<compile_context>
chip_gen: v7x
topology: tpu7x:2x2x1
jax: 0.10.0
libtpu: 0.0.40
codegen_flags: <defaults>
</compile_context>

<pallas_src>
import functools
import math

import jax
import jax.numpy as jnp
from jax.experimental import pallas as pl
from jax.experimental.pallas import tpu as pltpu

EPS = 1e-5                 # nn.LayerNorm default
APPROX_RECIPROCAL = True   # exact-divide fallback for parity tests if False

# rows of the packed "vecs" slab (all 1-row parameters, f32, zero padded):
#  0 norm_exc.weight   1 norm_exc.bias
#  2 dw[0].bias (2D)   3 dw[3].bias (D)
#  4 q bias (scaled)   5 k bias        6 v bias
#  7 out_proj.bias
#  8 norm1.weight      9 norm1.bias
# 10 linear1.bias(dff) 11 linear2.bias (D)
# 12 norm2.weight     13 norm2.bias
_NUM_VEC_ROWS = 14

PACKED_ORDER = ("vecs", "w_qkv", "w_o", "w_dw1", "w_dw2", "w_ff1", "w_ff2")


# ----------------------------------------------------------------------------
# kernel (one grid step == one batch element)
# ----------------------------------------------------------------------------
def decoder_cfa_kernel(tgt_ref, exc_ref, posd_ref, mem_ref, pose_ref,
                       vecs_ref, wqkv_ref, wo_ref, wdw1_ref, wdw2_ref,
                       wff1_ref, wff2_ref,
                       tgt_out_ref, exc_out_ref, *, nhead):
    f32 = jnp.float32
    bf16 = jnp.bfloat16

    D = tgt_ref.shape[-1]           # d_model
    D2 = wdw2_ref.shape[0]          # 2 * d_model
    dff = wff1_ref.shape[-1]        # feedforward width
    Lq = tgt_ref.shape[1]
    Lk = mem_ref.shape[1]
    hd = D // nhead

    tgt = tgt_ref[0]                # (Lq, D) f32
    exc = exc_ref[0]                # (Lq, D) f32
    posd = posd_ref[0]              # (Lq, D) f32

    def vrow(i, w):                 # one packed 1-row parameter, shape (1, w)
        return vecs_ref[i:i + 1, 0:w]

    def ln(x, gi, bi):              # LayerNorm (f32, biased variance, eps=1e-5)
        mu = jnp.mean(x, axis=-1, keepdims=True)
        xc = x - mu
        var = jnp.mean(xc * xc, axis=-1, keepdims=True)
        return xc * jax.lax.rsqrt(var + EPS) * vrow(gi, D) + vrow(bi, D)

    # preq = tgt + pos_dec ; exc = norm_exc(exc)
    preq = tgt + posd
    excn = ln(exc, 0, 1)

    # dw gating MLP: Linear(2D,2D) + ReLU + Linear(2D,D); the concat is
    # avoided by splitting the first-layer weight into preq / exc halves.
    h = (jnp.dot(preq.astype(bf16), wdw1_ref[0], preferred_element_type=f32)
         + jnp.dot(excn.astype(bf16), wdw1_ref[1], preferred_element_type=f32)
         + vrow(2, D2))
    h = jnp.maximum(h, 0.0)
    gate = (jnp.dot(h.astype(bf16), wdw2_ref[...], preferred_element_type=f32)
            + vrow(3, D))

    # q = preq + exc * mask ; k = memory + pos_enc ; v = memory
    q_in = (preq + excn * gate).astype(bf16)
    k_in = mem_ref[0] + pose_ref[0]         # bf16 add
    v_in = mem_ref[0]                       # bf16

    # full-width, lane-dense (D x D) projections (1/sqrt(hd) folded in W_q/b_q)
    q = jnp.dot(q_in, wqkv_ref[0], preferred_element_type=f32) + vrow(4, D)
    k = jnp.dot(k_in, wqkv_ref[1], preferred_element_type=f32) + vrow(5, D)
    v = jnp.dot(v_in, wqkv_ref[2], preferred_element_type=f32) + vrow(6, D)

    # head split on the XLU: (L, D) -> (H, L, hd)
    qh = jnp.transpose(q.reshape(Lq, nhead, hd), (1, 0, 2)).astype(bf16)
    kh = jnp.transpose(k.reshape(Lk, nhead, hd), (1, 0, 2)).astype(bf16)
    vh = jnp.transpose(v.reshape(Lk, nhead, hd), (1, 0, 2)).astype(bf16)

    # batched-head attention (per-batch -> no block-diagonal bias needed)
    s = jnp.einsum('hqd,hkd->hqk', qh, kh, preferred_element_type=f32)
    s = s - jnp.max(s, axis=-1, keepdims=True)
    p = jnp.exp(s)
    denom = jnp.sum(p, axis=-1, keepdims=True)
    if APPROX_RECIPROCAL:
        p = p * pl.reciprocal(denom, approx=True)
    else:
        p = p / denom
    ctx = jnp.einsum('hqk,hkd->hqd', p.astype(bf16), vh,
                     preferred_element_type=f32)

    # merge heads back: (H, Lq, hd) -> (Lq, D); single (D x D) out-projection
    ctx2 = jnp.transpose(ctx, (1, 0, 2)).reshape(Lq, D)
    attn = (jnp.dot(ctx2.astype(bf16), wo_ref[...], preferred_element_type=f32)
            + vrow(7, D))

    # residual + norm1
    t = ln(tgt + attn, 8, 9)

    # FFN (relu) + residual + norm2
    ff = (jnp.dot(t.astype(bf16), wff1_ref[...], preferred_element_type=f32)
          + vrow(10, dff))
    ff = jnp.maximum(ff, 0.0)
    ff2 = (jnp.dot(ff.astype(bf16), wff2_ref[...], preferred_element_type=f32)
           + vrow(11, D))
    t = ln(t + ff2, 12, 13)

    tgt_out_ref[0] = t              # tgt output
    exc_out_ref[0] = excn           # normalized exc output


# ----------------------------------------------------------------------------
# parameter construction (PyTorch layout) and packing into kernel slabs
# ----------------------------------------------------------------------------
def make_params(key, d_model, dff):
    D, D2 = d_model, 2 * d_model
    ks = jax.random.split(key, 12)
    n = lambda k, shp, s=0.05: jax.random.normal(k, shp, jnp.float32) * s
    return {
        "in_proj_weight": n(ks[0], (3 * D, D)),
        "in_proj_bias": n(ks[1], (3 * D,), 0.01),
        "out_proj_weight": n(ks[2], (D, D)),
        "out_proj_bias": n(ks[3], (D,), 0.01),
        "linear1_weight": n(ks[4], (dff, D)),
        "linear1_bias": n(ks[5], (dff,), 0.01),
        "linear2_weight": n(ks[6], (D, dff)),
        "linear2_bias": n(ks[7], (D,), 0.01),
        "dw0_weight": n(ks[8], (D2, D2)),
        "dw0_bias": n(ks[9], (D2,), 0.01),
        "dw3_weight": n(ks[10], (D, D2)),
        "dw3_bias": n(ks[11], (D,), 0.01),
        "norm_exc_weight": jnp.ones((D,), jnp.float32),
        "norm_exc_bias": jnp.zeros((D,), jnp.float32),
        "norm1_weight": jnp.ones((D,), jnp.float32),
        "norm1_bias": jnp.zeros((D,), jnp.float32),
        "norm2_weight": jnp.ones((D,), jnp.float32),
        "norm2_bias": jnp.zeros((D,), jnp.float32),
    }


def pack_params(p, d_model, nhead, dff, w_dtype=jnp.bfloat16):
    """One-time packing: transpose, fold 1/sqrt(hd) into W_q/b_q, cast bf16."""
    D = d_model
    hd = D // nhead
    scale = 1.0 / math.sqrt(hd)

    wq_t = p["in_proj_weight"][0:D].T * scale        # scale folded in
    wk_t = p["in_proj_weight"][D:2 * D].T
    wv_t = p["in_proj_weight"][2 * D:3 * D].T
    w_qkv = jnp.stack([wq_t, wk_t, wv_t], 0).astype(w_dtype)   # (3, D, D)

    bq = p["in_proj_bias"][0:D] * scale
    bk = p["in_proj_bias"][D:2 * D]
    bv = p["in_proj_bias"][2 * D:3 * D]

    w_o = p["out_proj_weight"].T.astype(w_dtype)     # (D, D)
    dw0_t = p["dw0_weight"].T                        # (2D, 2D)
    w_dw1 = jnp.stack([dw0_t[0:D], dw0_t[D:2 * D]], 0).astype(w_dtype)  # (2, D, 2D)
    w_dw2 = p["dw3_weight"].T.astype(w_dtype)        # (2D, D)
    w_ff1 = p["linear1_weight"].T.astype(w_dtype)    # (D, dff)
    w_ff2 = p["linear2_weight"].T.astype(w_dtype)    # (dff, D)

    width = max(D, 2 * D, dff)
    rows = [
        (p["norm_exc_weight"], D), (p["norm_exc_bias"], D),
        (p["dw0_bias"], 2 * D), (p["dw3_bias"], D),
        (bq, D), (bk, D), (bv, D),
        (p["out_proj_bias"], D),
        (p["norm1_weight"], D), (p["norm1_bias"], D),
        (p["linear1_bias"], dff), (p["linear2_bias"], D),
        (p["norm2_weight"], D), (p["norm2_bias"], D),
    ]
    assert len(rows) == _NUM_VEC_ROWS
    vecs = jnp.zeros((_NUM_VEC_ROWS, width), jnp.float32)
    for i, (v, w) in enumerate(rows):
        vecs = vecs.at[i, :w].set(v.astype(jnp.float32))

    return dict(vecs=vecs, w_qkv=w_qkv, w_o=w_o,
                w_dw1=w_dw1, w_dw2=w_dw2, w_ff1=w_ff1, w_ff2=w_ff2)


# ----------------------------------------------------------------------------
# wrapper
# ----------------------------------------------------------------------------
def decoder_cfa_forward(tgt, memory, exc, pos_dec, pos_enc, packed, nhead):
    """Inputs in PyTorch (L, B, D) convention; returns (tgt_out, exc_out)."""
    Lq, B, D = tgt.shape
    Lk = memory.shape[0]

    bm = lambda x: jnp.transpose(x, (1, 0, 2))       # (L,B,D) -> (B,L,D)
    tgt_b = bm(tgt)
    exc_b = bm(exc)
    posd_b = bm(pos_dec)
    # key-side activations only feed bf16 matmuls -> cast once in the wrapper
    mem_b = bm(memory).astype(jnp.bfloat16)
    pose_b = bm(pos_enc).astype(jnp.bfloat16)

    q_spec = pl.BlockSpec((1, Lq, D), lambda b: (b, 0, 0))
    k_spec = pl.BlockSpec((1, Lk, D), lambda b: (b, 0, 0))

    def w_spec(a):                                   # resident across the grid
        nd = a.ndim
        return pl.BlockSpec(a.shape, lambda b, _n=nd: (0,) * _n)

    in_specs = ([q_spec, q_spec, q_spec, k_spec, k_spec]
                + [w_spec(packed[k]) for k in PACKED_ORDER])
    out_specs = [pl.BlockSpec((1, Lq, D), lambda b: (b, 0, 0)),
                 pl.BlockSpec((1, Lq, D), lambda b: (b, 0, 0))]
    out_shape = (jax.ShapeDtypeStruct((B, Lq, D), jnp.float32),
                 jax.ShapeDtypeStruct((B, Lq, D), jnp.float32))

    kernel = functools.partial(decoder_cfa_kernel, nhead=nhead)

    tgt_out, exc_out = pl.pallas_call(
        kernel,
        out_shape=out_shape,
        grid_spec=pltpu.PrefetchScalarGridSpec(
            num_scalar_prefetch=0,
            grid=(B,),
            in_specs=in_specs,
            out_specs=out_specs),
        compiler_params=pltpu.CompilerParams(
            dimension_semantics=("parallel",)),
    )(tgt_b, exc_b, posd_b, mem_b, pose_b,
      *[packed[k] for k in PACKED_ORDER])

    unbm = lambda x: jnp.transpose(x, (1, 0, 2))     # (B,L,D) -> (L,B,D)
    return unbm(tgt_out), unbm(exc_out)


# ----------------------------------------------------------------------------
# pure-JAX f32 reference (PyTorch semantics, eval-mode dropout)
# ----------------------------------------------------------------------------
def reference_forward(tgt, memory, exc, pos_dec, pos_enc, p, nhead):
    D = tgt.shape[-1]
    hd = D // nhead

    def ln(x, g, b):
        mu = x.mean(-1, keepdims=True)
        var = ((x - mu) ** 2).mean(-1, keepdims=True)
        return (x - mu) / jnp.sqrt(var + EPS) * g + b

    preq = tgt + pos_dec
    excn = ln(exc, p["norm_exc_weight"], p["norm_exc_bias"])
    cat = jnp.concatenate([preq, excn], -1)
    h = jnp.maximum(cat @ p["dw0_weight"].T + p["dw0_bias"], 0.0)
    gate = h @ p["dw3_weight"].T + p["dw3_bias"]
    q = preq + excn * gate
    k = memory + pos_enc
    v = memory

    Lq, B, _ = q.shape
    Lk = k.shape[0]
    wq, wk, wv = (p["in_proj_weight"][0:D], p["in_proj_weight"][D:2 * D],
                  p["in_proj_weight"][2 * D:])
    bq, bk, bv = (p["in_proj_bias"][0:D], p["in_proj_bias"][D:2 * D],
                  p["in_proj_bias"][2 * D:])
    qp = q @ wq.T + bq
    kp = k @ wk.T + bk
    vp = v @ wv.T + bv

    def heads(x, L):                                 # (L,B,D) -> (B,H,L,hd)
        return jnp.transpose(x.reshape(L, B, nhead, hd), (1, 2, 0, 3))

    qh = heads(qp, Lq) / math.sqrt(hd)
    kh = heads(kp, Lk)
    vh = heads(vp, Lk)
    s = jnp.einsum('bhqd,bhkd->bhqk', qh, kh)
    attn_w = jax.nn.softmax(s, axis=-1)
    ctx = jnp.einsum('bhqk,bhkd->bhqd', attn_w, vh)  # (B,H,Lq,hd)
    ctx = jnp.transpose(ctx, (2, 0, 1, 3)).reshape(Lq, B, D)
    attn = ctx @ p["out_proj_weight"].T + p["out_proj_bias"]

    t = ln(tgt + attn, p["norm1_weight"], p["norm1_bias"])
    ff = jnp.maximum(t @ p["linear1_weight"].T + p["linear1_bias"], 0.0)
    ff2 = ff @ p["linear2_weight"].T + p["linear2_bias"]
    t = ln(t + ff2, p["norm2_weight"], p["norm2_bias"])
    return t, excn


# ----------------------------------------------------------------------------
# demo
# ----------------------------------------------------------------------------
if __name__ == "__main__":
    d_model, nhead, dff = 128, 4, 256
    Lq, Lk, B = 16, 32, 2

    key = jax.random.PRNGKey(0)
    k_par, k_t, k_m, k_e, k_pd, k_pe = jax.random.split(key, 6)

    torch_style_params = make_params(k_par, d_model, dff)
    packed = pack_params(torch_style_params, d_model, nhead, dff)

    tgt = jax.random.normal(k_t, (Lq, B, d_model), jnp.float32)
    memory = jax.random.normal(k_m, (Lk, B, d_model), jnp.float32)
    exc = jax.random.normal(k_e, (Lq, B, d_model), jnp.float32)
    pos_dec = jax.random.normal(k_pd, (Lq, B, d_model), jnp.float32)
    pos_enc = jax.random.normal(k_pe, (Lk, B, d_model), jnp.float32)

    tgt_out, exc_out = decoder_cfa_forward(
        tgt, memory, exc, pos_dec, pos_enc, packed, nhead)
    jax.block_until_ready((tgt_out, exc_out))

    assert tgt_out.shape == (Lq, B, d_model)
    assert exc_out.shape == (Lq, B, d_model)
    assert bool(jnp.all(jnp.isfinite(tgt_out)))
    assert bool(jnp.all(jnp.isfinite(exc_out)))

    # loose parity vs. pure-f32 reference (kernel uses bf16 matmuls + approx
    # reciprocal, so tolerance is bf16-level, not exact)
    ref_tgt, ref_exc = reference_forward(
        tgt, memory, exc, pos_dec, pos_enc, torch_style_params, nhead)
    assert float(jnp.max(jnp.abs(tgt_out - ref_tgt))) < 0.15
    assert float(jnp.max(jnp.abs(exc_out - ref_exc))) < 0.05

    print("KERNEL_OK")
</pallas_src>

<mosaic_0001>
module attributes {stable_mosaic.version = 11 : i64} {
  func.func @decoder_cfa_kernel(%arg0: i32, %arg1: memref<1x16x128xf32, #tpu.memory_space<vmem>>, %arg2: memref<1x16x128xf32, #tpu.memory_space<vmem>>, %arg3: memref<1x16x128xf32, #tpu.memory_space<vmem>>, %arg4: memref<1x32x128xbf16, #tpu.memory_space<vmem>>, %arg5: memref<1x32x128xbf16, #tpu.memory_space<vmem>>, %arg6: memref<14x256xf32, #tpu.memory_space<vmem>>, %arg7: memref<3x128x128xbf16, #tpu.memory_space<vmem>>, %arg8: memref<128x128xbf16, #tpu.memory_space<vmem>>, %arg9: memref<2x128x256xbf16, #tpu.memory_space<vmem>>, %arg10: memref<256x128xbf16, #tpu.memory_space<vmem>>, %arg11: memref<128x256xbf16, #tpu.memory_space<vmem>>, %arg12: memref<256x128xbf16, #tpu.memory_space<vmem>>, %arg13: memref<1x16x128xf32, #tpu.memory_space<vmem>>, %arg14: memref<1x16x128xf32, #tpu.memory_space<vmem>>) attributes {dimension_semantics = [#tpu.dimension_semantics<parallel>], iteration_bounds = array<i64: 2>, scalar_prefetch = 0 : i64, scratch_operands = 0 : i64, tpu.core_type = #tpu.core_type<tc>, window_params = [{transform_indices = @transform_0, window_bounds = array<i64: 1, 16, 128>}, {transform_indices = @transform_1, window_bounds = array<i64: 1, 16, 128>}, {transform_indices = @transform_2, window_bounds = array<i64: 1, 16, 128>}, {transform_indices = @transform_3, window_bounds = array<i64: 1, 32, 128>}, {transform_indices = @transform_4, window_bounds = array<i64: 1, 32, 128>}, {pipeline_mode = #tpu.pipeline_mode<synchronous>, transform_indices = @transform_5, window_bounds = array<i64: 14, 256>}, {pipeline_mode = #tpu.pipeline_mode<synchronous>, transform_indices = @transform_6, window_bounds = array<i64: 3, 128, 128>}, {pipeline_mode = #tpu.pipeline_mode<synchronous>, transform_indices = @transform_7, window_bounds = array<i64: 128, 128>}, {pipeline_mode = #tpu.pipeline_mode<synchronous>, transform_indices = @transform_8, window_bounds = array<i64: 2, 128, 256>}, {pipeline_mode = #tpu.pipeline_mode<synchronous>, transform_indices = @transform_9, window_bounds = array<i64: 256, 128>}, {pipeline_mode = #tpu.pipeline_mode<synchronous>, transform_indices = @transform_10, window_bounds = array<i64: 128, 256>}, {pipeline_mode = #tpu.pipeline_mode<synchronous>, transform_indices = @transform_11, window_bounds = array<i64: 256, 128>}, {transform_indices = @transform_12, window_bounds = array<i64: 1, 16, 128>}, {transform_indices = @transform_13, window_bounds = array<i64: 1, 16, 128>}]} {
    %c0 = arith.constant 0 : index
    %c0_0 = arith.constant 0 : index
    %c0_1 = arith.constant 0 : index
    %0 = vector.load %arg1[%c0, %c0_0, %c0_1] : memref<1x16x128xf32, #tpu.memory_space<vmem>>, vector<1x16x128xf32>
    %1 = vector.shape_cast %0 : vector<1x16x128xf32> to vector<16x128xf32>
    %c0_2 = arith.constant 0 : index
    %c0_3 = arith.constant 0 : index
    %c0_4 = arith.constant 0 : index
    %2 = vector.load %arg2[%c0_2, %c0_3, %c0_4] : memref<1x16x128xf32, #tpu.memory_space<vmem>>, vector<1x16x128xf32>
    %3 = vector.shape_cast %2 : vector<1x16x128xf32> to vector<16x128xf32>
    %c0_5 = arith.constant 0 : index
    %c0_6 = arith.constant 0 : index
    %c0_7 = arith.constant 0 : index
    %4 = vector.load %arg3[%c0_5, %c0_6, %c0_7] : memref<1x16x128xf32, #tpu.memory_space<vmem>>, vector<1x16x128xf32>
    %5 = vector.shape_cast %4 : vector<1x16x128xf32> to vector<16x128xf32>
    %6 = arith.addf %1, %5 : vector<16x128xf32>
    %cst = arith.constant dense<0.000000e+00> : vector<16xf32>
    %7 = vector.multi_reduction <add>, %3, %cst [1] : vector<16x128xf32> to vector<16xf32>
    %8 = vector.shape_cast %7 : vector<16xf32> to vector<16x1xf32>
    %cst_8 = arith.constant 1.280000e+02 : f32
    %9 = vector.broadcast %cst_8 : f32 to vector<16x1xf32>
    %10 = arith.divf %8, %9 : vector<16x1xf32>
    %11 = vector.broadcast %10 : vector<16x1xf32> to vector<16x128xf32>
    %12 = arith.subf %3, %11 : vector<16x128xf32>
    %13 = arith.mulf %12, %12 : vector<16x128xf32>
    %cst_9 = arith.constant dense<0.000000e+00> : vector<16xf32>
    %14 = vector.multi_reduction <add>, %13, %cst_9 [1] : vector<16x128xf32> to vector<16xf32>
    %15 = vector.shape_cast %14 : vector<16xf32> to vector<16x1xf32>
    %cst_10 = arith.constant 1.280000e+02 : f32
    %16 = vector.broadcast %cst_10 : f32 to vector<16x1xf32>
    %17 = arith.divf %15, %16 : vector<16x1xf32>
    %cst_11 = arith.constant 9.99999974E-6 : f32
    %18 = vector.broadcast %cst_11 : f32 to vector<16x1xf32>
    %19 = arith.addf %17, %18 : vector<16x1xf32>
    %20 = math.rsqrt %19 : vector<16x1xf32>
    %21 = vector.broadcast %20 : vector<16x1xf32> to vector<16x128xf32>
    %22 = arith.mulf %12, %21 : vector<16x128xf32>
    %c0_12 = arith.constant 0 : index
    %c0_13 = arith.constant 0 : index
    %23 = vector.load %arg6[%c0_12, %c0_13] : memref<14x256xf32, #tpu.memory_space<vmem>>, vector<1x128xf32>
    %24 = vector.broadcast %23 : vector<1x128xf32> to vector<16x128xf32>
    %25 = arith.mulf %22, %24 : vector<16x128xf32>
    %c1 = arith.constant 1 : index
    %c0_14 = arith.constant 0 : index
    %26 = vector.load %arg6[%c1, %c0_14] : memref<14x256xf32, #tpu.memory_space<vmem>>, vector<1x128xf32>
    %27 = vector.broadcast %26 : vector<1x128xf32> to vector<16x128xf32>
    %28 = arith.addf %25, %27 : vector<16x128xf32>
    %29 = arith.truncf %6 : vector<16x128xf32> to vector<16x128xbf16>
    %c0_15 = arith.constant 0 : index
    %c0_16 = arith.constant 0 : index
    %c0_17 = arith.constant 0 : index
    %30 = vector.load %arg9[%c0_15, %c0_16, %c0_17] : memref<2x128x256xbf16, #tpu.memory_space<vmem>>, vector<1x128x256xbf16>
    %31 = vector.shape_cast %30 : vector<1x128x256xbf16> to vector<128x256xbf16>
    %cst_18 = arith.constant dense<0.000000e+00> : vector<16x256xf32>
    %32 = tpu.matmul %29, %31, %cst_18 {dimension_numbers = #tpu.dot_dimension_numbers<[1], [0], [0], [1], [0, 0, 1, 1], [], []>} : vector<16x128xbf16>, vector<128x256xbf16>, vector<16x256xf32> -> vector<16x256xf32>
    %33 = arith.truncf %28 : vector<16x128xf32> to vector<16x128xbf16>
    %c1_19 = arith.constant 1 : index
    %c0_20 = arith.constant 0 : index
    %c0_21 = arith.constant 0 : index
    %34 = vector.load %arg9[%c1_19, %c0_20, %c0_21] : memref<2x128x256xbf16, #tpu.memory_space<vmem>>, vector<1x128x256xbf16>
    %35 = vector.shape_cast %34 : vector<1x128x256xbf16> to vector<128x256xbf16>
    %cst_22 = arith.constant dense<0.000000e+00> : vector<16x256xf32>
    %36 = tpu.matmul %33, %35, %cst_22 {dimension_numbers = #tpu.dot_dimension_numbers<[1], [0], [0], [1], [0, 0, 1, 1], [], []>} : vector<16x128xbf16>, vector<128x256xbf16>, vector<16x256xf32> -> vector<16x256xf32>
    %37 = arith.addf %32, %36 : vector<16x256xf32>
    %c2 = arith.constant 2 : index
    %c0_23 = arith.constant 0 : index
    %38 = vector.load %arg6[%c2, %c0_23] : memref<14x256xf32, #tpu.memory_space<vmem>>, vector<1x256xf32>
    %39 = vector.broadcast %38 : vector<1x256xf32> to vector<16x256xf32>
    %40 = arith.addf %37, %39 : vector<16x256xf32>
    %cst_24 = arith.constant 0.000000e+00 : f32
    %41 = vector.broadcast %cst_24 : f32 to vector<16x256xf32>
    %42 = arith.maximumf %40, %41 : vector<16x256xf32>
    %43 = arith.truncf %42 : vector<16x256xf32> to vector<16x256xbf16>
    %c0_25 = arith.constant 0 : index
    %c0_26 = arith.constant 0 : index
    %44 = vector.load %arg10[%c0_25, %c0_26] : memref<256x128xbf16, #tpu.memory_space<vmem>>, vector<256x128xbf16>
    %cst_27 = arith.constant dense<0.000000e+00> : vector<16x128xf32>
    %45 = tpu.matmul %43, %44, %cst_27 {dimension_numbers = #tpu.dot_dimension_numbers<[1], [0], [0], [1], [0, 0, 1, 1], [], []>} : vector<16x256xbf16>, vector<256x128xbf16>, vector<16x128xf32> -> vector<16x128xf32>
    %c3 = arith.constant 3 : index
    %c0_28 = arith.constant 0 : index
    %46 = vector.load %arg6[%c3, %c0_28] : memref<14x256xf32, #tpu.memory_space<vmem>>, vector<1x128xf32>
    %47 = vector.broadcast %46 : vector<1x128xf32> to vector<16x128xf32>
    %48 = arith.addf %45, %47 : vector<16x128xf32>
    %49 = arith.mulf %28, %48 : vector<16x128xf32>
    %50 = arith.addf %6, %49 : vector<16x128xf32>
    %51 = arith.truncf %50 : vector<16x128xf32> to vector<16x128xbf16>
    %c0_29 = arith.constant 0 : index
    %c0_30 = arith.constant 0 : index
    %c0_31 = arith.constant 0 : index
    %52 = vector.load %arg4[%c0_29, %c0_30, %c0_31] : memref<1x32x128xbf16, #tpu.memory_space<vmem>>, vector<1x32x128xbf16>
    %53 = vector.shape_cast %52 : vector<1x32x128xbf16> to vector<32x128xbf16>
    %c0_32 = arith.constant 0 : index
    %c0_33 = arith.constant 0 : index
    %c0_34 = arith.constant 0 : index
    %54 = vector.load %arg5[%c0_32, %c0_33, %c0_34] : memref<1x32x128xbf16, #tpu.memory_space<vmem>>, vector<1x32x128xbf16>
    %55 = vector.shape_cast %54 : vector<1x32x128xbf16> to vector<32x128xbf16>
    %56 = arith.addf %53, %55 : vector<32x128xbf16>
    %c0_35 = arith.constant 0 : index
    %c0_36 = arith.constant 0 : index
    %c0_37 = arith.constant 0 : index
    %57 = vector.load %arg4[%c0_35, %c0_36, %c0_37] : memref<1x32x128xbf16, #tpu.memory_space<vmem>>, vector<1x32x128xbf16>
    %58 = vector.shape_cast %57 : vector<1x32x128xbf16> to vector<32x128xbf16>
    %c0_38 = arith.constant 0 : index
    %c0_39 = arith.constant 0 : index
    %c0_40 = arith.constant 0 : index
    %59 = vector.load %arg7[%c0_38, %c0_39, %c0_40] : memref<3x128x128xbf16, #tpu.memory_space<vmem>>, vector<1x128x128xbf16>
    %60 = vector.shape_cast %59 : vector<1x128x128xbf16> to vector<128x128xbf16>
    %cst_41 = arith.constant dense<0.000000e+00> : vector<16x128xf32>
    %61 = tpu.matmul %51, %60, %cst_41 {dimension_numbers = #tpu.dot_dimension_numbers<[1], [0], [0], [1], [0, 0, 1, 1], [], []>} : vector<16x128xbf16>, vector<128x128xbf16>, vector<16x128xf32> -> vector<16x128xf32>
    %c4 = arith.constant 4 : index
    %c0_42 = arith.constant 0 : index
    %62 = vector.load %arg6[%c4, %c0_42] : memref<14x256xf32, #tpu.memory_space<vmem>>, vector<1x128xf32>
    %63 = vector.broadcast %62 : vector<1x128xf32> to vector<16x128xf32>
    %64 = arith.addf %61, %63 : vector<16x128xf32>
    %c1_43 = arith.constant 1 : index
    %c0_44 = arith.constant 0 : index
    %c0_45 = arith.constant 0 : index
    %65 = vector.load %arg7[%c1_43, %c0_44, %c0_45] : memref<3x128x128xbf16, #tpu.memory_space<vmem>>, vector<1x128x128xbf16>
    %66 = vector.shape_cast %65 : vector<1x128x128xbf16> to vector<128x128xbf16>
    %cst_46 = arith.constant dense<0.000000e+00> : vector<32x128xf32>
    %67 = tpu.matmul %56, %66, %cst_46 {dimension_numbers = #tpu.dot_dimension_numbers<[1], [0], [0], [1], [0, 0, 1, 1], [], []>} : vector<32x128xbf16>, vector<128x128xbf16>, vector<32x128xf32> -> vector<32x128xf32>
    %c5 = arith.constant 5 : index
    %c0_47 = arith.constant 0 : index
    %68 = vector.load %arg6[%c5, %c0_47] : memref<14x256xf32, #tpu.memory_space<vmem>>, vector<1x128xf32>
    %69 = vector.broadcast %68 : vector<1x128xf32> to vector<32x128xf32>
    %70 = arith.addf %67, %69 : vector<32x128xf32>
    %c2_48 = arith.constant 2 : index
    %c0_49 = arith.constant 0 : index
    %c0_50 = arith.constant 0 : index
    %71 = vector.load %arg7[%c2_48, %c0_49, %c0_50] : memref<3x128x128xbf16, #tpu.memory_space<vmem>>, vector<1x128x128xbf16>
    %72 = vector.shape_cast %71 : vector<1x128x128xbf16> to vector<128x128xbf16>
    %cst_51 = arith.constant dense<0.000000e+00> : vector<32x128xf32>
    %73 = tpu.matmul %58, %72, %cst_51 {dimension_numbers = #tpu.dot_dimension_numbers<[1], [0], [0], [1], [0, 0, 1, 1], [], []>} : vector<32x128xbf16>, vector<128x128xbf16>, vector<32x128xf32> -> vector<32x128xf32>
    %c6 = arith.constant 6 : index
    %c0_52 = arith.constant 0 : index
    %74 = vector.load %arg6[%c6, %c0_52] : memref<14x256xf32, #tpu.memory_space<vmem>>, vector<1x128xf32>
    %75 = vector.broadcast %74 : vector<1x128xf32> to vector<32x128xf32>
    %76 = arith.addf %73, %75 : vector<32x128xf32>
    %77 = vector.shape_cast %64 : vector<16x128xf32> to vector<16x4x32xf32>
    %78 = tpu.transpose %77, [1, 0, 2] : vector<16x4x32xf32> -> vector<4x16x32xf32>
    %79 = arith.truncf %78 : vector<4x16x32xf32> to vector<4x16x32xbf16>
    %80 = vector.shape_cast %70 : vector<32x128xf32> to vector<32x4x32xf32>
    %81 = tpu.transpose %80, [1, 0, 2] : vector<32x4x32xf32> -> vector<4x32x32xf32>
    %82 = arith.truncf %81 : vector<4x32x32xf32> to vector<4x32x32xbf16>
    %83 = vector.shape_cast %76 : vector<32x128xf32> to vector<32x4x32xf32>
    %84 = tpu.transpose %83, [1, 0, 2] : vector<32x4x32xf32> -> vector<4x32x32xf32>
    %85 = arith.truncf %84 : vector<4x32x32xf32> to vector<4x32x32xbf16>
    "tpu.trace_start"() <{level = 10 : i32, message = "hqd,hkd->hqk"}> : () -> ()
    %cst_53 = arith.constant dense<0.000000e+00> : vector<4x16x32xf32>
    %86 = tpu.matmul %79, %82, %cst_53 {dimension_numbers = #tpu.dot_dimension_numbers<[2], [2], [1], [1], [0, 0, 0, 1, 1, 1], [0], [0]>} : vector<4x16x32xbf16>, vector<4x32x32xbf16>, vector<4x16x32xf32> -> vector<4x16x32xf32>
    "tpu.trace_stop"() : () -> ()
    %cst_54 = arith.constant dense<0xFF800000> : vector<4x16xf32>
    %87 = vector.multi_reduction <maximumf>, %86, %cst_54 [2] : vector<4x16x32xf32> to vector<4x16xf32>
    %88 = vector.shape_cast %87 : vector<4x16xf32> to vector<4x16x1xf32>
    %89 = vector.broadcast %88 : vector<4x16x1xf32> to vector<4x16x32xf32>
    %90 = arith.subf %86, %89 : vector<4x16x32xf32>
    %91 = math.exp %90 : vector<4x16x32xf32>
    %cst_55 = arith.constant dense<0.000000e+00> : vector<4x16xf32>
    %92 = vector.multi_reduction <add>, %91, %cst_55 [2] : vector<4x16x32xf32> to vector<4x16xf32>
    %93 = vector.shape_cast %92 : vector<4x16xf32> to vector<4x16x1xf32>
    %94 = tpu.reciprocal %93 {approx = true} : vector<4x16x1xf32> -> vector<4x16x1xf32>
    %95 = vector.broadcast %94 : vector<4x16x1xf32> to vector<4x16x32xf32>
    %96 = arith.mulf %91, %95 : vector<4x16x32xf32>
    %97 = arith.truncf %96 : vector<4x16x32xf32> to vector<4x16x32xbf16>
    "tpu.trace_start"() <{level = 10 : i32, message = "hqk,hkd->hqd"}> : () -> ()
    %cst_56 = arith.constant dense<0.000000e+00> : vector<4x16x32xf32>
    %98 = tpu.matmul %97, %85, %cst_56 {dimension_numbers = #tpu.dot_dimension_numbers<[2], [1], [1], [2], [0, 0, 0, 1, 1, 2], [0], [0]>} : vector<4x16x32xbf16>, vector<4x32x32xbf16>, vector<4x16x32xf32> -> vector<4x16x32xf32>
    "tpu.trace_stop"() : () -> ()
    %99 = tpu.transpose %98, [1, 0, 2] : vector<4x16x32xf32> -> vector<16x4x32xf32>
    %100 = vector.shape_cast %99 : vector<16x4x32xf32> to vector<16x128xf32>
    %101 = arith.truncf %100 : vector<16x128xf32> to vector<16x128xbf16>
    %c0_57 = arith.constant 0 : index
    %c0_58 = arith.constant 0 : index
    %102 = vector.load %arg8[%c0_57, %c0_58] : memref<128x128xbf16, #tpu.memory_space<vmem>>, vector<128x128xbf16>
    %cst_59 = arith.constant dense<0.000000e+00> : vector<16x128xf32>
    %103 = tpu.matmul %101, %102, %cst_59 {dimension_numbers = #tpu.dot_dimension_numbers<[1], [0], [0], [1], [0, 0, 1, 1], [], []>} : vector<16x128xbf16>, vector<128x128xbf16>, vector<16x128xf32> -> vector<16x128xf32>
    %c7 = arith.constant 7 : index
    %c0_60 = arith.constant 0 : index
    %104 = vector.load %arg6[%c7, %c0_60] : memref<14x256xf32, #tpu.memory_space<vmem>>, vector<1x128xf32>
    %105 = vector.broadcast %104 : vector<1x128xf32> to vector<16x128xf32>
    %106 = arith.addf %103, %105 : vector<16x128xf32>
    %107 = arith.addf %1, %106 : vector<16x128xf32>
    %cst_61 = arith.constant dense<0.000000e+00> : vector<16xf32>
    %108 = vector.multi_reduction <add>, %107, %cst_61 [1] : vector<16x128xf32> to vector<16xf32>
    %109 = vector.shape_cast %108 : vector<16xf32> to vector<16x1xf32>
    %cst_62 = arith.constant 1.280000e+02 : f32
    %110 = vector.broadcast %cst_62 : f32 to vector<16x1xf32>
    %111 = arith.divf %109, %110 : vector<16x1xf32>
    %112 = vector.broadcast %111 : vector<16x1xf32> to vector<16x128xf32>
    %113 = arith.subf %107, %112 : vector<16x128xf32>
    %114 = arith.mulf %113, %113 : vector<16x128xf32>
    %cst_63 = arith.constant dense<0.000000e+00> : vector<16xf32>
    %115 = vector.multi_reduction <add>, %114, %cst_63 [1] : vector<16x128xf32> to vector<16xf32>
    %116 = vector.shape_cast %115 : vector<16xf32> to vector<16x1xf32>
    %cst_64 = arith.constant 1.280000e+02 : f32
    %117 = vector.broadcast %cst_64 : f32 to vector<16x1xf32>
    %118 = arith.divf %116, %117 : vector<16x1xf32>
    %cst_65 = arith.constant 9.99999974E-6 : f32
    %119 = vector.broadcast %cst_65 : f32 to vector<16x1xf32>
    %120 = arith.addf %118, %119 : vector<16x1xf32>
    %121 = math.rsqrt %120 : vector<16x1xf32>
    %122 = vector.broadcast %121 : vector<16x1xf32> to vector<16x128xf32>
    %123 = arith.mulf %113, %122 : vector<16x128xf32>
    %c8 = arith.constant 8 : index
    %c0_66 = arith.constant 0 : index
    %124 = vector.load %arg6[%c8, %c0_66] : memref<14x256xf32, #tpu.memory_space<vmem>>, vector<1x128xf32>
    %125 = vector.broadcast %124 : vector<1x128xf32> to vector<16x128xf32>
    %126 = arith.mulf %123, %125 : vector<16x128xf32>
    %c9 = arith.constant 9 : index
    %c0_67 = arith.constant 0 : index
    %127 = vector.load %arg6[%c9, %c0_67] : memref<14x256xf32, #tpu.memory_space<vmem>>, vector<1x128xf32>
    %128 = vector.broadcast %127 : vector<1x128xf32> to vector<16x128xf32>
    %129 = arith.addf %126, %128 : vector<16x128xf32>
    %130 = arith.truncf %129 : vector<16x128xf32> to vector<16x128xbf16>
    %c0_68 = arith.constant 0 : index
    %c0_69 = arith.constant 0 : index
    %131 = vector.load %arg11[%c0_68, %c0_69] : memref<128x256xbf16, #tpu.memory_space<vmem>>, vector<128x256xbf16>
    %cst_70 = arith.constant dense<0.000000e+00> : vector<16x256xf32>
    %132 = tpu.matmul %130, %131, %cst_70 {dimension_numbers = #tpu.dot_dimension_numbers<[1], [0], [0], [1], [0, 0, 1, 1], [], []>} : vector<16x128xbf16>, vector<128x256xbf16>, vector<16x256xf32> -> vector<16x256xf32>
    %c10 = arith.constant 10 : index
    %c0_71 = arith.constant 0 : index
    %133 = vector.load %arg6[%c10, %c0_71] : memref<14x256xf32, #tpu.memory_space<vmem>>, vector<1x256xf32>
    %134 = vector.broadcast %133 : vector<1x256xf32> to vector<16x256xf32>
    %135 = arith.addf %132, %134 : vector<16x256xf32>
    %cst_72 = arith.constant 0.000000e+00 : f32
    %136 = vector.broadcast %cst_72 : f32 to vector<16x256xf32>
    %137 = arith.maximumf %135, %136 : vector<16x256xf32>
    %138 = arith.truncf %137 : vector<16x256xf32> to vector<16x256xbf16>
    %c0_73 = arith.constant 0 : index
    %c0_74 = arith.constant 0 : index
    %139 = vector.load %arg12[%c0_73, %c0_74] : memref<256x128xbf16, #tpu.memory_space<vmem>>, vector<256x128xbf16>
    %cst_75 = arith.constant dense<0.000000e+00> : vector<16x128xf32>
    %140 = tpu.matmul %138, %139, %cst_75 {dimension_numbers = #tpu.dot_dimension_numbers<[1], [0], [0], [1], [0, 0, 1, 1], [], []>} : vector<16x256xbf16>, vector<256x128xbf16>, vector<16x128xf32> -> vector<16x128xf32>
    %c11 = arith.constant 11 : index
    %c0_76 = arith.constant 0 : index
    %141 = vector.load %arg6[%c11, %c0_76] : memref<14x256xf32, #tpu.memory_space<vmem>>, vector<1x128xf32>
    %142 = vector.broadcast %141 : vector<1x128xf32> to vector<16x128xf32>
    %143 = arith.addf %140, %142 : vector<16x128xf32>
    %144 = arith.addf %129, %143 : vector<16x128xf32>
    %cst_77 = arith.constant dense<0.000000e+00> : vector<16xf32>
    %145 = vector.multi_reduction <add>, %144, %cst_77 [1] : vector<16x128xf32> to vector<16xf32>
    %146 = vector.shape_cast %145 : vector<16xf32> to vector<16x1xf32>
    %cst_78 = arith.constant 1.280000e+02 : f32
    %147 = vector.broadcast %cst_78 : f32 to vector<16x1xf32>
    %148 = arith.divf %146, %147 : vector<16x1xf32>
    %149 = vector.broadcast %148 : vector<16x1xf32> to vector<16x128xf32>
    %150 = arith.subf %144, %149 : vector<16x128xf32>
    %151 = arith.mulf %150, %150 : vector<16x128xf32>
    %cst_79 = arith.constant dense<0.000000e+00> : vector<16xf32>
    %152 = vector.multi_reduction <add>, %151, %cst_79 [1] : vector<16x128xf32> to vector<16xf32>
    %153 = vector.shape_cast %152 : vector<16xf32> to vector<16x1xf32>
    %cst_80 = arith.constant 1.280000e+02 : f32
    %154 = vector.broadcast %cst_80 : f32 to vector<16x1xf32>
    %155 = arith.divf %153, %154 : vector<16x1xf32>
    %cst_81 = arith.constant 9.99999974E-6 : f32
    %156 = vector.broadcast %cst_81 : f32 to vector<16x1xf32>
    %157 = arith.addf %155, %156 : vector<16x1xf32>
    %158 = math.rsqrt %157 : vector<16x1xf32>
    %159 = vector.broadcast %158 : vector<16x1xf32> to vector<16x128xf32>
    %160 = arith.mulf %150, %159 : vector<16x128xf32>
    %c12 = arith.constant 12 : index
    %c0_82 = arith.constant 0 : index
    %161 = vector.load %arg6[%c12, %c0_82] : memref<14x256xf32, #tpu.memory_space<vmem>>, vector<1x128xf32>
    %162 = vector.broadcast %161 : vector<1x128xf32> to vector<16x128xf32>
    %163 = arith.mulf %160, %162 : vector<16x128xf32>
    %c13 = arith.constant 13 : index
    %c0_83 = arith.constant 0 : index
    %164 = vector.load %arg6[%c13, %c0_83] : memref<14x256xf32, #tpu.memory_space<vmem>>, vector<1x128xf32>
    %165 = vector.broadcast %164 : vector<1x128xf32> to vector<16x128xf32>
    %166 = arith.addf %163, %165 : vector<16x128xf32>
    %c0_84 = arith.constant 0 : index
    %c0_85 = arith.constant 0 : index
    %c0_86 = arith.constant 0 : index
    %167 = vector.load %arg13[%c0_84, %c0_85, %c0_86] : memref<1x16x128xf32, #tpu.memory_space<vmem>>, vector<1x16x128xf32>
    %168 = vector.shape_cast %167 : vector<1x16x128xf32> to vector<16x128xf32>
    %169 = vector.shape_cast %166 : vector<16x128xf32> to vector<1x16x128xf32>
    tpu.vector_store %arg13[%c0_84, %c0_85, %c0_86], %169 {strides = array<i32>} : memref<1x16x128xf32, #tpu.memory_space<vmem>>, vector<1x16x128xf32>,
    %c0_87 = arith.constant 0 : index
    %c0_88 = arith.constant 0 : index
    %c0_89 = arith.constant 0 : index
    %170 = vector.load %arg14[%c0_87, %c0_88, %c0_89] : memref<1x16x128xf32, #tpu.memory_space<vmem>>, vector<1x16x128xf32>
    %171 = vector.shape_cast %170 : vector<1x16x128xf32> to vector<16x128xf32>
    %172 = vector.shape_cast %28 : vector<16x128xf32> to vector<1x16x128xf32>
    tpu.vector_store %arg14[%c0_87, %c0_88, %c0_89], %172 {strides = array<i32>} : memref<1x16x128xf32, #tpu.memory_space<vmem>>, vector<1x16x128xf32>,
    return
  }
  func.func @transform_0(%arg0: i32) -> (i32, i32, i32) {
    %c0_i32 = arith.constant 0 : i32
    %c0_i32_0 = arith.constant 0 : i32
    %c0_i32_1 = arith.constant 0 : i32
    return %arg0, %c0_i32, %c0_i32_0 : i32, i32, i32
  }
  func.func @transform_1(%arg0: i32) -> (i32, i32, i32) {
    %c0_i32 = arith.constant 0 : i32
    %c0_i32_0 = arith.constant 0 : i32
    %c0_i32_1 = arith.constant 0 : i32
    return %arg0, %c0_i32, %c0_i32_0 : i32, i32, i32
  }
  func.func @transform_2(%arg0: i32) -> (i32, i32, i32) {
    %c0_i32 = arith.constant 0 : i32
    %c0_i32_0 = arith.constant 0 : i32
    %c0_i32_1 = arith.constant 0 : i32
    return %arg0, %c0_i32, %c0_i32_0 : i32, i32, i32
  }
  func.func @transform_3(%arg0: i32) -> (i32, i32, i32) {
    %c0_i32 = arith.constant 0 : i32
    %c0_i32_0 = arith.constant 0 : i32
    %c0_i32_1 = arith.constant 0 : i32
    return %arg0, %c0_i32, %c0_i32_0 : i32, i32, i32
  }
  func.func @transform_4(%arg0: i32) -> (i32, i32, i32) {
    %c0_i32 = arith.constant 0 : i32
    %c0_i32_0 = arith.constant 0 : i32
    %c0_i32_1 = arith.constant 0 : i32
    return %arg0, %c0_i32, %c0_i32_0 : i32, i32, i32
  }
  func.func @transform_5(%arg0: i32) -> (i32, i32) {
    %c0_i32 = arith.constant 0 : i32
    %c0_i32_0 = arith.constant 0 : i32
    %c0_i32_1 = arith.constant 0 : i32
    return %c0_i32, %c0_i32_0 : i32, i32
  }
  func.func @transform_6(%arg0: i32) -> (i32, i32, i32) {
    %c0_i32 = arith.constant 0 : i32
    %c0_i32_0 = arith.constant 0 : i32
    %c0_i32_1 = arith.constant 0 : i32
    %c0_i32_2 = arith.constant 0 : i32
    return %c0_i32, %c0_i32_0, %c0_i32_1 : i32, i32, i32
  }
  func.func @transform_7(%arg0: i32) -> (i32, i32) {
    %c0_i32 = arith.constant 0 : i32
    %c0_i32_0 = arith.constant 0 : i32
    %c0_i32_1 = arith.constant 0 : i32
    return %c0_i32, %c0_i32_0 : i32, i32
  }
  func.func @transform_8(%arg0: i32) -> (i32, i32, i32) {
    %c0_i32 = arith.constant 0 : i32
    %c0_i32_0 = arith.constant 0 : i32
    %c0_i32_1 = arith.constant 0 : i32
    %c0_i32_2 = arith.constant 0 : i32
    return %c0_i32, %c0_i32_0, %c0_i32_1 : i32, i32, i32
  }
  func.func @transform_9(%arg0: i32) -> (i32, i32) {
    %c0_i32 = arith.constant 0 : i32
    %c0_i32_0 = arith.constant 0 : i32
    %c0_i32_1 = arith.constant 0 : i32
    return %c0_i32, %c0_i32_0 : i32, i32
  }
  func.func @transform_10(%arg0: i32) -> (i32, i32) {
    %c0_i32 = arith.constant 0 : i32
    %c0_i32_0 = arith.constant 0 : i32
    %c0_i32_1 = arith.constant 0 : i32
    return %c0_i32, %c0_i32_0 : i32, i32
  }
  func.func @transform_11(%arg0: i32) -> (i32, i32) {
    %c0_i32 = arith.constant 0 : i32
    %c0_i32_0 = arith.constant 0 : i32
    %c0_i32_1 = arith.constant 0 : i32
    return %c0_i32, %c0_i32_0 : i32, i32
  }
  func.func @transform_12(%arg0: i32) -> (i32, i32, i32) {
    %c0_i32 = arith.constant 0 : i32
    %c0_i32_0 = arith.constant 0 : i32
    %c0_i32_1 = arith.constant 0 : i32
    return %arg0, %c0_i32, %c0_i32_0 : i32, i32, i32
  }
  func.func @transform_13(%arg0: i32) -> (i32, i32, i32) {
    %c0_i32 = arith.constant 0 : i32
    %c0_i32_0 = arith.constant 0 : i32
    %c0_i32_1 = arith.constant 0 : i32
    return %arg0, %c0_i32, %c0_i32_0 : i32, i32, i32
  }
}

</mosaic_0001>

<bundles_post_ra>
// kernel: tpu_custom_call.1
= control target key start
LH: loop header
LB: loop body
LE: loop exit
PB: predicated region body
PF: predicated region fallthrough
CT: control target
= control target key end

     0   :  { %s7206_s0 = inlined_call_operand.hbm [shape: f32[2,16,128], index: 0, kind: input, shape index: {}]   ;;  %s7207_s1 = inlined_call_operand.hbm [shape: f32[2,16,128], index: 1, kind: input, shape index: {}]   ;;  %s7208_s2 = inlined_call_operand.hbm [shape: f32[2,16,128], index: 2, kind: input, shape index: {}]   ;;  %s7209_s3 = inlined_call_operand.hbm [shape: bf16[2,32,128], index: 3, kind: input, shape index: {}]   ;;  %s7210_s4 = inlined_call_operand.hbm [shape: bf16[2,32,128], index: 4, kind: input, shape index: {}]   ;;  %s7211_s5 = inlined_call_operand.hbm [shape: f32[14,256], index: 5, kind: input, shape index: {}]   ;;  %s7212_s6 = inlined_call_operand.hbm [shape: bf16[3,128,128], index: 6, kind: input, shape index: {}]   ;;  %s7213_s7 = inlined_call_operand.hbm [shape: bf16[128,128], index: 7, kind: input, shape index: {}]   ;;  %s7214_s8 = inlined_call_operand.hbm [shape: bf16[2,128,256], index: 8, kind: input, shape index: {}]   ;;  %s7215_s9 = inlined_call_operand.hbm [shape: bf16[256,128], index: 9, kind: input, shape index: {}]   ;;  %s7216_s10 = inlined_call_operand.hbm [shape: bf16[128,256], index: 10, kind: input, shape index: {}]   ;;  %s7217_s11 = inlined_call_operand.hbm [shape: bf16[256,128], index: 11, kind: input, shape index: {}]   ;;  %s7218_s12 = inlined_call_operand.hbm [shape: f32[2,16,128], index: 12, kind: output, shape index: {0}]   ;;  %s7219_s13 = inlined_call_operand.hbm [shape: f32[2,16,128], index: 13, kind: output, shape index: {1}]  }
   0x1   :  { %7256 = sst [smem:[#allocation42_spill]] %s7207_s1 }
   0x2   :  { %7257 = sst [smem:[#allocation43_spill]] %s7208_s2 }
   0x3   :  { %7258 = sst [smem:[#allocation44_spill]] %s7209_s3 }
   0x4   :  { %7259 = sst [smem:[#allocation45_spill]] %s7210_s4 }
   0x5   :  { %7260 = sst [smem:[#allocation46_spill]] %s7211_s5 }
   0x6   :  { %7261 = sst [smem:[#allocation47_spill]] %s7212_s6 }
   0x7   :  { %7262 = sst [smem:[#allocation48_spill]] %s7213_s7 }
   0x8   :  { %7263 = sst [smem:[#allocation49_spill]] %s7215_s9 }
   0x9   :  { %7264 = sst [smem:[#allocation50_spill]] %s7218_s12 }
   0xa   :  { %7265 = sst [smem:[#allocation51_spill]] %s7219_s13 }
   0xb   :  { %19 = vsyncpa [#allocation3], 0 }
   0xc   :  { %21 = vsyncpa [#allocation3 + $0x1], 0 }
   0xd   :  { %22 = vsyncpa [#allocation6], 0 }
   0xe   :  { %24 = vsyncpa [#allocation6 + $0x1], 0 }
   0xf   :  { %25 = vsyncpa [#allocation9], 0 }
  0x10   :  { %27 = vsyncpa [#allocation9 + $0x1], 0 }
  0x11   :  { %28 = vsyncpa [#allocation12], 0 }
  0x12   :  { %29 = vsyncpa [#allocation15], 0 }
  0x13   :  { %30 = vsyncpa [#allocation18], 0 }
  0x14   :  { %31 = vsyncpa [#allocation21], 0 }
  0x15   :  { %32 = vsyncpa [#allocation4], 0 }
  0x16   :  { %34 = vsyncpa [#allocation4 + $0x1], 0 }
  0x17   :  { %35 = vsyncpa [#allocation24], 0 }
  0x18   :  { %37 = vsyncpa [#allocation24 + $0x1], 0  ;;  %s6045_s25 = smov 0   ;;  %s6047_s26 = smov 0  }
  0x19   :  { %s6049_s27 = smov 0   ;;  %s6051_s28 = smov 0  }
  0x1a LB: > { %7266 = sst [smem:[#allocation34_spill]] %s5931_s25  ;;  %s5945_s29 = smov [#allocation11]   ;;  %s5943_s28 = sphi %s6051_s28, %s7323_s28   ;;  %s5939_s27 = sphi %s6049_s27, %s7327_s27   ;;  %s5935_s26 = sphi %s6047_s26, %s7326_s26   ;;  %s5931_s25 = sphi %s6045_s25, %s7325_s25  }
  0x1b   : > { %7267 = sst [smem:[#allocation35_spill]] %s5943_s28  ;;  %s389_s30 = sshll.u32 %s5945_s29, 4  ;;  %s6071_s30 = int_to_ptr.vmem [resolvable:$true] %s389_s30 }
  0x1c   : > { %s6066_s14 = sadd.s32 4294967295, %s5943_s28   ;;  %p4662_p0 = scmp.ge.s32.totalorder %s5943_s28, 1 }
  0x1d   : > { %7268 = sst [smem:[#allocation36_spill]] %s6066_s14  ;;  %p7225_p1 = scmp.eq.s32.totalorder %s6066_s14, 0 }
  0x1e   : > { %p377_p2 = scmp.lt.s32.totalorder %s5943_s28, 3  ;;  %s5946_s17 = smov [#allocation14]  }
  0x1f   : > { %s415_s18 = sshll.u32 %s5946_s17, 4  ;;  %s5947_s19 = smov [#allocation17]   ;;  %s6086_s18 = int_to_ptr.vmem [resolvable:$true] %s415_s18 }
  0x20   : > { %p6073_p3 = pnand %p4662_p0, %p377_p2  ;;  %s6088_s20 = sshll.u32 %s5947_s19, 4  ;;  %s442_s20 = int_to_ptr.vmem [resolvable:$true] %s6088_s20 }
  0x21   : > { %s7272_s5 = sld [smem:[#allocation46_spill]] }
  0x22   : > { %s7269_s15 = scalar_select %p6073_p3, 1, 0 }
  0x23   : > { %p5160_p5 = pneg %p6073_p3 }
  0x24   : > { %7270 = sst [smem:[#allocation37_spill]] %s7269_s15 }
  0x25   : > { %p6082_p6 = pnand %p5160_p5, %p7225_p1 }
  0x27   : > { %s7271_s16 = scalar_select %p6082_p6, 1, 0 }
  0x28   : > { %s5475_s23 = scalar_lea.hbm %s7272_s5, 512  ;;  %p6098_p8 = pneg %p6082_p6 }
  0x29   : > { %p5476_p7 = scmp.ne.s32.totalorder %s7272_s5, %s5475_s23  ;;  %p5482_p11 = scmp.lt.u32.totalorder %s5475_s23, %s7272_s5 }
  0x2a   : > { %s7273_s12 = scalar_select %p6098_p8, 1, 0 }
  0x2b   : > { %p5478_p9 = pnand %p6098_p8, %p5476_p7 }
  0x2d   : > { %p5479_p10 = pneg %p5478_p9 }
  0x2f   : > { %p5484_p12 = pnand %p5482_p11, %p5479_p10 }
  0x31   : > { %5487 = shalt.err (!%p5484_p12)
}
  0x32   : > { %s5488_s21 = scalar_lea.vmem %s6071_s30, 512  ;;  %p5496_p5 = scmp.lt.s32.totalorder %s6071_s30, %s6071_s30 }
  0x33   : > { %p5489_p13 = scmp.ne.s32.totalorder %s6071_s30, %s5488_s21  ;;  %p5497_p4 = scmp.lt.s32.totalorder %s5488_s21, %s5488_s21 }
  0x35   : > { %p5491_p0 = pnand %p5489_p13, %p6098_p8  ;;  %p5498_p7 = por %p5497_p4, %p5496_p5 }
  0x37   : > { %p5492_p2 = pneg %p5491_p0 }
  0x39   : > { %p5499_p9 = pnand %p5498_p7, %p5492_p2 }
  0x3b   : > { %5502 = shalt.err (!%p5499_p9)
}
  0x3c   : > { %s5948_s22 = smov 256   ;;  %s5949_s23 = smov 16  }
  0x3d   : > { %5163 = dma.hbm_to_vmem [thread:$0]  (!%p6082_p6), %s7272_s5, 512, %s6071_s30, [#allocation12], %s5948_s22, %s5948_s22, %s5949_s23  }
  0x3e   : > { %s7274_s7 = sld [smem:[#allocation48_spill]] }
  0x44   : > { %s5503_s13 = scalar_lea.hbm %s7274_s7, 1024 }
  0x45   : > { %p5504_p4 = scmp.ne.s32.totalorder %s7274_s7, %s5503_s13  ;;  %p5510_p12 = scmp.lt.u32.totalorder %s5503_s13, %s7274_s7 }
  0x47   : > { %p5506_p10 = pnand %p5504_p4, %p6098_p8 }
  0x49   : > { %p5507_p11 = pneg %p5506_p10 }
  0x4b   : > { %p5512_p13 = pnand %p5510_p12, %p5507_p11 }
  0x4d   : > { %5515 = shalt.err (!%p5512_p13)
}
  0x4e   : > { %s5516_s30 = scalar_lea.vmem %s6086_s18, 1024  ;;  %p5524_p7 = scmp.lt.s32.totalorder %s6086_s18, %s6086_s18 }
  0x4f   : > { %p5517_p0 = scmp.ne.s32.totalorder %s6086_s18, %s5516_s30  ;;  %p5525_p9 = scmp.lt.s32.totalorder %s5516_s30, %s5516_s30 }
  0x51   : > { %p5519_p2 = pnand %p5517_p0, %p6098_p8  ;;  %p5526_p4 = por %p5525_p9, %p5524_p7 }
  0x53   : > { %p5520_p5 = pneg %p5519_p2 }
  0x55   : > { %p5527_p10 = pnand %p5526_p4, %p5520_p5 }
  0x57   : > { %5530 = shalt.err (!%p5527_p10)
}
  0x58   : > { %s7227_s4 = smov 64   ;;  %s7229_s2 = smov 4  }
  0x59   : > { %5169 = dma.hbm_to_vmem [thread:$0]  (!%p6082_p6), %s7274_s7, 1024, %s6086_s18, [#allocation15], %s7227_s4, %s7227_s4, %s7229_s2  }
  0x5a   : > { %s7275_s9 = sld [smem:[#allocation49_spill]] }
  0x60   : > { %s5531_s24 = scalar_lea.hbm %s7275_s9, 2048 }
  0x61   : > { %p5532_p11 = scmp.ne.s32.totalorder %s7275_s9, %s5531_s24  ;;  %p5538_p0 = scmp.lt.u32.totalorder %s5531_s24, %s7275_s9 }
  0x63   : > { %p5534_p12 = pnand %p5532_p11, %p6098_p8 }
  0x65   : > { %p5535_p13 = pneg %p5534_p12 }
  0x67   : > { %p5540_p2 = pnand %p5538_p0, %p5535_p13 }
  0x69   : > { %5543 = shalt.err (!%p5540_p2)
}
  0x6a   : > { %s5544_s30 = scalar_lea.vmem %s442_s20, 2048  ;;  %p5552_p4 = scmp.lt.s32.totalorder %s442_s20, %s442_s20 }
  0x6b   : > { %p5545_p5 = scmp.ne.s32.totalorder %s442_s20, %s5544_s30  ;;  %p5553_p10 = scmp.lt.s32.totalorder %s5544_s30, %s5544_s30 }
  0x6d   : > { %p5547_p7 = pnand %p5545_p5, %p6098_p8  ;;  %p5554_p1 = por %p5553_p10, %p5552_p4 }
  0x6f   : > { %p5548_p9 = pneg %p5547_p7 }
  0x71   : > { %p5555_p3 = pnand %p5554_p1, %p5548_p9 }
  0x73   : > { %5558 = shalt.err (!%p5555_p3)
}
  0x74   : > { %5175 = dma.hbm_to_vmem [thread:$0]  (!%p6082_p6), %s7275_s9, 2048, %s442_s20, [#allocation18], %s7227_s4, %s7227_s4, %s7229_s2  }
  0x75   : > { %s4661_s15 = sadd.s32 4294967294, %s5943_s28   ;;  %s6169_s22 = sadd.s32 1, %s5943_s28  }
  0x76   : > { %7276 = sst [smem:[#allocation38_spill]] %s6169_s22  ;;  %s50_s23 = sadd.s32 1, %s5939_s27 }
  0x77   : > { %s47_s24 = ssub.s32 %s5943_s28, %s6169_s22  ;;  %p57_p1 = scmp.ne.s32.totalorder %s5939_s27, %s5935_s26 }
  0x78   : > { %p48_p3 = scmp.eq.s32.totalorder %s47_s24, 0  ;;  %p58_p11 = scmp.eq.s32.totalorder %s5943_s28, 0 }
  0x79   : > { %p63_p12 = scmp.ne.s32.totalorder %s5935_s26, %s5931_s25  ;;  %p338_p13 = scmp.eq.s32.totalorder %s6066_s14, 1 }
  0x7a   : > { %s6181_s29 = scalar_select %p48_p3, %s5939_s27, %s50_s23  }
  0x7b   : > { %p59_p0 = por %p58_p11, %p57_p1  ;;  %p7278_p2 = scmp.eq.s32.totalorder %s6066_s14, 0 }
  0x7c   : > { %7277 = sst [smem:[#allocation39_spill]] %s6181_s29  ;;  %p6189_p7 = por %p338_p13, %p57_p1 }
  0x7d   : > { %p6185_p5 = por %p7278_p2, %p63_p12  ;;  %p344_p9 = scmp.eq.s32.totalorder %s4661_s15, 1 }
  0x7e   : > { %s7280_s17 = scalar_select %p6189_p7, 1, 0 }
  0x7f   : > { %s7279_s20 = scalar_select %p6185_p5, 1, 0 }
  0x80   : > { %7281 = sst [smem:[#allocation40_spill]] %s7280_s17  ;;  %p6193_p4 = por %p344_p9, %p63_p12 }
  0x81   : > { %p5212_p10 = scmp.lt.s32.totalorder %s5943_s28, 2  ;;  %s7231_s21 = sand.u32 1, %s5939_s27  }
  0x82   : > { %s7282_s19 = scalar_select %p6193_p4, 1, 0 }
  0x83   : > { %s6200_s30 = sshll.u32 %s5943_s28, 8  ;;  %s6204_s18 = sshll.u32 %s7231_s21, 4 }
  0x84   : > { %7283 = sst [smem:[#allocation41_spill]] %s7282_s19  ;;  %p6206_p3 = pnand %p5212_p10, %p59_p0 }
  0x85   : > { %s7235_s23 = sand.u32 1, %s5943_s28   ;;  %s7285_s1 = sld [smem:[#allocation42_spill]] }
  0x86   : > { %s7284_s13 = scalar_select %p6206_p3, 1, 0 }
  0x87   : > { %s506_s2 = scalar_lea.vmem [#allocation5], %s6204_s18  ;;  %s6222_s21 = scalar_lea.sflag [#allocation6], %s7235_s23 }
  0x88   : > { %s513_s5 = sshll.u32 %s506_s2, 4  ;;  %p6228_p11 = pneg %p6206_p3  ;;  %s6218_s5 = int_to_ptr.vmem [resolvable:$true] %s513_s5 }
  0x8a   : > { %s7286_s9 = scalar_select %p6228_p11, 1, 0 }
  0x8b   : > { %s6215_s4 = scalar_lea.hbm %s7285_s1, %s6200_s30  ;;  %s5564_s2 = scalar_lea.hbm %s7285_s1, 512 }
  0x8c   : > { %s5559_s7 = scalar_lea.hbm %s6215_s4, 256  ;;  %p5565_p0 = scmp.lt.u32.totalorder %s6215_s4, %s7285_s1 }
  0x8d   : > { %p5560_p1 = scmp.ne.s32.totalorder %s6215_s4, %s5559_s7  ;;  %p5566_p2 = scmp.lt.u32.totalorder %s5564_s2, %s5559_s7 }
  0x8e   : > { %p5568_p10 = scmp.lt.u32.totalorder %s5559_s7, %s6215_s4 }
  0x8f   : > { %p5562_p12 = pnand %p6228_p11, %p5560_p1  ;;  %p5567_p9 = por %p5566_p2, %p5565_p0 }
  0x91   : > { %p5563_p13 = pneg %p5562_p12  ;;  %p5569_p4 = por %p5568_p10, %p5567_p9 }
  0x93   : > { %p5570_p7 = pnand %p5569_p4, %p5563_p13 }
  0x95   : > { %5573 = shalt.err (!%p5570_p7)
}
  0x96   : > { %s5574_s23 = scalar_lea.vmem %s6218_s5, 256  ;;  %s5952_s15 = smov [#allocation5]  }
  0x97   : > { %p5575_p1 = scmp.ne.s32.totalorder %s6218_s5, %s5574_s23  ;;  %s5579_s24 = sshll.u32 %s5952_s15, 4  ;;  %s5580_s24 = int_to_ptr.vmem [resolvable:$false] %s5579_s24 }
  0x98   : > { %s5581_s22 = scalar_lea.vmem %s5580_s24, 512  ;;  %p5582_p6 = scmp.lt.s32.totalorder %s6218_s5, %s5580_s24 }
  0x99   : > { %p5577_p12 = pnand %p5575_p1, %p6228_p11  ;;  %p5583_p8 = scmp.lt.s32.totalorder %s5581_s22, %s5574_s23 }
  0x9b   : > { %p5578_p5 = pneg %p5577_p12  ;;  %p5584_p0 = por %p5583_p8, %p5582_p6 }
  0x9d   : > { %p5585_p2 = pnand %p5584_p0, %p5578_p5 }
  0x9f   : > { %5588 = shalt.err (!%p5585_p2)
}
  0xa0   : > { %s7245_s7 = smov 128   ;;  %s7247_s29 = smov 8  }
  0xa1   : > { %5188 = dma.hbm_to_vmem [thread:$0]  (!%p6206_p3), %s6215_s4, 256, %s6218_s5, %s6222_s21, %s7245_s7, %s7245_s7, %s7247_s29  }
  0xa2   : > { %s7287_s3 = sld [smem:[#allocation44_spill]]  ;;  %s548_s24 = scalar_lea.vmem [#allocation8], %s6204_s18 }
  0xa3   : > { %s555_s22 = sshll.u32 %s548_s24, 4  ;;  %s5955_s1 = smov [#allocation13]   ;;  %s6262_s22 = int_to_ptr.vmem [resolvable:$true] %s555_s22 }
  0xa4   : > { %s6264_s19 = sshll.u32 %s5955_s1, 4  ;;  %s7288_s25 = sand.u32 1, %s5943_s28   ;;  %s403_s19 = int_to_ptr.vmem [resolvable:$true] %s6264_s19 }
  0xa5   : > { %s6268_s17 = scalar_lea.sflag [#allocation9], %s7288_s25 }
  0xa8   : > { %s6259_s15 = scalar_lea.hbm %s7287_s3, %s6200_s30  ;;  %s5594_s23 = scalar_lea.hbm %s7287_s3, 512 }
  0xa9   : > { %s5589_s5 = scalar_lea.hbm %s6259_s15, 256  ;;  %p5595_p7 = scmp.lt.u32.totalorder %s6259_s15, %s7287_s3 }
  0xaa   : > { %p5590_p6 = scmp.ne.s32.totalorder %s6259_s15, %s5589_s5  ;;  %p5596_p4 = scmp.lt.u32.totalorder %s5594_s23, %s5589_s5 }
  0xab   : > { %p5598_p9 = scmp.lt.u32.totalorder %s5589_s5, %s6259_s15 }
  0xac   : > { %p5592_p8 = pnand %p5590_p6, %p6228_p11  ;;  %p5597_p13 = por %p5596_p4, %p5595_p7 }
  0xae   : > { %p5593_p5 = pneg %p5592_p8  ;;  %p5599_p10 = por %p5598_p9, %p5597_p13 }
  0xb0   : > { %p5600_p1 = pnand %p5599_p10, %p5593_p5 }
  0xb2   : > { %5603 = shalt.err (!%p5600_p1)
}
  0xb3   : > { %s5604_s1 = scalar_lea.vmem %s6262_s22, 256  ;;  %s5956_s25 = smov [#allocation8]  }
  0xb4   : > { %p5605_p12 = scmp.ne.s32.totalorder %s6262_s22, %s5604_s1  ;;  %s5609_s24 = sshll.u32 %s5956_s25, 4  ;;  %s5610_s24 = int_to_ptr.vmem [resolvable:$false] %s5609_s24 }
  0xb5   : > { %s5611_s7 = scalar_lea.vmem %s5610_s24, 512  ;;  %p5612_p6 = scmp.lt.s32.totalorder %s6262_s22, %s5610_s24 }
  0xb6   : > { %p5607_p0 = pnand %p5605_p12, %p6228_p11  ;;  %p5613_p8 = scmp.lt.s32.totalorder %s5611_s7, %s5604_s1 }
  0xb8   : > { %p5608_p2 = pneg %p5607_p0  ;;  %p5614_p7 = por %p5613_p8, %p5612_p6 }
  0xba   : > { %p5615_p4 = pnand %p5614_p7, %p5608_p2 }
  0xbc   : > { %5618 = shalt.err (!%p5615_p4)
}
  0xbd   : > { %s7289_s29 = smov 4   ;;  %s7290_s5 = smov 64  }
  0xbe   : > { %5194 = dma.hbm_to_vmem [thread:$0]  (!%p6206_p3), %s6259_s15, 256, %s6262_s22, %s6268_s17, %s7290_s5, %s7290_s5, %s7289_s29  }
  0xbf   : > { %s7291_s6 = sld [smem:[#allocation47_spill]]  ;;  %p7292_p13 = scmp.ne.s32.totalorder %s7273_s12, 0 }
  0xc5   : > { %s5619_s23 = scalar_lea.hbm %s7291_s6, 3072 }
  0xc6   : > { %p5620_p5 = scmp.ne.s32.totalorder %s7291_s6, %s5619_s23  ;;  %p5626_p1 = scmp.lt.u32.totalorder %s5619_s23, %s7291_s6 }
  0xc8   : > { %p5622_p9 = pnand %p5620_p5, %p7292_p13 }
  0xca   : > { %p5623_p10 = pneg %p5622_p9 }
  0xcc   : > { %p5628_p12 = pnand %p5626_p1, %p5623_p10 }
  0xce   : > { %5631 = shalt.err (!%p5628_p12)
}
  0xcf   : > { %s5632_s3 = scalar_lea.vmem %s403_s19, 3072  ;;  %p5640_p8 = scmp.lt.s32.totalorder %s403_s19, %s403_s19 }
  0xd0   : > { %p5633_p0 = scmp.ne.s32.totalorder %s403_s19, %s5632_s3  ;;  %p5641_p7 = scmp.lt.s32.totalorder %s5632_s3, %s5632_s3 }
  0xd2   : > { %p5635_p2 = pnand %p5633_p0, %p7292_p13  ;;  %p5642_p4 = por %p5641_p7, %p5640_p8 }
  0xd4   : > { %p5636_p6 = pneg %p5635_p2 }
  0xd6   : > { %p5643_p3 = pnand %p5642_p4, %p5636_p6 }
  0xd8   : > { %5646 = shalt.err (!%p5643_p3)
}
  0xd9   : > { %p7293_p5 = scmp.ne.s32.totalorder %s7271_s16, 0  ;;  %s5957_s4 = smov [#allocation16]  }
  0xda   : > { %s428_s2 = sshll.u32 %s5957_s4, 4  ;;  %s5958_s23 = smov [#allocation19]   ;;  %s429_s2 = int_to_ptr.vmem [resolvable:$true] %s428_s2 }
  0xdb   : > { %5166 = dma.hbm_to_vmem [thread:$0]  (!%p7293_p5), %s7291_s6, 3072, %s403_s19, [#allocation12], %s7290_s5, %s7290_s5, %s7289_s29  }
  0xdc   : > { %s454_s1 = sshll.u32 %s5958_s23, 4  ;;  %s5647_s24 = scalar_lea.hbm %s7214_s8, 4096  ;;  %s455_s1 = int_to_ptr.vmem [resolvable:$true] %s454_s1 }
  0xdd   : > { %p5648_p3 = scmp.ne.s32.totalorder %s7214_s8, %s5647_s24  ;;  %p5654_p1 = scmp.lt.u32.totalorder %s5647_s24, %s7214_s8 }
  0xdf   : > { %p5650_p9 = pnand %p5648_p3, %p7292_p13 }
  0xe1   : > { %p5651_p10 = pneg %p5650_p9 }
  0xe3   : > { %p5656_p12 = pnand %p5654_p1, %p5651_p10 }
  0xe5   : > { %5659 = shalt.err (!%p5656_p12)
}
  0xe6   : > { %s5660_s19 = scalar_lea.vmem %s429_s2, 4096  ;;  %p5668_p8 = scmp.lt.s32.totalorder %s429_s2, %s429_s2 }
  0xe7   : > { %p5661_p0 = scmp.ne.s32.totalorder %s429_s2, %s5660_s19  ;;  %p5669_p7 = scmp.lt.s32.totalorder %s5660_s19, %s5660_s19 }
  0xe9   : > { %p5663_p2 = pnand %p5661_p0, %p7292_p13  ;;  %p5670_p4 = por %p5669_p7, %p5668_p8 }
  0xeb   : > { %p5664_p6 = pneg %p5663_p2 }
  0xed   : > { %p5671_p11 = pnand %p5670_p4, %p5664_p6 }
  0xef   : > { %5674 = shalt.err (!%p5671_p11)
}
  0xf0   : > { %s7294_s28 = smov 8   ;;  %s7295_s22 = smov 128  }
  0xf1   : > { %5172 = dma.hbm_to_vmem [thread:$0]  (!%p7293_p5), %s7214_s8, 4096, %s429_s2, [#allocation15], %s7295_s22, %s7295_s22, %s7294_s28  }
  0xf2   : > { %s5675_s3 = scalar_lea.hbm %s7216_s10, 2048 }
  0xf3   : > { %p5676_p3 = scmp.ne.s32.totalorder %s7216_s10, %s5675_s3  ;;  %p5682_p10 = scmp.lt.u32.totalorder %s5675_s3, %s7216_s10 }
  0xf5   : > { %p5678_p11 = pnand %p5676_p3, %p7292_p13 }
  0xf7   : > { %p5679_p9 = pneg %p5678_p11 }
  0xf9   : > { %p5684_p1 = pnand %p5682_p10, %p5679_p9 }
  0xfb   : > { %5687 = shalt.err (!%p5684_p1)
}
  0xfc   : > { %s5688_s14 = scalar_lea.vmem %s455_s1, 2048  ;;  %p5696_p6 = scmp.lt.s32.totalorder %s455_s1, %s455_s1 }
  0xfd   : > { %p5689_p12 = scmp.ne.s32.totalorder %s455_s1, %s5688_s14  ;;  %p5697_p8 = scmp.lt.s32.totalorder %s5688_s14, %s5688_s14 }
  0xff   : > { %p5691_p0 = pnand %p5689_p12, %p7292_p13  ;;  %p5698_p7 = por %p5697_p8, %p5696_p6 }
 0x101   : > { %p5692_p2 = pneg %p5691_p0 }
 0x103   : > { %p5699_p4 = pnand %p5698_p7, %p5692_p2 }
 0x105   : > { %5702 = shalt.err (!%p5699_p4)
}
 0x106   : > { %5178 = dma.hbm_to_vmem [thread:$0]  (!%p7293_p5), %s7216_s10, 2048, %s455_s1, [#allocation18], %s7295_s22, %s7295_s22, %s7294_s28  }
 0x107   : > { %s5959_s23 = smov [#allocation20]   ;;  %s5703_s7 = scalar_lea.hbm %s7217_s11, 2048 }
 0x108   : > { %s467_s25 = sshll.u32 %s5959_s23, 4  ;;  %p5704_p3 = scmp.ne.s32.totalorder %s7217_s11, %s5703_s7  ;;  %s468_s25 = int_to_ptr.vmem [resolvable:$true] %s467_s25 }
 0x109   : > { %p5710_p10 = scmp.lt.u32.totalorder %s5703_s7, %s7217_s11 }
 0x10a   : > { %p5706_p11 = pnand %p5704_p3, %p7292_p13 }
 0x10c   : > { %p5707_p9 = pneg %p5706_p11 }
 0x10e   : > { %p5712_p1 = pnand %p5710_p10, %p5707_p9 }
 0x110   : > { %5715 = shalt.err (!%p5712_p1)
}
 0x111   : > { %s5716_s1 = scalar_lea.vmem %s468_s25, 2048  ;;  %p5724_p6 = scmp.lt.s32.totalorder %s468_s25, %s468_s25 }
 0x112   : > { %p5717_p12 = scmp.ne.s32.totalorder %s468_s25, %s5716_s1  ;;  %p5725_p8 = scmp.lt.s32.totalorder %s5716_s1, %s5716_s1 }
 0x114   : > { %p5719_p0 = pnand %p5717_p12, %p7292_p13  ;;  %p5726_p7 = por %p5725_p8, %p5724_p6 }
 0x116   : > { %p5720_p2 = pneg %p5719_p0 }
 0x118   : > { %p5727_p4 = pnand %p5726_p7, %p5720_p2 }
 0x11a   : > { %5730 = shalt.err (!%p5727_p4)
}
 0x11b   : > { %5181 = dma.hbm_to_vmem [thread:$0]  (!%p7293_p5), %s7217_s11, 2048, %s468_s25, [#allocation21], %s7290_s5, %s7290_s5, %s7289_s29  }
 0x11c   : > { %s6384_s23 = scalar_lea.hbm %s7206_s0, %s6200_s30  ;;  %s485_s16 = scalar_lea.vmem [#allocation2], %s6204_s18 }
 0x11d   : > { %s492_s3 = sshll.u32 %s485_s16, 4  ;;  %s7296_s24 = sand.u32 1, %s5939_s27   ;;  %s6387_s3 = int_to_ptr.vmem [resolvable:$true] %s492_s3 }
 0x11e   : > { %s6391_s7 = scalar_lea.sflag [#allocation3], %s7296_s24  ;;  %s5731_s15 = scalar_lea.hbm %s6384_s23, 256 }
 0x11f   : > { %p5732_p13 = scmp.ne.s32.totalorder %s6384_s23, %s5731_s15  ;;  %p7297_p3 = scmp.ne.s32.totalorder %s7286_s9, 0 }
 0x120   : > { %s5736_s14 = scalar_lea.hbm %s7206_s0, 512  ;;  %p5737_p9 = scmp.lt.u32.totalorder %s6384_s23, %s7206_s0 }
 0x121   : > { %p5734_p5 = pnand %p5732_p13, %p7297_p3  ;;  %p5738_p10 = scmp.lt.u32.totalorder %s5736_s14, %s5731_s15 }
 0x122   : > { %p5740_p12 = scmp.lt.u32.totalorder %s5731_s15, %s6384_s23 }
 0x123   : > { %p5735_p11 = pneg %p5734_p5  ;;  %p5739_p1 = por %p5738_p10, %p5737_p9 }
 0x125   : > { %p5741_p0 = por %p5740_p12, %p5739_p1 }
 0x127   : > { %p5742_p2 = pnand %p5741_p0, %p5735_p11 }
 0x129   : > { %5745 = shalt.err (!%p5742_p2)
}
 0x12a   : > { %s5746_s2 = scalar_lea.vmem %s6387_s3, 256  ;;  %s5960_s12 = smov [#allocation2]  }
 0x12b   : > { %p5747_p6 = scmp.ne.s32.totalorder %s6387_s3, %s5746_s2  ;;  %s5751_s4 = sshll.u32 %s5960_s12, 4  ;;  %s5752_s4 = int_to_ptr.vmem [resolvable:$false] %s5751_s4 }
 0x12c   : > { %s5753_s16 = scalar_lea.vmem %s5752_s4, 512  ;;  %p5754_p4 = scmp.lt.s32.totalorder %s6387_s3, %s5752_s4 }
 0x12d   : > { %p5749_p8 = pnand %p5747_p6, %p7297_p3  ;;  %p5755_p13 = scmp.lt.s32.totalorder %s5753_s16, %s5746_s2 }
 0x12f   : > { %p5750_p7 = pneg %p5749_p8  ;;  %p5756_p5 = por %p5755_p13, %p5754_p4 }
 0x131   : > { %p5757_p9 = pnand %p5756_p5, %p5750_p7 }
 0x133   : > { %5760 = shalt.err (!%p5757_p9)
}
 0x134   : > { %p7298_p11 = scmp.ne.s32.totalorder %s7284_s13, 0  ;;  %s7299_s25 = sld [smem:[#allocation43_spill]] }
 0x135   : > { %s527_s1 = scalar_lea.vmem [#allocation7], %s6204_s18 }
 0x136   : > { %5185 = dma.hbm_to_vmem [thread:$0]  (!%p7298_p11), %s6384_s23, 256, %s6387_s3, %s6391_s7, %s7295_s22, %s7295_s22, %s7294_s28  }
 0x137   : > { %s534_s6 = sshll.u32 %s527_s1, 4  ;;  %s6425_s6 = int_to_ptr.vmem [resolvable:$true] %s534_s6 }
 0x13a   : > { %s7300_s19 = smov %s7299_s25  ;;  %s6422_s14 = scalar_lea.hbm %s7299_s25, %s6200_s30 }
 0x13b   : > { %s5761_s2 = scalar_lea.hbm %s6422_s14, 256  ;;  %s5766_s3 = scalar_lea.hbm %s7300_s19, 512 }
 0x13c   : > { %p5762_p10 = scmp.ne.s32.totalorder %s6422_s14, %s5761_s2  ;;  %p5767_p0 = scmp.lt.u32.totalorder %s6422_s14, %s7300_s19 }
 0x13d   : > { %p5768_p2 = scmp.lt.u32.totalorder %s5766_s3, %s5761_s2  ;;  %p5770_p8 = scmp.lt.u32.totalorder %s5761_s2, %s6422_s14 }
 0x13e   : > { %p5764_p1 = pnand %p5762_p10, %p7297_p3 }
 0x13f   : > { %p5769_p6 = por %p5768_p2, %p5767_p0 }
 0x140   : > { %p5765_p12 = pneg %p5764_p1 }
 0x141   : > { %p5771_p7 = por %p5770_p8, %p5769_p6 }
 0x143   : > { %p5772_p4 = pnand %p5771_p7, %p5765_p12 }
 0x145   : > { %5775 = shalt.err (!%p5772_p4)
}
 0x146   : > { %s5776_s16 = scalar_lea.vmem %s6425_s6, 256  ;;  %s5961_s24 = smov [#allocation7]  }
 0x147   : > { %p5777_p13 = scmp.ne.s32.totalorder %s6425_s6, %s5776_s16  ;;  %s5781_s15 = sshll.u32 %s5961_s24, 4  ;;  %s5782_s15 = int_to_ptr.vmem [resolvable:$false] %s5781_s15 }
 0x148   : > { %s5783_s25 = scalar_lea.vmem %s5782_s15, 512  ;;  %p5784_p10 = scmp.lt.s32.totalorder %s6425_s6, %s5782_s15 }
 0x149   : > { %p5779_p5 = pnand %p5777_p13, %p7297_p3  ;;  %p5785_p1 = scmp.lt.s32.totalorder %s5783_s25, %s5776_s16 }
 0x14b   : > { %p5780_p9 = pneg %p5779_p5  ;;  %p5786_p0 = por %p5785_p1, %p5784_p10 }
 0x14d   : > { %p5787_p2 = pnand %p5786_p0, %p5780_p9 }
 0x14f   : > { %5790 = shalt.err (!%p5787_p2)
}
 0x150   : > { %5191 = dma.hbm_to_vmem [thread:$0]  (!%p7298_p11), %s6422_s14, 256, %s6425_s6, %s6222_s21, %s7295_s22, %s7295_s22, %s7294_s28  }
 0x151   : > { %s7301_s12 = sld [smem:[#allocation45_spill]]  ;;  %s569_s3 = scalar_lea.vmem [#allocation10], %s6204_s18 }
 0x152   : > { %s576_s7 = sshll.u32 %s569_s3, 4  ;;  %s6459_s7 = int_to_ptr.vmem [resolvable:$true] %s576_s7 }
 0x157   : > { %s6456_s23 = scalar_lea.hbm %s7301_s12, %s6200_s30  ;;  %s5796_s28 = scalar_lea.hbm %s7301_s12, 512 }
 0x158   : > { %s5791_s4 = scalar_lea.hbm %s6456_s23, 256  ;;  %p5797_p7 = scmp.lt.u32.totalorder %s6456_s23, %s7301_s12 }
 0x159   : > { %p5792_p12 = scmp.ne.s32.totalorder %s6456_s23, %s5791_s4  ;;  %p5798_p4 = scmp.lt.u32.totalorder %s5796_s28, %s5791_s4 }
 0x15a   : > { %p5800_p5 = scmp.lt.u32.totalorder %s5791_s4, %s6456_s23 }
 0x15b   : > { %p5794_p6 = pnand %p5792_p12, %p7297_p3  ;;  %p5799_p13 = por %p5798_p4, %p5797_p7 }
 0x15d   : > { %p5795_p8 = pneg %p5794_p6  ;;  %p5801_p9 = por %p5800_p5, %p5799_p13 }
 0x15f   : > { %p5802_p10 = pnand %p5801_p9, %p5795_p8 }
 0x161   : > { %5805 = shalt.err (!%p5802_p10)
}
 0x162   : > { %s5806_s18 = scalar_lea.vmem %s6459_s7, 256  ;;  %s5962_s14 = smov [#allocation10]  }
 0x163   : > { %p5807_p1 = scmp.ne.s32.totalorder %s6459_s7, %s5806_s18  ;;  %s5811_s6 = sshll.u32 %s5962_s14, 4  ;;  %s5812_s6 = int_to_ptr.vmem [resolvable:$false] %s5811_s6 }
 0x164   : > { %s5813_s24 = scalar_lea.vmem %s5812_s6, 512  ;;  %p5814_p12 = scmp.lt.s32.totalorder %s6459_s7, %s5812_s6 }
 0x165   : > { %p5809_p0 = pnand %p5807_p1, %p7297_p3  ;;  %p5815_p6 = scmp.lt.s32.totalorder %s5813_s24, %s5806_s18 }
 0x167   : > { %p5810_p2 = pneg %p5809_p0  ;;  %p5816_p7 = por %p5815_p6, %p5814_p12 }
 0x169   : > { %p5817_p4 = pnand %p5816_p7, %p5810_p2 }
 0x16b   : > { %5820 = shalt.err (!%p5817_p4)
}
 0x16c   : > { %5197 = dma.hbm_to_vmem [thread:$0]  (!%p7298_p11), %s6456_s23, 256, %s6459_s7, %s6268_s17, %s7290_s5, %s7290_s5, %s7289_s29  }
 0x16d   : > { %s7302_s9 = sld [smem:[#allocation37_spill]] }
 0x173   : > { %p7303_p3 = scmp.ne.s32.totalorder %s7302_s9, 0 }
 0x174   : > { %s6489_s15 = sand.u32 (!%p7303_p3), 1, %s5935_s26   ;;  %p7304_p8 = scmp.ne.s32.totalorder (!%p7303_p3), %s7279_s20, 0 }
 0x175   : > { %588 = sbr.rel (%p7303_p3) target bundleno = 3825 (0xef1), region = 68  ;;  %s6492_s25 = sshll.u32 (!%p7303_p3), %s6489_s15, 4 }
 0x176   : > { %s591_s13 = scalar_lea.sflag (!%p7303_p3), [#allocation3], %s6489_s15  ;;  %s6496_s1 = scalar_lea.vmem (!%p7303_p3), [#allocation2], %s6492_s25 }
 0x17c   : > { %5894 = dma.done.wait (%p7304_p8), %s591_s13, 256  }
 0x17d   : > { %5896 = vsyncadd (%p7304_p8), %s591_s13, 4294967040  ;;  %s7305_s17 = sld [smem:[#allocation36_spill]]  ;;  %s603_s2 = scalar_lea.vmem [#allocation5], %s6492_s25 }
 0x183   : > { %s599_s29 = sand.u32 1, %s7305_s17  }
 0x184   : > { %s600_s5 = scalar_lea.sflag [#allocation6], %s599_s29 }
 0x185   : > { %5898 = dma.done.wait (%p7304_p8), %s600_s5, 512  }
 0x186   : > { %5900 = vsyncadd (%p7304_p8), %s600_s5, 4294966784  ;;  %s612_s23 = scalar_lea.vmem [#allocation7], %s6492_s25  ;;  %s618_s3 = scalar_lea.sflag [#allocation9], %s599_s29 }
 0x187   : > { %s6510_s7 = scalar_lea.vmem [#allocation8], %s6492_s25 }
 0x188   : > { %5902 = dma.done.wait (%p7304_p8), %s618_s3, 512  }
 0x189   : > { %5904 = vsyncadd (%p7304_p8), %s618_s3, 4294966784  ;;  %s6517_s4 = scalar_lea.vmem [#allocation10], %s6492_s25  ;;  %p7306_p11 = scmp.eq.s32.totalorder %s7305_s17, 0 }
 0x18b   : > { %5906 = dma.done.wait (%p7306_p11), [#allocation12], 3584   ;;  %p7307_p13 = pmov %p7306_p11 }
 0x18c   : > { %p7308_p5 = pmov %p7306_p11 }
 0x18d   : > { %5908 = vsyncadd (%p7307_p13), [#allocation12], 4294963712 }
 0x18e   : > { %5910 = dma.done.wait (%p7308_p5), [#allocation15], 5120   ;;  %p7309_p9 = pmov %p7308_p5 }
 0x18f   : > { %p7310_p10 = pmov %p7308_p5 }
 0x190   : > { %5912 = vsyncadd (%p7309_p9), [#allocation15], 4294962176 }
 0x191   : > { %5914 = dma.done.wait (%p7310_p10), [#allocation18], 4096   ;;  %p7311_p1 = pmov %p7308_p5 }
 0x193   : > { %5916 = vsyncadd (%p7311_p1), [#allocation18], 4294963200  ;;  %p7312_p0 = pmov %p7311_p1 }
 0x195   : > { %5918 = dma.done.wait (%p7312_p0), [#allocation21], 2048   ;;  %p7313_p2 = pmov %p7312_p0 }
 0x196   : > { %v729_v0 = vld [vmem:[%s603_s2] sm:$0xff]  ;;  %v730_v1 = vld [vmem:[%s603_s2 + $0x8] sm:$0xff]  ;;  %v5963_v22 = vmov 0   ;;  %s6549_s20 = scalar_lea.vmem [#allocation23], %s6492_s25  ;;  %vm5965_vm0 = vmmov 0   ;;  %s5966_s16 = smov 96  }
 0x197   : > { %5920 = vsyncadd (%p7313_p2), [#allocation21], 4294965248  ;;  %735 = vadd.xlane.f32.xlu0 %v729_v0  ;;  %v5291_v2 = vld [vmem:[#allocation16 + $0x84] ss:$8 sps:$4 sm:$0xff]   ;;  %v5293_v3 = vld [vmem:[#allocation16 + $0x80] ss:$8 sps:$4 sm:$0xff]   ;;  %911 = vmatprep.mubr.bf16.mxu0 %v5963_v22 }
 0x198   : > { %v5294_v4 = vld [vmem:[#allocation16 + $0x94] ss:$8 sps:$4 sm:$0xff]   ;;  %v5296_v5 = vld [vmem:[#allocation16 + $0x90] ss:$8 sps:$4 sm:$0xff]   ;;  %879 = vmatprep.subr.bf16.mxu0 %v5291_v2  ;;  %v5297_v14 = vld [vmem:[#allocation16 + $0xa4] ss:$8 sps:$4 sm:$0xff]  }
 0x199   : > { %880 = vmatpush1.bf16.msra.mxu0 %v5293_v3  ;;  %v5299_v15 = vld [vmem:[#allocation16 + $0xa0] ss:$8 sps:$4 sm:$0xff]   ;;  %v5300_v16 = vld [vmem:[#allocation16 + $0xb4] ss:$8 sps:$4 sm:$0xff]   ;;  %v5302_v17 = vld [vmem:[#allocation16 + $0xb0] ss:$8 sps:$4 sm:$0xff]  }
 0x19a   : > { %881 = vmatprep.subr.bf16.mxu0 %v5294_v4  ;;  %v5303_v18 = vld [vmem:[#allocation16 + $0xc4] ss:$8 sps:$4 sm:$0xff]   ;;  %v5305_v19 = vld [vmem:[#allocation16 + $0xc0] ss:$8 sps:$4 sm:$0xff]   ;;  %v5306_v20 = vld [vmem:[#allocation16 + $0xd4] ss:$8 sps:$4 sm:$0xff]  }
 0x19b   : > { %737 = vadd.xlane.f32.xlu0 %v730_v1  ;;  %v5308_v21 = vld [vmem:[#allocation16 + $0xd0] ss:$8 sps:$4 sm:$0xff]   ;;  %v5309_v23 = vld [vmem:[#allocation16 + $0xe4] ss:$8 sps:$4 sm:$0xff]   ;;  %v5311_v24 = vld [vmem:[#allocation16 + $0xe0] ss:$8 sps:$4 sm:$0xff]  }
 0x19c   : > { %v5312_v25 = vld [vmem:[#allocation16 + $0xf4] ss:$8 sps:$4 sm:$0xff]   ;;  %v5314_v26 = vld [vmem:[#allocation16 + $0xf0] ss:$8 sps:$4 sm:$0xff]   ;;  %v5317_v27 = vld [vmem:[#allocation16 + $0x4] ss:$8 sps:$4 sm:$0xff]  }
 0x19d   : > { %882 = vmatpush1.bf16.msra.mxu0 %v5296_v5  ;;  %v5339_v28 = vld [vmem:[#allocation17 + $0x40] sm:$0xff]   ;;  %v5341_v30 = vld [vmem:[#allocation17 + $0x48] sm:$0xff]   ;;  %v5343_v32 = vld [vmem:[#allocation17 + $0x50] sm:$0xff]   ;;  %s5967_s21 = smov 64   ;;  %s5968_s28 = smov 32   ;;  %vm3095_vm1 = vcmask 261120  }
 0x19e   : > { %883 = vmatprep.subr.bf16.mxu0 %v5297_v14  ;;  %v5340_v29 = vld [vmem:[#allocation17] sm:$0xff]   ;;  %4864 = vmatprep.subr.bf16.mxu1 %v5339_v28  ;;  %v5342_v31 = vld [vmem:[#allocation17 + $0x8] sm:$0xff]   ;;  %v5344_v33 = vld [vmem:[#allocation17 + $0x10] sm:$0xff]   ;;  %vm3862_vm2 = vcmask 523264   ;;  %vm3865_vm3 = vcmask 785408   ;;  %s7314_s22 = sld [smem:[#allocation40_spill]] }
 0x19f   : > { %4865 = vmatpush3.bf16.msra.mxu1 %v5340_v29  ;;  %v5345_v34 = vld [vmem:[#allocation17 + $0x58] sm:$0xff]   ;;  %v5347_v36 = vld [vmem:[#allocation17 + $0x60] sm:$0xff]   ;;  %v5349_v38 = vld [vmem:[#allocation17 + $0x68] sm:$0xff]   ;;  %s4862_s30 = sshll.u32 %s7305_s17, 8  ;;  %s7315_s6 = sld [smem:[#allocation51_spill]] }
 0x1a0   : > { %4866 = vmatprep.subr.bf16.mxu1 %v5341_v30  ;;  %v5346_v35 = vld [vmem:[#allocation17 + $0x18] sm:$0xff]   ;;  %v5348_v37 = vld [vmem:[#allocation17 + $0x20] sm:$0xff]   ;;  %v5350_v14 = vld [vmem:[#allocation17 + $0x28] sm:$0xff]   ;;  %s4403_s9 = sshll.u32 %s6549_s20, 4  ;;  %s4374_s13 = scalar_lea.sflag [#allocation24], %s6489_s15  ;;  %s7122_s9 = int_to_ptr.vmem [resolvable:$true] %s4403_s9 }
 0x1a1   : > { %884 = vmatpush1.bf16.msra.mxu0 %v5299_v15  ;;  %v758_v46 = vld [vmem:[#allocation11] ss:$0 sm:$0xff]  ;;  %v761_v48 = vld [vmem:[#allocation11 + $0x1] ss:$0 sm:$0xff]  ;;  %v5320_v57 = vld [vmem:[#allocation16 + $0x14] ss:$8 sps:$4 sm:$0xff]  }
 0x1a2   : > { %885 = vmatprep.subr.bf16.mxu0 %v5300_v16  ;;  %v5315_v55 = vld [vmem:[#allocation16] ss:$8 sps:$4 sm:$0xff]   ;;  %v5318_v58 = vld [vmem:[#allocation16 + $0x10] ss:$8 sps:$4 sm:$0xff]   ;;  %v5323_v59 = vld [vmem:[#allocation16 + $0x24] ss:$8 sps:$4 sm:$0xff]  }
 0x1a3   : > { %4867 = vmatpush3.bf16.msra.mxu1 %v5342_v31  ;;  %v5321_v60 = vld [vmem:[#allocation16 + $0x20] ss:$8 sps:$4 sm:$0xff]   ;;  %v5326_v61 = vld [vmem:[#allocation16 + $0x34] ss:$8 sps:$4 sm:$0xff]   ;;  %v5324_v62 = vld [vmem:[#allocation16 + $0x30] ss:$8 sps:$4 sm:$0xff]  }
 0x1a4   : > { %4868 = vmatprep.subr.bf16.mxu1 %v5343_v32  ;;  %v5329_v63 = vld [vmem:[#allocation16 + $0x44] ss:$8 sps:$4 sm:$0xff]   ;;  %v5330_v2 = vld [vmem:[#allocation16 + $0x50] ss:$8 sps:$4 sm:$0xff]   ;;  %v5333_v4 = vld [vmem:[#allocation16 + $0x60] ss:$8 sps:$4 sm:$0xff]  }
 0x1a5   : > { %886 = vmatpush1.bf16.msra.mxu0 %v5302_v17  ;;  %v5335_v3 = vld [vmem:[#allocation16 + $0x64] ss:$8 sps:$4 sm:$0xff]   ;;  %v5351_v15 = vld [vmem:[#allocation17 + $0x70] sm:$0xff]   ;;  %v5353_v17 = vld [vmem:[#allocation17 + $0x78] sm:$0xff]   ;;  %s7119_s24 = scalar_lea.hbm %s7315_s6, %s4862_s30  ;;  %p7316_p6 = scmp.ne.s32.totalorder %s7314_s22, 0 }
 0x1a6   : > { %887 = vmatprep.subr.bf16.mxu0 %v5303_v18  ;;  %v727_v5 = vld [vmem:[%s6496_s1] sm:$0xff]  ;;  %v5354_v18 = vld [vmem:[#allocation17 + $0x38] sm:$0xff]   ;;  %s5971_s29 = smov [#allocation23]  }
 0x1a7   : > { %4869 = vmatpush3.bf16.msra.mxu1 %v5344_v33  ;;  %v5352_v16 = vld [vmem:[#allocation17 + $0x30] sm:$0xff]   ;;  %v5358_v31 = vld [vmem:[#allocation13 + $0x58] sm:$0xff]   ;;  %v5359_v32 = vld [vmem:[#allocation13 + $0x60] sm:$0xff]   ;;  %s5825_s5 = sshll.u32 %s5971_s29, 4  ;;  %s5826_s5 = int_to_ptr.vmem [resolvable:$false] %s5825_s5 }
 0x1a8   : > { %4870 = vmatprep.subr.bf16.mxu1 %v5345_v34  ;;  %v5360_v33 = vld [vmem:[#allocation13 + $0x68] sm:$0xff]   ;;  %v5361_v34 = vld [vmem:[#allocation13 + $0x70] sm:$0xff]   ;;  %s5827_s2 = scalar_lea.vmem %s5826_s5, 512  ;;  %p5828_p3 = scmp.lt.s32.totalorder %s7122_s9, %s5826_s5 }
 0x1a9   : > { %888 = vmatpush1.bf16.msra.mxu0 %v5305_v19  ;;  %v5355_v19 = vld [vmem:[#allocation13 + $0x40] sm:$0xff]  }
 0x1aa   : > { %889 = vmatprep.subr.bf16.mxu0 %v5306_v20  ;;  %v5356_v20 = vld [vmem:[#allocation13 + $0x48] sm:$0xff]  }
 0x1ab   : > { %4871 = vmatpush3.bf16.msra.mxu1 %v5346_v35  ;;  %v6584_v35 = vld [vmem:[%s6510_s7 + $0x8] sm:$0xf] }
 0x1ac   : > { %4872 = vmatprep.subr.bf16.mxu1 %v5347_v36  ;;  %v6587_v36 = vld [vmem:[%s6510_s7 + $0xc] sm:$0xf] }
 0x1ad   : > { %890 = vmatpush1.bf16.msra.mxu0 %v5308_v21  ;;  %v5964_v21 = vmov 0.0  }
 0x1ae   : > { %891 = vmatprep.subr.bf16.mxu0 %v5309_v23  ;;  %v6574_v23 = vld [vmem:[%s6510_s7] sm:$0xf] }
 0x1af   : > { %4873 = vmatpush3.bf16.msra.mxu1 %v5348_v37  ;;  %v1249_v37 = vld [vmem:[%s6517_s4 + $0x8] sm:$0xf] }
 0x1b0   : > { %4874 = vmatprep.subr.bf16.mxu1 %v5349_v38  ;;  %v1250_v38 = vld [vmem:[%s6517_s4 + $0xc] sm:$0xf] }
 0x1b1   : > { %892 = vmatpush1.bf16.msra.mxu0 %v5311_v24  ;;  %v6577_v24 = vld [vmem:[%s6510_s7 + $0x4] sm:$0xf] }
 0x1b2   : > { %893 = vmatprep.subr.bf16.mxu0 %v5312_v25  ;;  %v1247_v25 = vld [vmem:[%s6517_s4] sm:$0xf] }
 0x1b3   : > { %4875 = vmatpush3.bf16.msra.mxu1 %v5350_v14  ;;  %v1251_v28 = vadd.bf16 %v1247_v25, %v6574_v23 }
 0x1b4   : > { %4876 = vmatprep.subr.bf16.mxu1 %v5351_v15 }
 0x1b5   : > { %894 = vmatpush1.bf16.msra.mxu0 %v5314_v26  ;;  %v1248_v26 = vld [vmem:[%s6517_s4 + $0x4] sm:$0xf] }
 0x1b6   : > { %1002 = vmatprep.subr.bf16.mxu0 %v5317_v27  ;;  %v5357_v27 = vld [vmem:[#allocation13 + $0x50] sm:$0xff]   ;;  %v1252_v29 = vadd.bf16 %v1248_v26, %v6577_v24 }
 0x1b7   : > { %4877 = vmatpush3.bf16.msra.mxu1 %v5352_v16 }
 0x1b8   : > { %4878 = vmatprep.subr.bf16.mxu1 %v5353_v17  ;;  %v4757_v30 = vcombine.low %v1251_v28, %v1252_v29 }
 0x1bb   : > { %4879 = vmatpush3.bf16.msra.mxu1 %v5354_v18 }
 0x1bc   : > { %4970 = vmatprep.subr.bf16.mxu1 %v5964_v21 }
 0x224   : > { %v736_v6 = vpop.xlane.xlu0 %735 }
 0x225   : > { %v740_v7 = vmul.f32 0.0078125, %v736_v6  ;;  %v728_v6 = vld [vmem:[%s6496_s1 + $0x8] sm:$0xff] }
 0x227   : > { %v6535_v8 = vsub.f32 %v729_v0, %v740_v7  ;;  %v5327_v0 = vld [vmem:[#allocation16 + $0x40] ss:$8 sps:$4 sm:$0xff]  }
 0x228   : > { %v738_v9 = vpop.xlane.xlu0 %737  ;;  %v731_v7 = vld [vmem:[%s612_s23] sm:$0xff] }
 0x229   : > { %v741_v10 = vmul.f32 0.0078125, %v738_v9  ;;  %v744_v11 = vmul.f32 %v6535_v8, %v6535_v8  ;;  %v5338_v9 = vld [vmem:[#allocation16 + $0x74] ss:$8 sps:$4 sm:$0xff]  }
 0x22b   : > { %v6539_v12 = vsub.f32 %v730_v1, %v741_v10  ;;  %746 = vadd.xlane.f32.xlu1 %v744_v11  ;;  %v5332_v1 = vld [vmem:[#allocation16 + $0x54] ss:$8 sps:$4 sm:$0xff]   ;;  %v6566_v10 = vadd.f32 %v731_v7, %v727_v5  ;;  %v5368_v7 = vld [vmem:[#allocation13 + $0x28] sm:$0xff]  }
 0x22c   : > { %v5366_v5 = vld [vmem:[#allocation13 + $0x18] sm:$0xff]  }
 0x22d   : > { %v745_v13 = vmul.f32 %v6539_v12, %v6539_v12 }
 0x22f   : > { %748 = vadd.xlane.f32.xlu1 %v745_v13 }
 0x2b8   : > { %v747_v39 = vpop.xlane.xlu1 %746 }
 0x2b9   : > { %v750_v40 = vmul.f32 0.0078125, %v747_v39  ;;  %v5362_v39 = vld [vmem:[#allocation13 + $0x78] sm:$0xff]  }
 0x2bb   : > { %v752_v41 = vadd.f32 1e-05, %v750_v40  ;;  %v1253_v40 = vadd.bf16 %v1249_v37, %v6584_v35 }
 0x2bc   : > { %v749_v42 = vpop.xlane.xlu1 %748 }
 0x2bd   : > { %5429 = vrsqrt.f32 %v752_v41  ;;  %v751_v43 = vmul.f32 0.0078125, %v749_v42  ;;  %v1254_v41 = vadd.bf16 %v1250_v38, %v6587_v36 }
 0x2bf   : > { %v753_v44 = vadd.f32 1e-05, %v751_v43  ;;  %v4758_v42 = vcombine.low %v1253_v40, %v1254_v41  ;;  %v1048_v43 = vlaneseq  ;;  %v4767_v41 = vcombine.low %v6574_v23, %v6577_v24 }
 0x2c0   : > { %v5970_v23 = vmov 1934713408  }
 0x2c1   : > { %5431 = vrsqrt.f32 %v753_v44  ;;  %v6594_v44 = vshrl.u32 %v1048_v43, 7  ;;  %v5372_v43 = vld [vmem:[#allocation13 + $0x88] sm:$0xff]   ;;  %v1670_v24 = vunpack.c.l.s4 %v5970_v23 }
 0x2c7   : > { %v5430_v45 = vpop.eup %5429 }
 0x2c8   : > { %v756_v47 = vmul.f32 %v5430_v45, %v6535_v8  ;;  %v732_v8 = vld [vmem:[%s612_s23 + $0x8] sm:$0xff]  ;;  %v1050_v45 = vsub.s32 0, %v6594_v44 }
 0x2c9   : > { %v6568_v11 = vadd.f32 %v732_v8, %v728_v6  ;;  %v5367_v6 = vld [vmem:[#allocation13 + $0x20] sm:$0xff]   ;;  %v5369_v8 = vld [vmem:[#allocation13 + $0x30] sm:$0xff]  }
 0x2ca   : > { %v759_v49 = vmul.f32 %v758_v46, %v756_v47  ;;  %v1054_v47 = vsub.s32 1, %v6594_v44 }
 0x2cb   : > { %v5432_v50 = vpop.eup %5431  ;;  %v764_v13 = vpack.c.bf16 %v6568_v11, %v6566_v10 }
 0x2cc   : > { %v757_v51 = vmul.f32 %v5432_v50, %v6539_v12  ;;  %v6546_v52 = vadd.f32 %v761_v48, %v759_v49  ;;  %v5336_v12 = vld [vmem:[#allocation16 + $0x70] ss:$8 sps:$4 sm:$0xff]  }
 0x2ce   : > { %v760_v53 = vmul.f32 %v758_v46, %v757_v51  ;;  %4366 = vst [vmem:[%s6549_s20] sm:$0xff] %v6546_v52  ;;  %v1046_v46 = vld [vmem:[#allocation11 + $0x2] ss:$8 sm:$0x3] }
 0x2cf   : > { %v1055_v49 = vrot.slane %v1046_v46, %v1054_v47 }
 0x2d0   : > { %v6553_v54 = vadd.f32 %v761_v48, %v760_v53  ;;  %v1051_v48 = vrot.slane %v1046_v46, %v1050_v45  ;;  %v5373_v46 = vld [vmem:[#allocation13 + $0x90] sm:$0xff]  }
 0x2d2   : > { %v781_v56 = vpack.c.bf16 %v6553_v54, %v6546_v52  ;;  %4367 = vst [vmem:[%s6549_s20 + $0x8] sm:$0xff] %v6553_v54 }
 0x2d4   : > { %912 = vmatmul.mubr.bf16.vlgmr.msra.gmra.mrb[0].mxu0 %v781_v56 }
 0x2d5   : > { %1003 = vmatpush1.bf16.msra.mxu0 %v5315_v55  ;;  %1034 = vmatprep.mubr.bf16.mxu0 %v5963_v22 }
 0x2d6   : > { %1004 = vmatprep.subr.bf16.mxu0 %v5320_v57 }
 0x2d9   : > { %1005 = vmatpush1.bf16.msra.mxu0 %v5318_v58 }
 0x2da   : > { %1006 = vmatprep.subr.bf16.mxu0 %v5323_v59 }
 0x2dd   : > { %1007 = vmatpush1.bf16.msra.mxu0 %v5321_v60 }
 0x2de   : > { %1008 = vmatprep.subr.bf16.mxu0 %v5326_v61 }
 0x2e1   : > { %1009 = vmatpush1.bf16.msra.mxu0 %v5324_v62 }
 0x2e2   : > { %1010 = vmatprep.subr.bf16.mxu0 %v5329_v63 }
 0x2e5   : > { %1011 = vmatpush1.bf16.msra.mxu0 %v5327_v0 }
 0x2e6   : > { %1012 = vmatprep.subr.bf16.mxu0 %v5332_v1 }
 0x2e9   : > { %1013 = vmatpush1.bf16.msra.mxu0 %v5330_v2  ;;  %v5363_v2 = vld [vmem:[#allocation13] sm:$0xff]  }
 0x2ea   : > { %1014 = vmatprep.subr.bf16.mxu0 %v5335_v3  ;;  %v5364_v3 = vld [vmem:[#allocation13 + $0x8] sm:$0xff]  }
 0x2ed   : > { %1015 = vmatpush1.bf16.msra.mxu0 %v5333_v4  ;;  %v5365_v4 = vld [vmem:[#allocation13 + $0x10] sm:$0xff]  }
 0x2ee   : > { %1016 = vmatprep.subr.bf16.mxu0 %v5338_v9  ;;  %v5370_v9 = vld [vmem:[#allocation13 + $0x38] sm:$0xff]  }
 0x2f1   : > { %1017 = vmatpush1.bf16.msra.mxu0 %v5336_v12  ;;  %v5371_v12 = vld [vmem:[#allocation13 + $0x80] sm:$0xff]  }
 0x2f2   : > { %4990 = vmatprep.subr.bf16.mxu0 %v5355_v19 }
 0x2f4   : > { %1035 = vmatmul.mubr.bf16.vlgmr.msra.gmra.mrb[0].mxu0 %v764_v13  ;;  %v1378_v13 = vld [vmem:[#allocation11 + $0x5] ss:$0 sm:$0xff] }
 0x2f5   : > { %4991 = vmatpush3.bf16.msra.mxu0 %v5355_v19  ;;  %5006 = vmatprep.mubr.bf16.mxu0 %v4757_v30 }
 0x2f6   : > { %4992 = vmatprep.subr.bf16.mxu0 %v5356_v20 }
 0x2f9   : > { %4993 = vmatpush3.bf16.msra.mxu0 %v5356_v20 }
 0x2fa   : > { %4994 = vmatprep.subr.bf16.mxu0 %v5357_v27 }
 0x2fd   : > { %4995 = vmatpush3.bf16.msra.mxu0 %v5357_v27  ;;  %v1100_v27 = vld [vmem:[#allocation11 + $0x3] ss:$0 sm:$0xff] }
 0x2fe   : > { %4996 = vmatprep.subr.bf16.mxu0 %v5358_v31 }
 0x301   : > { %4997 = vmatpush3.bf16.msra.mxu0 %v5358_v31 }
 0x302   : > { %4998 = vmatprep.subr.bf16.mxu0 %v5359_v32 }
 0x305   : > { %4999 = vmatpush3.bf16.msra.mxu0 %v5359_v32 }
 0x306   : > { %5000 = vmatprep.subr.bf16.mxu0 %v5360_v33 }
 0x309   : > { %5001 = vmatpush3.bf16.msra.mxu0 %v5360_v33 }
 0x30a   : > { %5002 = vmatprep.subr.bf16.mxu0 %v5361_v34 }
 0x30d   : > { %5003 = vmatpush3.bf16.msra.mxu0 %v5361_v34 }
 0x30e   : > { %5004 = vmatprep.subr.bf16.mxu0 %v5362_v39 }
 0x311   : > { %5005 = vmatpush3.bf16.msra.mxu0 %v5362_v39 }
 0x312   : > { %5046 = vmatprep.subr.bf16.mxu0 %v5964_v21 }
 0x314   : > { %5007 = vmatmul.mubr.bf16.vlgmr.msra.gmra.mrb[4].mxu0 %v4758_v42 }
 0x315   : > { %5050 = vmatprep.mubr.msk.bf16.mxu0 %vm5965_vm0, %v5964_v21 }
 0x3c7   : > { %v1036_v50 = vpop.f32.mrb[0].mxu0 }
 0x3c8   : > { %v1058_v51 = vadd.f32 %v1051_v48, %v1036_v50  ;;  %v1038_v53 = vpop.f32.mrb[1].mxu0  ;;  %v5375_v50 = vld [vmem:[#allocation13 + $0xa0] sm:$0xff]  }
 0x3c9   : > { %v1059_v55 = vadd.f32 %v1055_v49, %v1038_v53  ;;  %v1040_v56 = vpop.f32.mrb[2].mxu0 }
 0x3ca   : > { %v1060_v57 = vadd.f32 %v1051_v48, %v1040_v56  ;;  %v1042_v58 = vpop.f32.mrb[3].mxu0  ;;  %v1062_v60 = vmax.f32 %v1058_v51, 0.0  ;;  %v5969_v48 = vmov 1983009808  }
 0x3cb   : > { %v1061_v59 = vadd.f32 %v1055_v49, %v1042_v58  ;;  %v1063_v62 = vmax.f32 %v1059_v55, 0.0  ;;  %v5374_v49 = vld [vmem:[#allocation13 + $0x98] sm:$0xff]   ;;  %v5376_v58 = vld [vmem:[#allocation13 + $0xa8] sm:$0xff]  }
 0x3cc   : > { %v1064_v61 = vmax.f32 %v1060_v57, 0.0 }
 0x3cd   : > { %v1065_v63 = vmax.f32 %v1061_v59, 0.0  ;;  %v1671_v59 = vunpack.c.0.s8 %v1670_v24 }
 0x3ce   : > { %v1066_v0 = vpack.c.bf16 %v1064_v61, %v1062_v60 }
 0x3cf   : > { %v1067_v1 = vpack.c.bf16 %v1065_v63, %v1063_v62 }
 0x3d1   : > { %1229 = vmatprep.mubr.bf16.mxu1 %v1067_v1 }
 0x3d2   : > { %1230 = vmatmul.mubr.bf16.vlgmr.msra.gmra.mrb[0].mxu1 %v1066_v0 }
 0x3d3   : > { %4971 = vmatpush3.bf16.msra.mxu1 %v5363_v2  ;;  %4986 = vmatprep.mubr.msk.bf16.mxu1 %vm5965_vm0, %v5964_v21  ;;  %v5377_v2 = vld [vmem:[#allocation13 + $0xb0] sm:$0xff]  }
 0x3d4   : > { %4972 = vmatprep.subr.bf16.mxu1 %v5964_v21 }
 0x3d7   : > { %4973 = vmatpush3.bf16.msra.mxu1 %v5364_v3  ;;  %v6663_v3 = vsub.s32 %v1671_v59, %v6594_v44 }
 0x3d8   : > { %4974 = vmatprep.subr.bf16.mxu1 %v5964_v21 }
 0x3db   : > { %4975 = vmatpush3.bf16.msra.mxu1 %v5365_v4 }
 0x3dc   : > { %4976 = vmatprep.subr.bf16.mxu1 %v5964_v21 }
 0x3df   : > { %4977 = vmatpush3.bf16.msra.mxu1 %v5366_v5 }
 0x3e0   : > { %4978 = vmatprep.subr.bf16.mxu1 %v5964_v21 }
 0x3e3   : > { %4979 = vmatpush3.bf16.msra.mxu1 %v5367_v6 }
 0x3e4   : > { %4980 = vmatprep.subr.bf16.mxu1 %v5964_v21 }
 0x3e7   : > { %4981 = vmatpush3.bf16.msra.mxu1 %v5368_v7  ;;  %v5008_v14 = vpop.f32.mrb[4].mxu0  ;;  %v4768_v7 = vcombine.low %v6584_v35, %v6587_v36 }
 0x3e8   : > { %4982 = vmatprep.subr.bf16.mxu1 %v5964_v21  ;;  %v6613_v15 = vadd.f32 %v5008_v14, %v1378_v13  ;;  %v1473_v16 = vpop.f32.mrb[5].mxu0 }
 0x3e9   : > { %v6615_v17 = vadd.f32 %v1473_v16, %v1378_v13  ;;  %v5009_v18 = vpop.f32.mrb[6].mxu0  ;;  %v5378_v16 = vld [vmem:[#allocation13 + $0xb8] sm:$0xff]  }
 0x3ea   : > { %v1476_v19 = vpop.f32.mrb[7].mxu0  ;;  %1919 = vrot.lane.b32.xlu0 %v6613_v15, %s5966_s16  ;;  %v6621_v20 = vadd.f32 %v5009_v18, %v1378_v13 }
 0x3eb   : > { %4983 = vmatpush3.bf16.msra.mxu1 %v5369_v8  ;;  %1927 = vrot.lane.b32.xlu1 %v6615_v17, %s5967_s21  ;;  %v6627_v25 = vadd.f32 %v1476_v19, %v1378_v13 }
 0x3ec   : > { %4984 = vmatprep.subr.bf16.mxu1 %v5964_v21 }
 0x3ee   : > { %1915 = vrot.lane.b32.xlu0 %v6615_v17, %s5966_s16 }
 0x3ef   : > { %4985 = vmatpush3.bf16.msra.mxu1 %v5370_v9  ;;  %1921 = vrot.lane.b32.xlu1 %v6621_v20, %s5966_s16 }
 0x3f0   : > { %5010 = vmatprep.subr.bf16.mxu1 %v5371_v12 }
 0x3f2   : > { %1939 = vrot.lane.b32.xlu0 %v6615_v17, %s5968_s28 }
 0x3f3   : > { %1917 = vrot.lane.b32.xlu1 %v6627_v25, %s5966_s16 }
 0x3f6   : > { %1931 = vrot.lane.b32.xlu0 %v6613_v15, %s5967_s21 }
 0x3f7   : > { %1929 = vrot.lane.b32.xlu1 %v6627_v25, %s5967_s21 }
 0x3fa   : > { %1943 = vrot.lane.b32.xlu0 %v6613_v15, %s5968_s28 }
 0x3fb   : > { %1941 = vrot.lane.b32.xlu1 %v6627_v25, %s5968_s28 }
 0x3ff   : > { %1933 = vrot.lane.b32.xlu1 %v6621_v20, %s5967_s21 }
 0x403   : > { %1945 = vrot.lane.b32.xlu1 %v6621_v20, %s5968_s28 }
 0x4a5   : > { %v4880_v26 = vpop.f32.mrb[0].mxu1 }
 0x4a6   : > { %v4881_v28 = vpop.f32.mrb[1].mxu1 }
 0x4a7   : > { %v4882_v29 = vadd.f32 %v4881_v28, %v4880_v26  ;;  %v4883_v30 = vpop.f32.mrb[2].mxu1 }
 0x4a8   : > { %v4884_v31 = vpop.f32.mrb[3].mxu1 }
 0x4a9   : > { %v1232_v32 = vadd.f32 %v4882_v29, %v1100_v27  ;;  %v4885_v33 = vadd.f32 %v4884_v31, %v4883_v30 }
 0x4ab   : > { %v1238_v34 = vmul.f32 %v1232_v32, %v6546_v52  ;;  %v1235_v37 = vadd.f32 %v4885_v33, %v1100_v27  ;;  %v1638_v52 = vunpack.c.l.s4 %v5969_v48 }
 0x4ad   : > { %v1239_v38 = vmul.f32 %v1235_v37, %v6553_v54  ;;  %v1240_v39 = vadd.f32 %v1238_v34, %v6566_v10  ;;  %v6651_v54 = vpop.permute.xlu0 %1919  ;;  %v1639_v10 = vunpack.c.0.s8 %v1638_v52 }
 0x4af   : > { %v1241_v40 = vadd.f32 %v1239_v38, %v6568_v11  ;;  %v1928_v11 = vpop.permute.xlu1 %1927  ;;  %v6654_v53 = vsub.s32 %v1639_v10, %v6594_v44 }
 0x4b0   : > { %v1951_v55 = vcombine.low %v6615_v17, %v1928_v11  ;;  %v1952_v56 = vcombine.high %v6615_v17, %v1928_v11 }
 0x4b1   : > { %v1242_v42 = vpack.c.bf16 %v1241_v40, %v1240_v39  ;;  %v1916_v51 = vpop.permute.xlu0 %1915 }
 0x4b2   : > { %v1959_v61 = vrot.slane %v1951_v55, %v6654_v53  ;;  %v1966_v62 = vrot.slane %v1952_v56, %v6654_v53 }
 0x4b3   : > { %4987 = vmatmul.mubr.bf16.vlgmr.msra.gmra.mrb[4].mxu1 %v1242_v42  ;;  %v6658_v57 = vpop.permute.xlu1 %1921 }
 0x4b4   : > { %5011 = vmatpush3.bf16.msra.mxu1 %v5371_v12  ;;  %5026 = vmatprep.mubr.bf16.mxu1 %v4767_v41 }
 0x4b5   : > { %5012 = vmatprep.subr.bf16.mxu1 %v5372_v43  ;;  %v1940_v60 = vpop.permute.xlu0 %1939 }
 0x4b6   : > { %v1967_v0 = vcombine.low %v1916_v51, %v1940_v60  ;;  %v1968_v1 = vcombine.high %v1916_v51, %v1940_v60 }
 0x4b7   : > { %v1918_v63 = vpop.permute.xlu1 %1917 }
 0x4b8   : > { %5013 = vmatpush3.bf16.msra.mxu1 %v5372_v43  ;;  %v1975_v4 = vrot.slane %v1967_v0, %v6654_v53  ;;  %v1982_v5 = vrot.slane %v1968_v1, %v6654_v53 }
 0x4b9   : > { %5014 = vmatprep.subr.bf16.mxu1 %v5373_v46  ;;  %v1932_v6 = vpop.permute.xlu0 %1931 }
 0x4ba   : > { %v1983_v9 = vcombine.low %v1959_v61, %v1975_v4  ;;  %v1984_v12 = vcombine.high %v1959_v61, %v1975_v4  ;;  %v1999_v13 = vcombine.low %v1966_v62, %v1982_v5  ;;  %v2000_v14 = vcombine.high %v1966_v62, %v1982_v5 }
 0x4bb   : > { %v1930_v8 = vpop.permute.xlu1 %1929  ;;  %v2087_v19 = vcombine.low %v6613_v15, %v1932_v6  ;;  %v2088_v26 = vcombine.high %v6613_v15, %v1932_v6 }
 0x4bc   : > { %5015 = vmatpush3.bf16.msra.mxu1 %v5373_v46  ;;  %v2019_v17 = vcombine.low %v6627_v25, %v1930_v8  ;;  %v2020_v18 = vcombine.high %v6627_v25, %v1930_v8  ;;  %v1991_v27 = vrot.slane %v1983_v9, %v6663_v3  ;;  %v1998_v28 = vrot.slane %v1984_v12, %v6663_v3 }
 0x4bd   : > { %5016 = vmatprep.subr.bf16.mxu1 %v5374_v49  ;;  %v2007_v35 = vrot.slane %v1999_v13, %v6663_v3  ;;  %v2014_v36 = vrot.slane %v2000_v14, %v6663_v3  ;;  %v2095_v31 = vrot.slane %v2087_v19, %v6654_v53  ;;  %v6681_v25 = vrot.slane %v2088_v26, %v6654_v53  ;;  %v1944_v32 = vpop.permute.xlu0 %1943 }
 0x4be   : > { %v2027_v29 = vrot.slane %v2019_v17, %v6654_v53  ;;  %v2034_v30 = vrot.slane %v2020_v18, %v6654_v53  ;;  %v2223_v33 = vcombine.low %v1991_v27, %v1998_v28  ;;  %v4781_v34 = vcombine.high %v1991_v27, %v1998_v28 }
 0x4bf   : > { %v1942_v15 = vpop.permute.xlu1 %1941  ;;  %v2239_v37 = vcombine.low %v2007_v35, %v2014_v36  ;;  %v4782_v38 = vcombine.high %v2007_v35, %v2014_v36  ;;  %v2103_v41 = vcombine.low %v6651_v54, %v1944_v32  ;;  %v2104_v42 = vcombine.high %v6651_v54, %v1944_v32 }
 0x4c0   : > { %5017 = vmatpush3.bf16.msra.mxu1 %v5374_v49  ;;  %v2035_v39 = vcombine.low %v1918_v63, %v1942_v15  ;;  %v2036_v40 = vcombine.high %v1918_v63, %v1942_v15  ;;  %v6686_v43 = vrot.slane %v2223_v33, %v6654_v53  ;;  %v6689_v46 = vrot.slane %v4781_v34, %v6654_v53 }
 0x4c1   : > { %5018 = vmatprep.subr.bf16.mxu1 %v5375_v50  ;;  %v6692_v48 = vrot.slane %v2239_v37, %v6654_v53  ;;  %v6695_v52 = vrot.slane %v4782_v38, %v6654_v53  ;;  %v2111_v11 = vrot.slane %v2103_v41, %v6654_v53  ;;  %v2118_v54 = vrot.slane %v2104_v42, %v6654_v53 }
 0x4c2   : > { %v2043_v49 = vrot.slane %v2035_v39, %v6654_v53  ;;  %v2050_v10 = vrot.slane %v2036_v40, %v6654_v53  ;;  %v2255_v23 = vcombine.low %v6686_v43, %v6689_v46  ;;  %v2256_v51 = vcombine.high %v6686_v43, %v6689_v46 }
 0x4c3   : > { %v2271_v24 = vcombine.low %v6692_v48, %v6695_v52  ;;  %v2272_v55 = vcombine.high %v6692_v48, %v6695_v52  ;;  %v2119_v63 = vcombine.low %v2095_v31, %v2111_v11  ;;  %v2120_v0 = vcombine.high %v2095_v31, %v2111_v11 }
 0x4c4   : > { %5019 = vmatpush3.bf16.msra.mxu1 %v5375_v50  ;;  %v1934_v50 = vpop.permute.xlu1 %1933  ;;  %v2051_v56 = vcombine.low %v2027_v29, %v2043_v49  ;;  %v2067_v59 = vcombine.low %v2034_v30, %v2050_v10  ;;  %v2068_v60 = vcombine.high %v2034_v30, %v2050_v10  ;;  %v2135_v19 = vcombine.low %v6681_v25, %v2118_v54 }
 0x4c5   : > { %5020 = vmatprep.subr.bf16.mxu1 %v5376_v58  ;;  %v2155_v61 = vcombine.low %v6621_v20, %v1934_v50  ;;  %v2156_v62 = vcombine.high %v6621_v20, %v1934_v50  ;;  %v2127_v20 = vrot.slane %v2119_v63, %v6663_v3  ;;  %v2136_v26 = vcombine.high %v6681_v25, %v2118_v54 }
 0x4c6   : > { %v2059_v1 = vrot.slane %v2051_v56, %v6663_v3  ;;  %v2075_v4 = vrot.slane %v2067_v59, %v6663_v3  ;;  %v2082_v5 = vrot.slane %v2068_v60, %v6663_v3  ;;  %v2143_v31 = vrot.slane %v2135_v19, %v6663_v3 }
 0x4c7   : > { %v2163_v6 = vrot.slane %v2155_v61, %v6654_v53  ;;  %v2170_v8 = vrot.slane %v2156_v62, %v6654_v53  ;;  %v6735_v25 = vrot.slane %v2255_v23, %v6663_v3  ;;  %v6738_v33 = vrot.slane %v2271_v24, %v6663_v3 }
 0x4c8   : > { %5021 = vmatpush3.bf16.msra.mxu1 %v5376_v58  ;;  %v2052_v58 = vcombine.high %v2027_v29, %v2043_v49  ;;  %v1946_v9 = vpop.permute.xlu1 %1945  ;;  %v2307_v14 = vcombine.low %v2075_v4, %v2082_v5 }
 0x4c9   : > { %5022 = vmatprep.subr.bf16.mxu1 %v5377_v2  ;;  %v2171_v17 = vcombine.low %v6658_v57, %v1946_v9  ;;  %v2172_v18 = vcombine.high %v6658_v57, %v1946_v9  ;;  %v2150_v57 = vrot.slane %v2136_v26, %v6663_v3  ;;  %v2287_v56 = vcombine.low %v6735_v25, %v6738_v33 }
 0x4ca   : > { %v2314_v35 = vrot.slane %v2307_v14, %v6654_v53 }
 0x4cb   : > { %v2179_v29 = vrot.slane %v2171_v17, %v6654_v53  ;;  %v2186_v30 = vrot.slane %v2172_v18, %v6654_v53  ;;  %v2375_v42 = vcombine.low %v2143_v31, %v2150_v57  ;;  %v4786_v49 = vcombine.high %v2143_v31, %v2150_v57 }
 0x4cc   : > { %5023 = vmatpush3.bf16.msra.mxu1 %v5377_v2  ;;  %v2066_v2 = vrot.slane %v2052_v58, %v6663_v3 }
 0x4cd   : > { %5024 = vmatprep.subr.bf16.mxu1 %v5378_v16  ;;  %v2187_v34 = vcombine.low %v2163_v6, %v2179_v29  ;;  %v2188_v37 = vcombine.high %v2163_v6, %v2179_v29  ;;  %v2203_v38 = vcombine.low %v2170_v8, %v2186_v30  ;;  %v2204_v39 = vcombine.high %v2170_v8, %v2186_v30 }
 0x4ce   : > { %v2291_v12 = vcombine.low %v2059_v1, %v2066_v2  ;;  %v4783_v13 = vcombine.high %v2059_v1, %v2066_v2  ;;  %v2382_v23 = vrot.slane %v2375_v42, %v6654_v53  ;;  %v2390_v24 = vrot.slane %v4786_v49, %v6654_v53 }
 0x4cf   : > { %v2195_v10 = vrot.slane %v2187_v34, %v6663_v3  ;;  %v2202_v11 = vrot.slane %v2188_v37, %v6663_v3  ;;  %v2211_v54 = vrot.slane %v2203_v38, %v6663_v3  ;;  %v2218_v50 = vrot.slane %v2204_v39, %v6663_v3 }
 0x4d0   : > { %5025 = vmatpush3.bf16.msra.mxu1 %v5378_v16  ;;  %v4784_v16 = vcombine.high %v2075_v4, %v2082_v5  ;;  %v2298_v27 = vrot.slane %v2291_v12, %v6654_v53  ;;  %v2306_v28 = vrot.slane %v4783_v13, %v6654_v53  ;;  %v2270_v1 = vrot.slane %v2256_v51, %v6663_v3 }
 0x4d1   : > { %5030 = vmatprep.subr.bf16.mxu1 %v5964_v21  ;;  %v2427_v59 = vcombine.low %v2195_v10, %v2202_v11  ;;  %v4787_v60 = vcombine.high %v2195_v10, %v2202_v11  ;;  %v2443_v61 = vcombine.low %v2211_v54, %v2218_v50  ;;  %v4788_v62 = vcombine.high %v2211_v54, %v2218_v50 }
 0x4d2   : > { %v2322_v36 = vrot.slane %v4784_v16, %v6654_v53  ;;  %v2323_v58 = vcombine.low %v2298_v27, %v2306_v28  ;;  %v2286_v2 = vrot.slane %v2272_v55, %v6663_v3  ;;  %v2407_v46 = vcombine.low %v2382_v23, %v2390_v24 }
 0x4d3   : > { %5027 = vmatmul.mubr.bf16.vlgmr.msra.gmra.mrb[8].mxu1 %v4768_v7  ;;  %v2134_v7 = vrot.slane %v2120_v0, %v6663_v3  ;;  %v2434_v4 = vrot.slane %v2427_v59, %v6654_v53  ;;  %v2442_v5 = vrot.slane %v4787_v60, %v6654_v53  ;;  %v2450_v6 = vrot.slane %v2443_v61, %v6654_v53 }
 0x4d4   : > { %5034 = vmatprep.mubr.msk.bf16.mxu1 %vm5965_vm0, %v5964_v21  ;;  %v2331_v63 = vrot.slane %v2323_v58, %v6663_v3  ;;  %v2339_v0 = vcombine.low %v2314_v35, %v2322_v36  ;;  %v2458_v8 = vrot.slane %v4788_v62, %v6654_v53  ;;  %v2340_v12 = vcombine.high %v2314_v35, %v2322_v36 }
 0x4d5   : > { %v2359_v32 = vcombine.low %v2127_v20, %v2134_v7  ;;  %v4785_v15 = vcombine.high %v2127_v20, %v2134_v7  ;;  %v2289_v20 = vcombine.low %v2270_v1, %v2286_v2  ;;  %v2324_v7 = vcombine.high %v2298_v27, %v2306_v28 }
 0x4d6   : > { %v2347_v9 = vrot.slane %v2339_v0, %v6663_v3  ;;  %v2459_v51 = vcombine.low %v2434_v4, %v2442_v5  ;;  %v2475_v13 = vcombine.low %v2450_v6, %v2458_v8  ;;  %v2354_v52 = vrot.slane %v2340_v12, %v6663_v3 }
 0x4d7   : > { %v2366_v40 = vrot.slane %v2359_v32, %v6654_v53  ;;  %v2374_v41 = vrot.slane %v4785_v15, %v6654_v53  ;;  %v2338_v48 = vrot.slane %v2324_v7, %v6663_v3  ;;  %v2415_v17 = vrot.slane %v2407_v46, %v6663_v3 }
 0x4d8   : > { %v2355_v14 = vcombine.low %v2331_v63, %v2347_v9  ;;  %v2467_v18 = vrot.slane %v2459_v51, %v6663_v3  ;;  %v2483_v19 = vrot.slane %v2475_v13, %v6663_v3  ;;  %v2408_v35 = vcombine.high %v2382_v23, %v2390_v24 }
 0x4d9   : > { %v2391_v43 = vcombine.low %v2366_v40, %v2374_v41  ;;  %v2392_v55 = vcombine.high %v2366_v40, %v2374_v41  ;;  %v2357_v27 = vcombine.low %v2338_v48, %v2354_v52  ;;  %v2460_v30 = vcombine.high %v2434_v4, %v2442_v5  ;;  %v1271_v4 = vld [vmem:[#allocation11 + $0x4] ss:$0 sm:$0xff] }
 0x4da   : > { %v2495_v26 = vpack.c.bf16 %v2355_v14, %v2287_v56  ;;  %v2491_v29 = vcombine.low %v2467_v18, %v2483_v19  ;;  %v2476_v31 = vcombine.high %v2450_v6, %v2458_v8  ;;  %v2422_v15 = vrot.slane %v2408_v35, %v6663_v3 }
 0x4db   : > { %v2399_v16 = vrot.slane %v2391_v43, %v6663_v3  ;;  %v2406_v28 = vrot.slane %v2392_v55, %v6663_v3  ;;  %v2499_v32 = vpack.c.bf16 %v2357_v27, %v2289_v20  ;;  %v2474_v34 = vrot.slane %v2460_v30, %v6663_v3 }
 0x4dc   : > { %v3100_v57 = vsel %vm3095_vm1, %v2495_v26, 0  ;;  %v2490_v37 = vrot.slane %v2476_v31, %v6663_v3  ;;  %v2288_v11 = vcombine.high %v6735_v25, %v6738_v33  ;;  %v2356_v54 = vcombine.high %v2331_v63, %v2347_v9 }
 0x4dd   : > { %v2423_v36 = vcombine.low %v2399_v16, %v2415_v17  ;;  %5031 = vmatpush3.bf16.xpose.msra.mxu1 %v3100_v57  ;;  %v3200_v38 = vsel %vm3095_vm1, %v2499_v32, 0  ;;  %v2425_v40 = vcombine.low %v2406_v28, %v2422_v15  ;;  %v2424_v50 = vcombine.high %v2399_v16, %v2415_v17 }
 0x4de   : > { %5032 = vmatprep.subr.bf16.mxu1 %v5964_v21  ;;  %5047 = vmatpush3.bf16.xpose.msra.mxu0 %v3200_v38  ;;  %v2493_v41 = vcombine.low %v2474_v34, %v2490_v37  ;;  %v2492_v23 = vcombine.high %v2467_v18, %v2483_v19  ;;  %v2290_v24 = vcombine.high %v2270_v1, %v2286_v2 }
 0x4df   : > { %v2496_v39 = vpack.c.bf16 %v2491_v29, %v2423_v36  ;;  %5048 = vmatprep.subr.bf16.mxu0 %v5964_v21  ;;  %v2358_v56 = vcombine.high %v2338_v48, %v2354_v52  ;;  %v6784_v58 = vpack.c.bf16 %v2356_v54, %v2288_v11  ;;  %v2426_v59 = vcombine.high %v2406_v28, %v2422_v15 }
 0x4e0   : > { %v2500_v42 = vpack.c.bf16 %v2493_v41, %v2425_v40  ;;  %v2494_v60 = vcombine.high %v2474_v34, %v2490_v37  ;;  %v6786_v61 = vpack.c.bf16 %v2492_v23, %v2424_v50 }
 0x4e1   : > { %v3103_v49 = vsel %vm3095_vm1, %v2496_v39, 0  ;;  %v6788_v62 = vpack.c.bf16 %v2358_v56, %v2290_v24 }
 0x4e2   : > { %v3203_v10 = vsel %vm3095_vm1, %v2500_v42, 0  ;;  %v6790_v0 = vpack.c.bf16 %v2494_v60, %v2426_v59 }
 0x4e5   : > { %5033 = vmatpush3.bf16.xpose.msra.mxu1 %v3103_v49 }
 0x4e6   : > { %5038 = vmatprep.subr.bf16.mxu1 %v5964_v21  ;;  %5049 = vmatpush3.bf16.xpose.msra.mxu0 %v3203_v10 }
 0x4e7   : > { %5062 = vmatprep.subr.bf16.mxu0 %v5964_v21 }
 0x586   : > { %v1354_v5 = vpop.f32.mrb[4].mxu1 }
 0x587   : > { %v1355_v6 = vadd.f32 %v1354_v5, %v1271_v4  ;;  %v4988_v8 = vpop.f32.mrb[5].mxu1 }
 0x588   : > { %v1357_v25 = vpop.f32.mrb[6].mxu1 }
 0x589   : > { %v1358_v33 = vadd.f32 %v1357_v25, %v1271_v4  ;;  %1617 = vrot.lane.b32.xlu0 %v1355_v6, %s5966_s16  ;;  %v4989_v63 = vpop.f32.mrb[7].mxu1 }
 0x58b   : > { %1619 = vrot.lane.b32.xlu1 %v1358_v33, %s5966_s16 }
 0x58d   : > { %1623 = vrot.lane.b32.xlu0 %v1355_v6, %s5967_s21 }
 0x58f   : > { %1625 = vrot.lane.b32.xlu1 %v1358_v33, %s5967_s21 }
 0x591   : > { %1629 = vrot.lane.b32.xlu0 %v1355_v6, %s5968_s28 }
 0x593   : > { %1631 = vrot.lane.b32.xlu1 %v1358_v33, %s5968_s28 }
 0x5a6   : > { %v6798_v1 = vpop.f32.mrb[8].mxu1 }
 0x5a7   : > { %v6800_v2 = vpop.f32.mrb[9].mxu1 }
 0x5a8   : > { %v6802_v9 = vpop.f32.mrb[10].mxu1 }
 0x5a9   : > { %v6804_v20 = vpop.f32.mrb[11].mxu1 }
 0x5fb   : > { %v1618_v7 = vpop.permute.xlu0 %1617 }
 0x5fd   : > { %v1620_v12 = vpop.permute.xlu1 %1619 }
 0x5ff   : > { %v1624_v43 = vpop.permute.xlu0 %1623 }
 0x600   : > { %v1635_v46 = vcombine.low %v1355_v6, %v1624_v43  ;;  %v1636_v51 = vcombine.high %v1355_v6, %v1624_v43 }
 0x601   : > { %v1626_v13 = vpop.permute.xlu1 %1625 }
 0x602   : > { %v1643_v55 = vrot.slane %v1635_v46, %v6654_v53  ;;  %v1650_v16 = vrot.slane %v1636_v51, %v6654_v53  ;;  %v1703_v17 = vcombine.low %v1358_v33, %v1626_v13  ;;  %v1704_v18 = vcombine.high %v1358_v33, %v1626_v13 }
 0x603   : > { %v1630_v14 = vpop.permute.xlu0 %1629 }
 0x604   : > { %v1651_v48 = vcombine.low %v1618_v7, %v1630_v14  ;;  %v1652_v52 = vcombine.high %v1618_v7, %v1630_v14  ;;  %v1711_v57 = vrot.slane %v1703_v17, %v6654_v53  ;;  %v1718_v32 = vrot.slane %v1704_v18, %v6654_v53 }
 0x605   : > { %v1632_v19 = vpop.permute.xlu1 %1631 }
 0x606   : > { %v1659_v26 = vrot.slane %v1651_v48, %v6654_v53  ;;  %v1666_v27 = vrot.slane %v1652_v52, %v6654_v53  ;;  %v1719_v28 = vcombine.low %v1620_v12, %v1632_v19  ;;  %v1720_v35 = vcombine.high %v1620_v12, %v1632_v19 }
 0x608   : > { %v1667_v36 = vcombine.low %v1643_v55, %v1659_v26  ;;  %v1668_v29 = vcombine.high %v1643_v55, %v1659_v26  ;;  %v1683_v30 = vcombine.low %v1650_v16, %v1666_v27  ;;  %v1684_v31 = vcombine.high %v1650_v16, %v1666_v27 }
 0x609   : > { %v1727_v15 = vrot.slane %v1719_v28, %v6654_v53  ;;  %v1734_v34 = vrot.slane %v1720_v35, %v6654_v53 }
 0x60a   : > { %v1675_v37 = vrot.slane %v1667_v36, %v6663_v3  ;;  %v1682_v38 = vrot.slane %v1668_v29, %v6663_v3  ;;  %v1691_v39 = vrot.slane %v1683_v30, %v6663_v3  ;;  %v1698_v40 = vrot.slane %v1684_v31, %v6663_v3 }
 0x60b   : > { %v1735_v41 = vcombine.low %v1711_v57, %v1727_v15  ;;  %v1736_v42 = vcombine.high %v1711_v57, %v1727_v15  ;;  %v1751_v49 = vcombine.low %v1718_v32, %v1734_v34  ;;  %v1752_v10 = vcombine.high %v1718_v32, %v1734_v34 }
 0x60c   : > { %v1771_v11 = vcombine.low %v1675_v37, %v1682_v38  ;;  %v4777_v54 = vcombine.high %v1675_v37, %v1682_v38  ;;  %v1787_v50 = vcombine.low %v1691_v39, %v1698_v40  ;;  %v4778_v23 = vcombine.high %v1691_v39, %v1698_v40 }
 0x60d   : > { %v1743_v24 = vrot.slane %v1735_v41, %v6663_v3  ;;  %v1750_v56 = vrot.slane %v1736_v42, %v6663_v3  ;;  %v1759_v59 = vrot.slane %v1751_v49, %v6663_v3  ;;  %v1766_v60 = vrot.slane %v1752_v10, %v6663_v3 }
 0x60e   : > { %v1778_v4 = vrot.slane %v1771_v11, %v6654_v53  ;;  %v1786_v5 = vrot.slane %v4777_v54, %v6654_v53  ;;  %v1794_v6 = vrot.slane %v1787_v50, %v6654_v53  ;;  %v1802_v8 = vrot.slane %v4778_v23, %v6654_v53 }
 0x60f   : > { %v1839_v25 = vcombine.low %v1743_v24, %v1750_v56  ;;  %v4779_v33 = vcombine.high %v1743_v24, %v1750_v56  ;;  %v1855_v63 = vcombine.low %v1759_v59, %v1766_v60  ;;  %v4780_v7 = vcombine.high %v1759_v59, %v1766_v60 }
 0x610   : > { %v1803_v12 = vcombine.low %v1778_v4, %v1786_v5  ;;  %v1804_v43 = vcombine.high %v1778_v4, %v1786_v5  ;;  %v1819_v46 = vcombine.low %v1794_v6, %v1802_v8  ;;  %v1820_v51 = vcombine.high %v1794_v6, %v1802_v8 }
 0x611   : > { %v1846_v13 = vrot.slane %v1839_v25, %v6654_v53  ;;  %v1854_v14 = vrot.slane %v4779_v33, %v6654_v53  ;;  %v1862_v48 = vrot.slane %v1855_v63, %v6654_v53  ;;  %v1870_v52 = vrot.slane %v4780_v7, %v6654_v53  ;;  %v1505_v7 = vld [vmem:[#allocation11 + $0x6] ss:$0 sm:$0xff] }
 0x612   : > { %v1811_v55 = vrot.slane %v1803_v12, %v6663_v3  ;;  %v1818_v16 = vrot.slane %v1804_v43, %v6663_v3  ;;  %v1827_v17 = vrot.slane %v1819_v46, %v6663_v3  ;;  %v1834_v18 = vrot.slane %v1820_v51, %v6663_v3 }
 0x613   : > { %v1871_v19 = vcombine.low %v1846_v13, %v1854_v14  ;;  %v1872_v26 = vcombine.high %v1846_v13, %v1854_v14  ;;  %v1887_v27 = vcombine.low %v1862_v48, %v1870_v52  ;;  %v1888_v28 = vcombine.high %v1862_v48, %v1870_v52 }
 0x614   : > { %v1835_v31 = vcombine.low %v1811_v55, %v1827_v17  ;;  %v1837_v32 = vcombine.low %v1818_v16, %v1834_v18  ;;  %v3150_v38 = vsel %vm3095_vm1, %v6784_v58, 0  ;;  %v3153_v39 = vsel %vm3095_vm1, %v6786_v61, 0 }
 0x615   : > { %v1879_v35 = vrot.slane %v1871_v19, %v6663_v3  ;;  %v1886_v36 = vrot.slane %v1872_v26, %v6663_v3  ;;  %v1895_v29 = vrot.slane %v1887_v27, %v6663_v3  ;;  %v1902_v30 = vrot.slane %v1888_v28, %v6663_v3 }
 0x616   : > { %v1836_v41 = vcombine.high %v1811_v55, %v1827_v17  ;;  %v3250_v42 = vsel %vm3095_vm1, %v6788_v62, 0  ;;  %v3253_v61 = vsel %vm3095_vm1, %v6790_v0, 0  ;;  %v1838_v10 = vcombine.high %v1818_v16, %v1834_v18 }
 0x617   : > { %v1903_v57 = vcombine.low %v1879_v35, %v1895_v29  ;;  %v1905_v15 = vcombine.low %v1886_v36, %v1902_v30  ;;  %v1904_v40 = vcombine.high %v1879_v35, %v1895_v29  ;;  %v1906_v49 = vcombine.high %v1886_v36, %v1902_v30 }
 0x618   : > { %v1604_v43 = vadd.f32 %v6804_v20, %v1505_v7  ;;  %v6877_v51 = vadd.f32 %v6800_v2, %v1505_v7  ;;  %v6890_v2 = vadd.f32 %v6802_v9, %v1505_v7  ;;  %v6899_v55 = vadd.f32 %v6798_v1, %v1505_v7 }
 0x619   : > { %v1907_v34 = vpack.c.bf16 %v1903_v57, %v1835_v31  ;;  %v1909_v37 = vpack.c.bf16 %v1905_v15, %v1837_v32  ;;  %v1908_v58 = vpack.c.bf16 %v1904_v40, %v1836_v41  ;;  %v1910_v11 = vpack.c.bf16 %v1906_v49, %v1838_v10 }
 0x61b   : > { %5035 = vmatmul.mubr.msk.bf16.vlgmr.msra.gmra.mrb[12].mxu1 %vm3095_vm1, %v1907_v34  ;;  %5051 = vmatmul.mubr.msk.bf16.vlgmr.msra.gmra.mrb[8].mxu0 %vm3095_vm1, %v1909_v37 }
 0x61c   : > { %5039 = vmatpush3.bf16.xpose.msra.mxu1 %v3150_v38  ;;  %5042 = vmatprep.mubr.msk.bf16.mxu1 %vm5965_vm0, %v5964_v21 }
 0x61d   : > { %5040 = vmatprep.subr.bf16.mxu1 %v5964_v21  ;;  %5066 = vmatprep.mubr.msk.bf16.mxu0 %vm5965_vm0, %v5964_v21 }
 0x624   : > { %5041 = vmatpush3.bf16.xpose.msra.mxu1 %v3153_v39 }
 0x625   : > { %5054 = vmatprep.subr.bf16.mxu1 %v5964_v21 }
 0x62b   : > { %5043 = vmatmul.mubr.msk.bf16.vlgmr.msra.gmra.mrb[16].mxu1 %vm3095_vm1, %v1908_v58 }
 0x62c   : > { %5055 = vmatpush3.bf16.xpose.msra.mxu1 %v3250_v42  ;;  %5058 = vmatprep.mubr.msk.bf16.mxu1 %vm5965_vm0, %v5964_v21 }
 0x62d   : > { %5056 = vmatprep.subr.bf16.mxu1 %v5964_v21 }
 0x634   : > { %5057 = vmatpush3.bf16.xpose.msra.mxu1 %v3253_v61 }
 0x635   : > { %5070 = vmatprep.subr.bf16.mxu1 %v5964_v21 }
 0x63b   : > { %5059 = vmatmul.mubr.msk.bf16.vlgmr.msra.gmra.mrb[20].mxu1 %vm3095_vm1, %v1910_v11 }
 0x63c   : > { %5074 = vmatprep.mubr.msk.bf16.mxu1 %vm5965_vm0, %v5964_v21 }
 0x6ee   : > { %v3139_v62 = vpop.f32.mrb[12].mxu1  ;;  %v6862_v54 = vpop.f32.mrb[8].mxu0 }
 0x6ef   : > { %v5036_v50 = vpop.f32.mrb[13].mxu1  ;;  %v5052_v23 = vpop.f32.mrb[9].mxu0  ;;  %v3296_v24 = vsel %vm3095_vm1, %v3139_v62, -inf  ;;  %v3308_v46 = vsel %vm3095_vm1, %v6862_v54, -inf }
 0x6f0   : > { %v6865_v56 = vpop.f32.mrb[10].mxu0  ;;  %3297 = vmax.xlane.f32.xlu0 %v3296_v24  ;;  %v3142_v0 = vpop.f32.mrb[14].mxu1 }
 0x6f1   : > { %v5037_v59 = vpop.f32.mrb[15].mxu1  ;;  %v5053_v60 = vpop.f32.mrb[11].mxu0  ;;  %v3299_v4 = vsel %vm3095_vm1, %v3142_v0, -inf  ;;  %v3311_v5 = vsel %vm3095_vm1, %v6865_v56, -inf }
 0x6f2   : > { %3300 = vmax.xlane.f32.xlu1 %v3299_v4 }
 0x6f6   : > { %3312 = vmax.xlane.f32.xlu1 %v3311_v5 }
 0x6fe   : > { %v3189_v6 = vpop.f32.mrb[16].mxu1 }
 0x6ff   : > { %v5044_v8 = vpop.f32.mrb[17].mxu1  ;;  %v3302_v25 = vsel %vm3095_vm1, %v3189_v6, -inf }
 0x700   : > { %3303 = vmax.xlane.f32.xlu0 %v3302_v25  ;;  %v3192_v33 = vpop.f32.mrb[18].mxu1 }
 0x701   : > { %v5045_v63 = vpop.f32.mrb[19].mxu1  ;;  %v3305_v12 = vsel %vm3095_vm1, %v3192_v33, -inf }
 0x704   : > { %3306 = vmax.xlane.f32.xlu0 %v3305_v12 }
 0x707   : > { %2509 = vrot.lane.b32.xlu1 %v1604_v43, %s5966_s16 }
 0x708   : > { %3309 = vmax.xlane.f32.xlu0 %v3308_v46 }
 0x70b   : > { %2519 = vrot.lane.b32.xlu1 %v6877_v51, %s5967_s21 }
 0x70e   : > { %v6881_v13 = vpop.f32.mrb[20].mxu1 }
 0x70f   : > { %v5060_v14 = vpop.f32.mrb[21].mxu1  ;;  %v3314_v48 = vsel %vm3095_vm1, %v6881_v13, -inf  ;;  %2521 = vrot.lane.b32.xlu1 %v1604_v43, %s5967_s21 }
 0x710   : > { %3315 = vmax.xlane.f32.xlu0 %v3314_v48  ;;  %v6886_v20 = vpop.f32.mrb[22].mxu1 }
 0x711   : > { %v5061_v52 = vpop.f32.mrb[23].mxu1  ;;  %v3317_v9 = vsel %vm3095_vm1, %v6886_v20, -inf }
 0x713   : > { %2533 = vrot.lane.b32.xlu1 %v1604_v43, %s5968_s28 }
 0x717   : > { %2513 = vrot.lane.b32.xlu1 %v6890_v2, %s5966_s16 }
 0x726   : > { %2507 = vrot.lane.b32.xlu0 %v6877_v51, %s5966_s16 }
 0x72a   : > { %2531 = vrot.lane.b32.xlu0 %v6877_v51, %s5968_s28 }
 0x72e   : > { %2511 = vrot.lane.b32.xlu0 %v6899_v55, %s5966_s16 }
 0x732   : > { %2523 = vrot.lane.b32.xlu0 %v6899_v55, %s5967_s21 }
 0x736   : > { %2535 = vrot.lane.b32.xlu0 %v6899_v55, %s5968_s28 }
 0x73b   : > { %3318 = vmax.xlane.f32.xlu1 %v3317_v9 }
 0x74c   : > { %2525 = vrot.lane.b32.xlu1 %v6890_v2, %s5967_s21 }
 0x77d   : > { %v3298_v16 = vpop.xlane.xlu0 %3297 }
 0x77e   : > { %v3320_v17 = vsub.f32 %v3139_v62, %v3298_v16 }
 0x77f   : > { %v3301_v1 = vpop.xlane.xlu1 %3300 }
 0x780   : > { %v3328_v18 = vmul.f32 1.442695, %v3320_v17  ;;  %v3321_v19 = vsub.f32 %v3142_v0, %v3301_v1 }
 0x782   : > { %5433 = vpow2.f32 %v3328_v18  ;;  %v3330_v26 = vmul.f32 1.442695, %v3321_v19 }
 0x783   : > { %v6911_v27 = vpop.xlane.xlu1 %3312 }
 0x784   : > { %5435 = vpow2.f32 %v3330_v26 }
 0x787   : > { %v2510_v28 = vpop.permute.xlu1 %2509 }
 0x78b   : > { %v6913_v35 = vpop.permute.xlu1 %2519 }
 0x78c   : > { %v6915_v36 = vpop.eup %5433 }
 0x78d   : > { %v3304_v29 = vpop.xlane.xlu0 %3303  ;;  %v3344_v30 = vsel %vm3095_vm1, %v6915_v36, 0.0 }
 0x78e   : > { %v6919_v31 = vpop.eup %5435  ;;  %v3322_v57 = vsub.f32 %v3189_v6, %v3304_v29  ;;  %3345 = vadd.xlane.f32.xlu0 %v3344_v30 }
 0x78f   : > { %v2522_v32 = vpop.permute.xlu1 %2521  ;;  %v3347_v15 = vsel %vm3095_vm1, %v6919_v31, 0.0 }
 0x790   : > { %v3332_v34 = vmul.f32 1.442695, %v3322_v57  ;;  %3348 = vadd.xlane.f32.xlu1 %v3347_v15  ;;  %v2611_v37 = vcombine.low %v1604_v43, %v2522_v32  ;;  %v2612_v38 = vcombine.high %v1604_v43, %v2522_v32  ;;  %v2543_v57 = vcombine.low %v6877_v51, %v6913_v35 }
 0x791   : > { %v3307_v39 = vpop.xlane.xlu0 %3306 }
 0x792   : > { %5437 = vpow2.f32 %v3332_v34  ;;  %v3323_v40 = vsub.f32 %v3192_v33, %v3307_v39  ;;  %v2619_v49 = vrot.slane %v2611_v37, %v6654_v53  ;;  %v2626_v10 = vrot.slane %v2612_v38, %v6654_v53 }
 0x793   : > { %v2534_v41 = vpop.permute.xlu1 %2533 }
 0x794   : > { %v3334_v58 = vmul.f32 1.442695, %v3323_v40  ;;  %v2627_v42 = vcombine.low %v2510_v28, %v2534_v41  ;;  %v2628_v61 = vcombine.high %v2510_v28, %v2534_v41  ;;  %v2551_v41 = vrot.slane %v2543_v57, %v6654_v53 }
 0x795   : > { %v3310_v11 = vpop.xlane.xlu0 %3309 }
 0x796   : > { %5439 = vpow2.f32 %v3334_v58  ;;  %v2635_v62 = vrot.slane %v2627_v42, %v6654_v53  ;;  %v2642_v50 = vrot.slane %v2628_v61, %v6654_v53  ;;  %v3324_v23 = vsub.f32 %v6862_v54, %v3310_v11 }
 0x798   : > { %v2643_v24 = vcombine.low %v2619_v49, %v2635_v62  ;;  %v2644_v0 = vcombine.high %v2619_v49, %v2635_v62  ;;  %v2659_v59 = vcombine.low %v2626_v10, %v2642_v50  ;;  %v2660_v60 = vcombine.high %v2626_v10, %v2642_v50 }
 0x799   : > { %v3336_v4 = vmul.f32 1.442695, %v3324_v23 }
 0x79a   : > { %v2651_v5 = vrot.slane %v2643_v24, %v6663_v3  ;;  %v2658_v6 = vrot.slane %v2644_v0, %v6663_v3  ;;  %v2667_v8 = vrot.slane %v2659_v59, %v6663_v3  ;;  %v2674_v25 = vrot.slane %v2660_v60, %v6663_v3 }
 0x79b   : > { %5441 = vpow2.f32 %v3336_v4 }
 0x79c   : > { %v6932_v33 = vpop.eup %5437  ;;  %v2883_v63 = vcombine.low %v2651_v5, %v2658_v6  ;;  %v4791_v7 = vcombine.high %v2651_v5, %v2658_v6  ;;  %v2899_v12 = vcombine.low %v2667_v8, %v2674_v25  ;;  %v4792_v54 = vcombine.high %v2667_v8, %v2674_v25 }
 0x79d   : > { %v3316_v43 = vpop.xlane.xlu0 %3315  ;;  %v3350_v46 = vsel %vm3095_vm1, %v6932_v33, 0.0 }
 0x79e   : > { %v2890_v14 = vrot.slane %v2883_v63, %v6654_v53  ;;  %v2898_v48 = vrot.slane %v4791_v7, %v6654_v53  ;;  %v2906_v52 = vrot.slane %v2899_v12, %v6654_v53  ;;  %v2914_v9 = vrot.slane %v4792_v54, %v6654_v53  ;;  %3351 = vadd.xlane.f32.xlu0 %v3350_v46 }
 0x79f   : > { %v3326_v16 = vsub.f32 %v6881_v13, %v3316_v43  ;;  %v2544_v13 = vcombine.high %v6877_v51, %v6913_v35 }
 0x7a0   : > { %v6941_v17 = vpop.eup %5439  ;;  %v2916_v1 = vcombine.high %v2890_v14, %v2898_v48  ;;  %v2932_v18 = vcombine.high %v2906_v52, %v2914_v9  ;;  %v2915_v0 = vcombine.low %v2890_v14, %v2898_v48  ;;  %v2931_v59 = vcombine.low %v2906_v52, %v2914_v9 }
 0x7a1   : > { %v3340_v19 = vmul.f32 1.442695, %v3326_v16  ;;  %v2508_v26 = vpop.permute.xlu0 %2507  ;;  %v3353_v28 = vsel %vm3095_vm1, %v6941_v17, 0.0  ;;  %v2558_v58 = vrot.slane %v2544_v13, %v6654_v53 }
 0x7a2   : > { %3354 = vadd.xlane.f32.xlu1 %v3353_v28  ;;  %v2930_v29 = vrot.slane %v2916_v1, %v6663_v3  ;;  %v2946_v30 = vrot.slane %v2932_v18, %v6663_v3  ;;  %v2923_v46 = vrot.slane %v2915_v0, %v6663_v3  ;;  %v2939_v14 = vrot.slane %v2931_v59, %v6663_v3 }
 0x7a3   : > { %5443 = vpow2.f32 %v3340_v19 }
 0x7a4   : > { %v2949_v32 = vcombine.low %v2930_v29, %v2946_v30  ;;  %v2950_v15 = vcombine.high %v2930_v29, %v2946_v30  ;;  %v2947_v19 = vcombine.low %v2923_v46, %v2939_v14 }
 0x7a5   : > { %v6951_v34 = vpop.eup %5441  ;;  %v2532_v37 = vpop.permute.xlu0 %2531 }
 0x7a6   : > { %v2559_v38 = vcombine.low %v2508_v26, %v2532_v37  ;;  %v2560_v39 = vcombine.high %v2508_v26, %v2532_v37  ;;  %v3356_v40 = vsel %vm3095_vm1, %v6951_v34, 0.0  ;;  %v2948_v26 = vcombine.high %v2923_v46, %v2939_v14 }
 0x7a7   : > { %3357 = vadd.xlane.f32.xlu0 %v3356_v40  ;;  %v3325_v40 = vsub.f32 %v6865_v56, %v6911_v27 }
 0x7a8   : > { %v2567_v42 = vrot.slane %v2559_v38, %v6654_v53  ;;  %v2574_v61 = vrot.slane %v2560_v39, %v6654_v53 }
 0x7a9   : > { %v2512_v56 = vpop.permute.xlu0 %2511 }
 0x7aa   : > { %v2575_v51 = vcombine.low %v2551_v41, %v2567_v42  ;;  %v2576_v35 = vcombine.high %v2551_v41, %v2567_v42  ;;  %v2591_v49 = vcombine.low %v2558_v58, %v2574_v61  ;;  %v2592_v10 = vcombine.high %v2558_v58, %v2574_v61  ;;  %v2514_v41 = vpop.permute.xlu1 %2513 }
 0x7ab   : > { %v3338_v58 = vmul.f32 1.442695, %v3325_v40 }
 0x7ac   : > { %v2583_v11 = vrot.slane %v2575_v51, %v6663_v3  ;;  %v2590_v62 = vrot.slane %v2576_v35, %v6663_v3  ;;  %v2599_v50 = vrot.slane %v2591_v49, %v6663_v3  ;;  %v2606_v23 = vrot.slane %v2592_v10, %v6663_v3 }
 0x7ad   : > { %v6963_v24 = vpop.eup %5443  ;;  %5445 = vpow2.f32 %v3338_v58  ;;  %v2524_v27 = vpop.permute.xlu0 %2523 }
 0x7ae   : > { %v2815_v60 = vcombine.low %v2583_v11, %v2590_v62  ;;  %v4789_v4 = vcombine.high %v2583_v11, %v2590_v62  ;;  %v2831_v5 = vcombine.low %v2599_v50, %v2606_v23  ;;  %v4790_v6 = vcombine.high %v2599_v50, %v2606_v23 }
 0x7af   : > { %v3362_v8 = vsel %vm3095_vm1, %v6963_v24, 0.0  ;;  %v2680_v50 = vcombine.high %v6899_v55, %v2524_v27 }
 0x7b0   : > { %v2822_v25 = vrot.slane %v2815_v60, %v6654_v53  ;;  %v2830_v63 = vrot.slane %v4789_v4, %v6654_v53  ;;  %v2838_v7 = vrot.slane %v2831_v5, %v6654_v53  ;;  %v2846_v12 = vrot.slane %v4790_v6, %v6654_v53  ;;  %3363 = vadd.xlane.f32.xlu0 %v3362_v8 }
 0x7b1   : > { %v2536_v10 = vpop.permute.xlu0 %2535  ;;  %v2694_v4 = vrot.slane %v2680_v50, %v6654_v53 }
 0x7b2   : > { %v2847_v54 = vcombine.low %v2822_v25, %v2830_v63  ;;  %v2863_v43 = vcombine.low %v2838_v7, %v2846_v12  ;;  %v2848_v48 = vcombine.high %v2822_v25, %v2830_v63  ;;  %v2864_v52 = vcombine.high %v2838_v7, %v2846_v12 }
 0x7b3   : > { %2537 = vrot.lane.b32.xlu1 %v6890_v2, %s5968_s28  ;;  %v2695_v11 = vcombine.low %v2512_v56, %v2536_v10  ;;  %v2696_v62 = vcombine.high %v2512_v56, %v2536_v10 }
 0x7b4   : > { %v2855_v9 = vrot.slane %v2847_v54, %v6663_v3  ;;  %v2871_v16 = vrot.slane %v2863_v43, %v6663_v3  ;;  %v2862_v1 = vrot.slane %v2848_v48, %v6663_v3  ;;  %v2878_v18 = vrot.slane %v2864_v52, %v6663_v3 }
 0x7b5   : > { %v2703_v23 = vrot.slane %v2695_v11, %v6654_v53  ;;  %v2710_v59 = vrot.slane %v2696_v62, %v6654_v53 }
 0x7b6   : > { %v2879_v28 = vcombine.low %v2855_v9, %v2871_v16  ;;  %v2880_v29 = vcombine.high %v2855_v9, %v2871_v16  ;;  %v2881_v30 = vcombine.low %v2862_v1, %v2878_v18  ;;  %v2882_v57 = vcombine.high %v2862_v1, %v2878_v18 }
 0x7b7   : > { %v2727_v8 = vcombine.low %v2694_v4, %v2710_v59  ;;  %v2728_v25 = vcombine.high %v2694_v4, %v2710_v59 }
 0x7b8   : > { %v3087_v13 = vpack.c.bf16 %v2947_v19, %v2879_v28  ;;  %v3089_v37 = vpack.c.bf16 %v2948_v26, %v2880_v29  ;;  %v6979_v38 = vpack.c.bf16 %v2949_v32, %v2881_v30  ;;  %v6981_v39 = vpack.c.bf16 %v2950_v15, %v2882_v57  ;;  %v6988_v32 = vpop.eup %5445 }
 0x7b9   : > { %v3359_v15 = vsel %vm3095_vm1, %v6988_v32, 0.0  ;;  %v2742_v54 = vrot.slane %v2728_v25, %v6663_v3 }
 0x7ba   : > { %5063 = vmatpush3.bf16.msra.mxu0 %v3087_v13  ;;  %5071 = vmatpush3.bf16.msra.mxu1 %v3089_v37 }
 0x7bb   : > { %5064 = vmatprep.subr.bf16.mxu0 %v5964_v21  ;;  %5072 = vmatprep.subr.bf16.mxu1 %v5964_v21 }
 0x7c8   : > { %v3319_v42 = vpop.xlane.xlu1 %3318 }
 0x7c9   : > { %v3327_v61 = vsub.f32 %v6886_v20, %v3319_v42  ;;  %v2679_v20 = vcombine.low %v6899_v55, %v2524_v27  ;;  %v2735_v55 = vrot.slane %v2727_v8, %v6663_v3 }
 0x7cb   : > { %v3342_v51 = vmul.f32 1.442695, %v3327_v61  ;;  %v2687_v0 = vrot.slane %v2679_v20, %v6654_v53  ;;  %v2967_v16 = vcombine.low %v2735_v55, %v2742_v54  ;;  %v4794_v1 = vcombine.high %v2735_v55, %v2742_v54 }
 0x7cc   : > { %v2526_v60 = vpop.permute.xlu1 %2525 }
 0x7cd   : > { %5447 = vpow2.f32 %v3342_v51  ;;  %v2711_v5 = vcombine.low %v2687_v0, %v2703_v23  ;;  %v2712_v6 = vcombine.high %v2687_v0, %v2703_v23  ;;  %v2747_v14 = vcombine.low %v6890_v2, %v2526_v60 }
 0x7ce   : > { %v2748_v48 = vcombine.high %v6890_v2, %v2526_v60  ;;  %v2974_v40 = vrot.slane %v2967_v16, %v6654_v53  ;;  %v2982_v58 = vrot.slane %v4794_v1, %v6654_v53 }
 0x7cf   : > { %v2719_v7 = vrot.slane %v2711_v5, %v6663_v3  ;;  %v2726_v12 = vrot.slane %v2712_v6, %v6663_v3  ;;  %v2755_v29 = vrot.slane %v2747_v14, %v6654_v53 }
 0x7d0   : > { %v2762_v30 = vrot.slane %v2748_v48, %v6654_v53  ;;  %v2999_v11 = vcombine.low %v2974_v40, %v2982_v58 }
 0x7d1   : > { %v2951_v46 = vcombine.low %v2719_v7, %v2726_v12  ;;  %v4793_v9 = vcombine.high %v2719_v7, %v2726_v12 }
 0x7d2   : > { %v3007_v25 = vrot.slane %v2999_v11, %v6663_v3 }
 0x7d3   : > { %v2958_v28 = vrot.slane %v2951_v46, %v6654_v53  ;;  %v2966_v37 = vrot.slane %v4793_v9, %v6654_v53 }
 0x7d5   : > { %v2983_v10 = vcombine.low %v2958_v28, %v2966_v37  ;;  %v2984_v48 = vcombine.high %v2958_v28, %v2966_v37 }
 0x7d7   : > { %v6992_v35 = vpop.eup %5447  ;;  %3360 = vadd.xlane.f32.xlu1 %v3359_v15  ;;  %v2991_v8 = vrot.slane %v2983_v10, %v6663_v3  ;;  %v2998_v28 = vrot.slane %v2984_v48, %v6663_v3 }
 0x7d8   : > { %v3365_v49 = vsel %vm3095_vm1, %v6992_v35, 0.0 }
 0x7d9   : > { %3366 = vadd.xlane.f32.xlu0 %v3365_v49  ;;  %v3015_v9 = vcombine.low %v2991_v8, %v3007_v25  ;;  %v3016_v1 = vcombine.high %v2991_v8, %v3007_v25 }
 0x81b   : > { %v3346_v52 = vpop.xlane.xlu0 %3345 }
 0x81c   : > { %5449 = vrcp.f32 %v3346_v52  ;;  %v3000_v52 = vcombine.high %v2974_v40, %v2982_v58 }
 0x81d   : > { %v3349_v63 = vpop.xlane.xlu1 %3348 }
 0x81e   : > { %5451 = vrcp.f32 %v3349_v63  ;;  %v3014_v37 = vrot.slane %v3000_v52, %v6663_v3 }
 0x826   : > { %v5450_v5 = vpop.eup %5449 }
 0x828   : > { %v5452_v6 = vpop.eup %5451 }
 0x82b   : > { %v3352_v57 = vpop.xlane.xlu0 %3351 }
 0x82f   : > { %v3355_v43 = vpop.xlane.xlu1 %3354 }
 0x830   : > { %5453 = vrcp.f32 %v3355_v43 }
 0x831   : > { %5455 = vrcp.f32 %v3352_v57 }
 0x833   : > { %v2538_v18 = vpop.permute.xlu1 %2537 }
 0x834   : > { %v2763_v19 = vcombine.low %v2514_v41, %v2538_v18  ;;  %v2764_v26 = vcombine.high %v2514_v41, %v2538_v18 }
 0x836   : > { %v2771_v13 = vrot.slane %v2763_v19, %v6654_v53  ;;  %v2778_v2 = vrot.slane %v2764_v26, %v6654_v53  ;;  %v3377_v19 = vmul.f32 %v5452_v6, %v6919_v31 }
 0x838   : > { %v2779_v41 = vcombine.low %v2755_v29, %v2771_v13  ;;  %v2780_v42 = vcombine.high %v2755_v29, %v2771_v13  ;;  %v2795_v61 = vcombine.low %v2762_v30, %v2778_v2  ;;  %v2796_v51 = vcombine.high %v2762_v30, %v2778_v2 }
 0x839   : > { %v3376_v2 = vmul.f32 %v5450_v5, %v6915_v36  ;;  %v3017_v36 = vcombine.low %v2998_v28, %v3014_v37 }
 0x83a   : > { %v2787_v15 = vrot.slane %v2779_v41, %v6663_v3  ;;  %v2794_v49 = vrot.slane %v2780_v42, %v6663_v3  ;;  %v2803_v56 = vrot.slane %v2795_v61, %v6663_v3  ;;  %v2810_v27 = vrot.slane %v2796_v51, %v6663_v3  ;;  %v5454_v12 = vpop.eup %5453 }
 0x83b   : > { %v5456_v14 = vpop.eup %5455  ;;  %v3379_v26 = vmul.f32 %v5454_v12, %v6941_v17  ;;  %v3384_v40 = vpack.c.bf16 %v3377_v19, %v3376_v2 }
 0x83c   : > { %v3019_v20 = vcombine.low %v2787_v15, %v2794_v49  ;;  %v4795_v62 = vcombine.high %v2787_v15, %v2794_v49  ;;  %v3035_v50 = vcombine.low %v2803_v56, %v2810_v27  ;;  %v4796_v23 = vcombine.high %v2803_v56, %v2810_v27 }
 0x83d   : > { %v3378_v41 = vmul.f32 %v5456_v14, %v6932_v33  ;;  %v3018_v33 = vcombine.high %v2998_v28, %v3014_v37 }
 0x83e   : > { %v3026_v0 = vrot.slane %v3019_v20, %v6654_v53  ;;  %v3034_v59 = vrot.slane %v4795_v62, %v6654_v53  ;;  %v3042_v60 = vrot.slane %v3035_v50, %v6654_v53  ;;  %v3050_v4 = vrot.slane %v4796_v23, %v6654_v53 }
 0x83f   : > { %v3385_v31 = vpack.c.bf16 %v3379_v26, %v3378_v41 }
 0x840   : > { %v3051_v63 = vcombine.low %v3026_v0, %v3034_v59  ;;  %v3067_v7 = vcombine.low %v3042_v60, %v3050_v4  ;;  %v3052_v43 = vcombine.high %v3026_v0, %v3034_v59  ;;  %v3068_v46 = vcombine.high %v3042_v60, %v3050_v4  ;;  %v5381_v59 = vld [vmem:[#allocation14] sm:$0xff]   ;;  %v5386_v60 = vld [vmem:[#allocation14 + $0x28] sm:$0xff]  }
 0x842   : > { %v3059_v55 = vrot.slane %v3051_v63, %v6663_v3  ;;  %v3075_v54 = vrot.slane %v3067_v7, %v6663_v3  ;;  %v3066_v57 = vrot.slane %v3052_v43, %v6663_v3  ;;  %v3082_v13 = vrot.slane %v3068_v46, %v6663_v3 }
 0x844   : > { %v3083_v16 = vcombine.low %v3059_v55, %v3075_v54  ;;  %v3084_v18 = vcombine.high %v3059_v55, %v3075_v54  ;;  %v3085_v17 = vcombine.low %v3066_v57, %v3082_v13  ;;  %v3086_v58 = vcombine.high %v3066_v57, %v3082_v13 }
 0x846   : > { %v3088_v29 = vpack.c.bf16 %v3083_v16, %v3015_v9  ;;  %v3090_v30 = vpack.c.bf16 %v3084_v18, %v3016_v1  ;;  %v3092_v42 = vpack.c.bf16 %v3085_v17, %v3017_v36  ;;  %v3094_v61 = vpack.c.bf16 %v3086_v58, %v3018_v33 }
 0x848   : > { %5065 = vmatpush3.bf16.msra.mxu0 %v3088_v29  ;;  %5073 = vmatpush3.bf16.msra.mxu1 %v3090_v30 }
 0x849   : > { %5078 = vmatprep.subr.bf16.mxu0 %v5964_v21  ;;  %5086 = vmatprep.subr.bf16.mxu1 %v5964_v21 }
 0x84b   : > { %5067 = vmatmul.mubr.msk.bf16.vlgmr.msra.gmra.mrb[12].mxu0 %vm3095_vm1, %v3384_v40  ;;  %5075 = vmatmul.mubr.msk.bf16.vlgmr.msra.gmra.mrb[24].mxu1 %vm3095_vm1, %v3385_v31 }
 0x84c   : > { %5079 = vmatpush3.bf16.msra.mxu0 %v6979_v38  ;;  %5087 = vmatpush3.bf16.msra.mxu1 %v6981_v39  ;;  %v3358_v38 = vpop.xlane.xlu0 %3357 }
 0x84d   : > { %5080 = vmatprep.subr.bf16.mxu0 %v5964_v21  ;;  %5088 = vmatprep.subr.bf16.mxu1 %v5964_v21  ;;  %5457 = vrcp.f32 %v3358_v38 }
 0x84e   : > { %5082 = vmatprep.mubr.msk.bf16.mxu0 %vm5965_vm0, %v5964_v21  ;;  %5090 = vmatprep.mubr.msk.bf16.mxu1 %vm5965_vm0, %v5964_v21 }
 0x850   : > { %5081 = vmatpush3.bf16.msra.mxu0 %v3092_v42  ;;  %5089 = vmatpush3.bf16.msra.mxu1 %v3094_v61  ;;  %v3364_v39 = vpop.xlane.xlu0 %3363 }
 0x851   : > { %5094 = vmatprep.subr.bf16.mxu0 %v5964_v21  ;;  %5459 = vrcp.f32 %v3364_v39 }
 0x857   : > { %v5458_v49 = vpop.eup %5457 }
 0x858   : > { %v3380_v10 = vmul.f32 %v5458_v49, %v6951_v34  ;;  %v5382_v34 = vld [vmem:[#allocation14 + $0x8] sm:$0xff]  }
 0x85b   : > { %v5460_v56 = vpop.eup %5459 }
 0x85c   : > { %v3382_v62 = vmul.f32 %v5460_v56, %v6963_v24  ;;  %v5383_v24 = vld [vmem:[#allocation14 + $0x10] sm:$0xff]  }
 0x864   : > { %v3361_v51 = vpop.xlane.xlu1 %3360 }
 0x865   : > { %5461 = vrcp.f32 %v3361_v51 }
 0x866   : > { %v3367_v15 = vpop.xlane.xlu0 %3366 }
 0x867   : > { %5463 = vrcp.f32 %v3367_v15 }
 0x86f   : > { %v5462_v27 = vpop.eup %5461 }
 0x870   : > { %v3381_v11 = vmul.f32 %v5462_v27, %v6988_v32  ;;  %v5384_v32 = vld [vmem:[#allocation14 + $0x18] sm:$0xff]  }
 0x871   : > { %v5464_v20 = vpop.eup %5463 }
 0x872   : > { %v3383_v50 = vmul.f32 %v5464_v20, %v6992_v35  ;;  %v3386_v23 = vpack.c.bf16 %v3381_v11, %v3380_v10  ;;  %v5385_v35 = vld [vmem:[#allocation14 + $0x20] sm:$0xff]  }
 0x874   : > { %5083 = vmatmul.mubr.msk.bf16.vlgmr.msra.gmra.mrb[16].mxu0 %vm3095_vm1, %v3386_v23  ;;  %v3387_v0 = vpack.c.bf16 %v3383_v50, %v3382_v62 }
 0x875   : > { %5110 = vmatprep.mubr.msk.bf16.mxu0 %vm5965_vm0, %v5964_v21  ;;  %5095 = vmatpush3.bf16.msra.mxu0 %v5381_v59 }
 0x876   : > { %5091 = vmatmul.mubr.msk.bf16.vlgmr.msra.gmra.mrb[28].mxu1 %vm3095_vm1, %v3387_v0  ;;  %5096 = vmatprep.subr.bf16.mxu0 %v5964_v21 }
 0x877   : > { %4147 = vmatprep.mubr.bf16.mxu1 %v5963_v22 }
 0x879   : > { %5097 = vmatpush3.bf16.msra.mxu0 %v5382_v34 }
 0x87a   : > { %5098 = vmatprep.subr.bf16.mxu0 %v5964_v21 }
 0x87d   : > { %5099 = vmatpush3.bf16.msra.mxu0 %v5383_v24 }
 0x87e   : > { %5100 = vmatprep.subr.bf16.mxu0 %v5964_v21 }
 0x881   : > { %5101 = vmatpush3.bf16.msra.mxu0 %v5384_v32 }
 0x882   : > { %5102 = vmatprep.subr.bf16.mxu0 %v5964_v21 }
 0x885   : > { %5103 = vmatpush3.bf16.msra.mxu0 %v5385_v35 }
 0x886   : > { %5104 = vmatprep.subr.bf16.mxu0 %v5964_v21 }
 0x889   : > { %5105 = vmatpush3.bf16.msra.mxu0 %v5386_v60 }
 0x88a   : > { %5106 = vmatprep.subr.bf16.mxu0 %v5964_v21 }
 0x91e   : > { %v3425_v22 = vpop.f32.mrb[12].mxu0  ;;  %v3469_v4 = vpop.f32.mrb[24].mxu1 }
 0x91f   : > { %v5068_v5 = vpop.f32.mrb[13].mxu0  ;;  %v5076_v6 = vpop.f32.mrb[25].mxu1 }
 0x920   : > { %v3428_v8 = vpop.f32.mrb[14].mxu0  ;;  %v3472_v25 = vpop.f32.mrb[26].mxu1  ;;  %v5387_v5 = vld [vmem:[#allocation14 + $0x30] sm:$0xff]  }
 0x921   : > { %v5069_v63 = vpop.f32.mrb[15].mxu0  ;;  %v5077_v7 = vpop.f32.mrb[27].mxu1  ;;  %5107 = vmatpush3.bf16.msra.mxu0 %v5387_v5  ;;  %v5391_v5 = vld [vmem:[#allocation19 + $0x4] ss:$8 sps:$4 sm:$0xff]  }
 0x922   : > { %5108 = vmatprep.subr.bf16.mxu0 %v5964_v21  ;;  %4115 = vmatprep.subr.bf16.mxu1 %v5391_v5 }
 0x947   : > { %v3513_v12 = vpop.f32.mrb[16].mxu0 }
 0x948   : > { %v3564_v55 = vcombine.low %v3425_v22, %v3513_v12  ;;  %v3565_v54 = vcombine.high %v3425_v22, %v3513_v12  ;;  %v5084_v43 = vpop.f32.mrb[17].mxu0 }
 0x949   : > { %v3516_v46 = vpop.f32.mrb[18].mxu0  ;;  %v3557_v14 = vpop.f32.mrb[28].mxu1 }
 0x94a   : > { %v3632_v48 = vcombine.low %v3428_v8, %v3516_v46  ;;  %v3633_v52 = vcombine.high %v3428_v8, %v3516_v46  ;;  %v5085_v9 = vpop.f32.mrb[19].mxu0  ;;  %v5092_v16 = vpop.f32.mrb[29].mxu1  ;;  %v3580_v1 = vcombine.low %v3469_v4, %v3557_v14  ;;  %v3581_v18 = vcombine.high %v3469_v4, %v3557_v14 }
 0x94b   : > { %v3560_v19 = vpop.f32.mrb[30].mxu1  ;;  %v3572_v57 = vrot.slane %v3564_v55, %v6654_v53  ;;  %v3579_v13 = vrot.slane %v3565_v54, %v6654_v53 }
 0x94c   : > { %v3648_v26 = vcombine.low %v3472_v25, %v3560_v19  ;;  %v3649_v29 = vcombine.high %v3472_v25, %v3560_v19  ;;  %v5093_v30 = vpop.f32.mrb[31].mxu1  ;;  %v3588_v2 = vrot.slane %v3580_v1, %v6654_v53  ;;  %v3595_v41 = vrot.slane %v3581_v18, %v6654_v53 }
 0x94d   : > { %v3640_v28 = vrot.slane %v3632_v48, %v6654_v53  ;;  %v3647_v37 = vrot.slane %v3633_v52, %v6654_v53 }
 0x94e   : > { %v3656_v40 = vrot.slane %v3648_v26, %v6654_v53  ;;  %v3663_v31 = vrot.slane %v3649_v29, %v6654_v53  ;;  %v3596_v17 = vcombine.low %v3572_v57, %v3588_v2  ;;  %v3597_v58 = vcombine.high %v3572_v57, %v3588_v2  ;;  %v5388_v29 = vld [vmem:[#allocation14 + $0x38] sm:$0xff]  }
 0x94f   : > { %v3612_v36 = vcombine.low %v3579_v13, %v3595_v41  ;;  %v3613_v33 = vcombine.high %v3579_v13, %v3595_v41  ;;  %5109 = vmatpush3.bf16.msra.mxu0 %v5388_v29  ;;  %v5412_v29 = vld [vmem:[#allocation19 + $0x74] ss:$8 sps:$4 sm:$0xff]  }
 0x950   : > { %v3664_v42 = vcombine.low %v3640_v28, %v3656_v40  ;;  %v3665_v61 = vcombine.high %v3640_v28, %v3656_v40  ;;  %v3680_v38 = vcombine.low %v3647_v37, %v3663_v31  ;;  %v3681_v39 = vcombine.high %v3647_v37, %v3663_v31 }
 0x951   : > { %v3604_v51 = vrot.slane %v3596_v17, %v6663_v3  ;;  %v3611_v15 = vrot.slane %v3597_v58, %v6663_v3  ;;  %v3620_v49 = vrot.slane %v3612_v36, %v6663_v3  ;;  %v3627_v56 = vrot.slane %v3613_v33, %v6663_v3 }
 0x952   : > { %v3672_v27 = vrot.slane %v3664_v42, %v6663_v3  ;;  %v3679_v10 = vrot.slane %v3665_v61, %v6663_v3  ;;  %v3688_v11 = vrot.slane %v3680_v38, %v6663_v3  ;;  %v3695_v20 = vrot.slane %v3681_v39, %v6663_v3 }
 0x953   : > { %v3700_v62 = vcombine.low %v3604_v51, %v3611_v15  ;;  %v4805_v50 = vcombine.high %v3604_v51, %v3611_v15  ;;  %v3716_v23 = vcombine.low %v3620_v49, %v3627_v56  ;;  %v4806_v0 = vcombine.high %v3620_v49, %v3627_v56 }
 0x954   : > { %v3768_v59 = vcombine.low %v3672_v27, %v3679_v10  ;;  %v4807_v34 = vcombine.high %v3672_v27, %v3679_v10  ;;  %v3784_v24 = vcombine.low %v3688_v11, %v3695_v20  ;;  %v4808_v32 = vcombine.high %v3688_v11, %v3695_v20 }
 0x955   : > { %v3707_v35 = vrot.slane %v3700_v62, %v6654_v53  ;;  %v3715_v60 = vrot.slane %v4805_v50, %v6654_v53  ;;  %v3723_v22 = vrot.slane %v3716_v23, %v6654_v53  ;;  %v3731_v4 = vrot.slane %v4806_v0, %v6654_v53  ;;  %v3885_v62 = vld [vmem:[#allocation11 + $0x7] ss:$0 sm:$0xff] }
 0x956   : > { %v3775_v6 = vrot.slane %v3768_v59, %v6654_v53  ;;  %v3783_v8 = vrot.slane %v4807_v34, %v6654_v53  ;;  %v3791_v25 = vrot.slane %v3784_v24, %v6654_v53  ;;  %v3799_v63 = vrot.slane %v4808_v32, %v6654_v53  ;;  %v5473_v32 = vld [vmem:[%s6496_s1] sm:$0xff] }
 0x957   : > { %v3733_v7 = vcombine.high %v3707_v35, %v3715_v60  ;;  %v3749_v12 = vcombine.high %v3723_v22, %v3731_v4  ;;  %v3732_v55 = vcombine.low %v3707_v35, %v3715_v60  ;;  %v3748_v54 = vcombine.low %v3723_v22, %v3731_v4  ;;  %v5474_v60 = vld [vmem:[%s6496_s1 + $0x8] sm:$0xff]  ;;  %s5821_s1 = scalar_lea.vmem %s7122_s9, 256 }
 0x958   : > { %v3801_v43 = vcombine.high %v3775_v6, %v3783_v8  ;;  %v3817_v46 = vcombine.high %v3791_v25, %v3799_v63  ;;  %v3800_v14 = vcombine.low %v3775_v6, %v3783_v8  ;;  %v3816_v48 = vcombine.low %v3791_v25, %v3799_v63  ;;  %v5389_v4 = vld [vmem:[#allocation19] ss:$8 sps:$4 sm:$0xff]   ;;  %v5394_v6 = vld [vmem:[#allocation19 + $0x14] ss:$8 sps:$4 sm:$0xff]   ;;  %v5392_v8 = vld [vmem:[#allocation19 + $0x10] ss:$8 sps:$4 sm:$0xff]   ;;  %p5822_p12 = scmp.ne.s32.totalorder %s7122_s9, %s5821_s1  ;;  %p5829_p8 = scmp.lt.s32.totalorder %s5827_s2, %s5821_s1 }
 0x959   : > { %v3747_v52 = vrot.slane %v3733_v7, %v6663_v3  ;;  %v3763_v9 = vrot.slane %v3749_v12, %v6663_v3  ;;  %v3740_v16 = vrot.slane %v3732_v55, %v6663_v3  ;;  %v3756_v1 = vrot.slane %v3748_v54, %v6663_v3  ;;  %4116 = vmatpush1.bf16.msra.mxu1 %v5389_v4 }
 0x95a   : > { %v3815_v53 = vrot.slane %v3801_v43, %v6663_v3  ;;  %v3831_v18 = vrot.slane %v3817_v46, %v6663_v3  ;;  %v3808_v19 = vrot.slane %v3800_v14, %v6663_v3  ;;  %v3824_v26 = vrot.slane %v3816_v48, %v6663_v3  ;;  %4117 = vmatprep.subr.bf16.mxu1 %v5394_v6  ;;  %v5397_v14 = vld [vmem:[#allocation19 + $0x24] ss:$8 sps:$4 sm:$0xff]   ;;  %v5395_v48 = vld [vmem:[#allocation19 + $0x20] ss:$8 sps:$4 sm:$0xff]   ;;  %p5823_p7 = pnand %p5822_p12, %p7316_p6  ;;  %p5830_p11 = por %p5829_p8, %p5828_p3 }
 0x95b   : > { %v3766_v30 = vcombine.low %v3747_v52, %v3763_v9  ;;  %v3764_v57 = vcombine.low %v3740_v16, %v3756_v1  ;;  %v3765_v21 = vcombine.high %v3740_v16, %v3756_v1  ;;  %v3767_v13 = vcombine.high %v3747_v52, %v3763_v9  ;;  %v5400_v52 = vld [vmem:[#allocation19 + $0x34] ss:$8 sps:$4 sm:$0xff]   ;;  %v5398_v9 = vld [vmem:[#allocation19 + $0x30] ss:$8 sps:$4 sm:$0xff]   ;;  %v5403_v16 = vld [vmem:[#allocation19 + $0x44] ss:$8 sps:$4 sm:$0xff]  }
 0x95c   : > { %v3834_v2 = vcombine.low %v3815_v53, %v3831_v18  ;;  %v3833_v41 = vcombine.high %v3808_v19, %v3824_v26  ;;  %v3832_v28 = vcombine.low %v3808_v19, %v3824_v26  ;;  %v3835_v37 = vcombine.high %v3815_v53, %v3831_v18  ;;  %v5401_v1 = vld [vmem:[#allocation19 + $0x40] ss:$8 sps:$4 sm:$0xff]   ;;  %v5406_v53 = vld [vmem:[#allocation19 + $0x54] ss:$8 sps:$4 sm:$0xff]   ;;  %v5404_v18 = vld [vmem:[#allocation19 + $0x50] ss:$8 sps:$4 sm:$0xff]   ;;  %p5824_p4 = pneg %p5823_p7 }
 0x95d   : > { %4118 = vmatpush1.bf16.msra.mxu1 %v5392_v8  ;;  %v5409_v19 = vld [vmem:[#allocation19 + $0x64] ss:$8 sps:$4 sm:$0xff]   ;;  %v5407_v26 = vld [vmem:[#allocation19 + $0x60] ss:$8 sps:$4 sm:$0xff]  }
 0x95e   : > { %v5281_v40 = vpack.i.bf16 %v3834_v2, %v3766_v30  ;;  %v5276_v31 = vpack.i.bf16 %v3833_v41, %v3765_v21  ;;  %v5286_v17 = vpack.i.bf16 %v3835_v37, %v3767_v13  ;;  %4119 = vmatprep.subr.bf16.mxu1 %v5397_v14  ;;  %v5410_v30 = vld [vmem:[#allocation19 + $0x70] ss:$8 sps:$4 sm:$0xff]   ;;  %v5414_v21 = vld [vmem:[#allocation20] sm:$0xff]   ;;  %v5415_v13 = vld [vmem:[#allocation20 + $0x48] sm:$0xff]   ;;  %p5831_p13 = pnand %p5830_p11, %p5824_p4 }
 0x95f   : > { %v5416_v2 = vld [vmem:[#allocation20 + $0x8] sm:$0xff]   ;;  %v5417_v41 = vld [vmem:[#allocation20 + $0x50] sm:$0xff]   ;;  %v5419_v37 = vld [vmem:[#allocation20 + $0x58] sm:$0xff]  }
 0x960   : > { %5282 = vrot.lane.b32.xlu1 %v5281_v40, %s5967_s21  ;;  %5277 = vrot.lane.b32.xlu0 %v5276_v31, %s5968_s28  ;;  %v5420_v40 = vld [vmem:[#allocation20 + $0x18] sm:$0xff]   ;;  %v5421_v31 = vld [vmem:[#allocation20 + $0x60] sm:$0xff]  }
 0x961   : > { %4120 = vmatpush1.bf16.msra.mxu1 %v5395_v48  ;;  %v4196_v48 = vld [vmem:[#allocation11 + $0x13] ss:$0 sm:$0xff] }
 0x962   : > { %4121 = vmatprep.subr.bf16.mxu1 %v5400_v52 }
 0x964   : > { %5287 = vrot.lane.b32.xlu1 %v5286_v17, %s5966_s16  ;;  %v5422_v17 = vld [vmem:[#allocation20 + $0x20] sm:$0xff]  }
 0x965   : > { %4122 = vmatpush1.bf16.msra.mxu1 %v5398_v9 }
 0x966   : > { %4123 = vmatprep.subr.bf16.mxu1 %v5403_v16 }
 0x969   : > { %4124 = vmatpush1.bf16.msra.mxu1 %v5401_v1 }
 0x96a   : > { %4125 = vmatprep.subr.bf16.mxu1 %v5406_v53 }
 0x96d   : > { %4126 = vmatpush1.bf16.msra.mxu1 %v5404_v18 }
 0x96e   : > { %4127 = vmatprep.subr.bf16.mxu1 %v5409_v19 }
 0x971   : > { %4128 = vmatpush1.bf16.msra.mxu1 %v5407_v26 }
 0x972   : > { %4129 = vmatprep.subr.bf16.mxu1 %v5412_v29 }
 0x975   : > { %4130 = vmatpush1.bf16.msra.mxu1 %v5410_v30 }
 0x9d2   : > { %v5283_v3 = vpop.permute.xlu1 %5282  ;;  %v5278_v58 = vpop.permute.xlu0 %5277 }
 0x9d3   : > { %v5280_v36 = vunpack.i.h.bf16 %v5278_v58  ;;  %v5279_v33 = vunpack.i.l.bf16 %v5278_v58  ;;  %v5285_v42 = vunpack.i.h.bf16 %v5283_v3  ;;  %v5284_v61 = vunpack.i.l.bf16 %v5283_v3  ;;  %v5423_v3 = vld [vmem:[#allocation20 + $0x68] sm:$0xff]  }
 0x9d5   : > { %v3860_v38 = vsel %vm3095_vm1, %v3764_v57, %v5279_v33  ;;  %v3861_v39 = vsel %vm3095_vm1, %v3832_v28, %v5280_v36  ;;  %v5413_v57 = vld [vmem:[#allocation20 + $0x40] sm:$0xff]   ;;  %v5418_v28 = vld [vmem:[#allocation20 + $0x10] sm:$0xff]  }
 0x9d6   : > { %v5288_v51 = vpop.permute.xlu1 %5287  ;;  %v3863_v56 = vsel %vm3862_vm2, %v3860_v38, %v5284_v61  ;;  %v3864_v27 = vsel %vm3862_vm2, %v3861_v39, %v5285_v42  ;;  %4948 = vmatprep.subr.bf16.mxu0 %v5413_v57 }
 0x9d7   : > { %v5290_v15 = vunpack.i.h.bf16 %v5288_v51  ;;  %v5289_v49 = vunpack.i.l.bf16 %v5288_v51 }
 0x9d9   : > { %v3866_v10 = vsel %vm3865_vm3, %v3863_v56, %v5289_v49  ;;  %v3867_v11 = vsel %vm3865_vm3, %v3864_v27, %v5290_v15  ;;  %v3999_v15 = vld [vmem:[#allocation11 + $0x10] ss:$0 sm:$0xff] }
 0x9da   : > { %v3868_v20 = vpack.c.bf16 %v3867_v11, %v3866_v10  ;;  %v4002_v10 = vld [vmem:[#allocation11 + $0x11] ss:$0 sm:$0xff] }
 0x9dc   : > { %5111 = vmatmul.mubr.bf16.vlgmr.msra.gmra.mrb[20].mxu0 %v3868_v20 }
 0x9dd   : > { %4949 = vmatpush3.bf16.msra.mxu0 %v5414_v21 }
 0x9de   : > { %4950 = vmatprep.subr.bf16.mxu0 %v5415_v13 }
 0x9e1   : > { %4951 = vmatpush3.bf16.msra.mxu0 %v5416_v2 }
 0x9e2   : > { %4952 = vmatprep.subr.bf16.mxu0 %v5417_v41 }
 0x9e5   : > { %4953 = vmatpush3.bf16.msra.mxu0 %v5418_v28 }
 0x9e6   : > { %4954 = vmatprep.subr.bf16.mxu0 %v5419_v37 }
 0x9e9   : > { %4955 = vmatpush3.bf16.msra.mxu0 %v5420_v40 }
 0x9ea   : > { %4956 = vmatprep.subr.bf16.mxu0 %v5421_v31 }
 0x9ed   : > { %4957 = vmatpush3.bf16.msra.mxu0 %v5422_v17 }
 0x9ee   : > { %4958 = vmatprep.subr.bf16.mxu0 %v5423_v3 }
 0xaaf   : > { %v3968_v50 = vpop.f32.mrb[20].mxu0 }
 0xab0   : > { %v3969_v23 = vadd.f32 %v3968_v50, %v3885_v62  ;;  %v5112_v0 = vpop.f32.mrb[21].mxu0 }
 0xab1   : > { %v3971_v59 = vpop.f32.mrb[22].mxu0  ;;  %v5425_v0 = vld [vmem:[#allocation20 + $0x70] sm:$0xff]  }
 0xab2   : > { %v3972_v34 = vadd.f32 %v3971_v59, %v3885_v62  ;;  %v5113_v24 = vpop.f32.mrb[23].mxu0  ;;  %v3975_v35 = vadd.f32 %v5473_v32, %v3969_v23  ;;  %v5424_v23 = vld [vmem:[#allocation20 + $0x28] sm:$0xff]   ;;  %v5426_v59 = vld [vmem:[#allocation20 + $0x30] sm:$0xff]  }
 0xab3   : > { %4959 = vmatpush3.bf16.msra.mxu0 %v5424_v23  ;;  %v5428_v24 = vld [vmem:[#allocation20 + $0x38] sm:$0xff]  }
 0xab4   : > { %3977 = vadd.xlane.f32.xlu1 %v3975_v35  ;;  %v3976_v22 = vadd.f32 %v5474_v60, %v3972_v34  ;;  %4960 = vmatprep.subr.bf16.mxu0 %v5425_v0  ;;  %v5427_v34 = vld [vmem:[#allocation20 + $0x78] sm:$0xff]  }
 0xab5   : > { %v4023_v32 = vld [vmem:[#allocation11 + $0x12] ss:$8 sm:$0x3] }
 0xab6   : > { %3979 = vadd.xlane.f32.xlu0 %v3976_v22  ;;  %v4032_v60 = vrot.slane %v4023_v32, %v1054_v47 }
 0xab7   : > { %4961 = vmatpush3.bf16.msra.mxu0 %v5426_v59 }
 0xab8   : > { %4962 = vmatprep.subr.bf16.mxu0 %v5427_v34 }
 0xabb   : > { %4963 = vmatpush3.bf16.msra.mxu0 %v5428_v24 }
 0xb41   : > { %v3978_v25 = vpop.xlane.xlu1 %3977 }
 0xb42   : > { %v3981_v63 = vmul.f32 0.0078125, %v3978_v25 }
 0xb43   : > { %v3980_v7 = vpop.xlane.xlu0 %3979 }
 0xb44   : > { %v3983_v12 = vsub.f32 %v3975_v35, %v3981_v63  ;;  %v3982_v55 = vmul.f32 0.0078125, %v3980_v7  ;;  %v4028_v35 = vrot.slane %v4023_v32, %v1050_v45 }
 0xb46   : > { %v7104_v54 = vsub.f32 %v3976_v22, %v3982_v55  ;;  %v3985_v43 = vmul.f32 %v3983_v12, %v3983_v12 }
 0xb48   : > { %3987 = vadd.xlane.f32.xlu0 %v3985_v43  ;;  %v3986_v46 = vmul.f32 %v7104_v54, %v7104_v54 }
 0xb4c   : > { %3989 = vadd.xlane.f32.xlu0 %v3986_v46 }
 0xbd5   : > { %v3988_v58 = vpop.xlane.xlu0 %3987 }
 0xbd6   : > { %v3991_v36 = vmul.f32 0.0078125, %v3988_v58 }
 0xbd8   : > { %v3993_v33 = vadd.f32 1e-05, %v3991_v36 }
 0xbd9   : > { %v3990_v42 = vpop.xlane.xlu0 %3989 }
 0xbda   : > { %5465 = vrsqrt.f32 %v3993_v33  ;;  %v3992_v61 = vmul.f32 0.0078125, %v3990_v42 }
 0xbdc   : > { %v3994_v38 = vadd.f32 1e-05, %v3992_v61 }
 0xbde   : > { %5467 = vrsqrt.f32 %v3994_v38 }
 0xbe4   : > { %v5466_v39 = vpop.eup %5465 }
 0xbe5   : > { %v3997_v51 = vmul.f32 %v5466_v39, %v3983_v12 }
 0xbe7   : > { %v4000_v27 = vmul.f32 %v3999_v15, %v3997_v51 }
 0xbe8   : > { %v5468_v49 = vpop.eup %5467 }
 0xbe9   : > { %v3998_v56 = vmul.f32 %v5468_v49, %v7104_v54  ;;  %v4003_v20 = vadd.f32 %v4002_v10, %v4000_v27 }
 0xbeb   : > { %v4001_v11 = vmul.f32 %v3999_v15, %v3998_v56 }
 0xbed   : > { %v4004_v62 = vadd.f32 %v4002_v10, %v4001_v11 }
 0xbef   : > { %v4005_v50 = vpack.c.bf16 %v4004_v62, %v4003_v20 }
 0xbf1   : > { %4148 = vmatmul.mubr.bf16.vlgmr.msra.gmra.mrb[32].mxu1 %v4005_v50 }
 0xcc4   : > { %v4149_v22 = vpop.f32.mrb[32].mxu1 }
 0xcc5   : > { %v4150_v4 = vadd.f32 %v4149_v22, %v4028_v35  ;;  %v4151_v5 = vpop.f32.mrb[33].mxu1 }
 0xcc6   : > { %v4152_v6 = vadd.f32 %v4151_v5, %v4032_v60  ;;  %v4153_v8 = vpop.f32.mrb[34].mxu1 }
 0xcc7   : > { %v4154_v25 = vadd.f32 %v4153_v8, %v4028_v35  ;;  %v4155_v63 = vpop.f32.mrb[35].mxu1  ;;  %v4158_v12 = vmax.f32 %v4150_v4, 0.0 }
 0xcc8   : > { %v4156_v7 = vadd.f32 %v4155_v63, %v4032_v60  ;;  %v4159_v54 = vmax.f32 %v4152_v6, 0.0 }
 0xcc9   : > { %v4160_v55 = vmax.f32 %v4154_v25, 0.0 }
 0xcca   : > { %v4161_v43 = vmax.f32 %v4156_v7, 0.0 }
 0xccb   : > { %v4162_v46 = vpack.c.bf16 %v4160_v55, %v4158_v12 }
 0xccc   : > { %v4163_v14 = vpack.c.bf16 %v4161_v43, %v4159_v54 }
 0xcce   : > { %4325 = vmatprep.mubr.bf16.mxu0 %v4163_v14 }
 0xccf   : > { %4326 = vmatmul.mubr.bf16.vlgmr.msra.gmra.mrb[24].mxu0 %v4162_v46 }
 0xda2   : > { %v4964_v45 = vpop.f32.mrb[24].mxu0 }
 0xda3   : > { %v4965_v44 = vpop.f32.mrb[25].mxu0 }
 0xda4   : > { %v4966_v47 = vadd.f32 %v4965_v44, %v4964_v45  ;;  %v4967_v52 = vpop.f32.mrb[26].mxu0 }
 0xda5   : > { %v4968_v9 = vpop.f32.mrb[27].mxu0 }
 0xda6   : > { %v4328_v16 = vadd.f32 %v4966_v47, %v4196_v48  ;;  %v4969_v1 = vadd.f32 %v4968_v9, %v4967_v52 }
 0xda8   : > { %v4331_v53 = vadd.f32 %v4969_v1, %v4196_v48  ;;  %v4334_v18 = vadd.f32 %v4328_v16, %v4003_v20 }
 0xdaa   : > { %4336 = vadd.xlane.f32.xlu1 %v4334_v18  ;;  %v4335_v19 = vadd.f32 %v4331_v53, %v4004_v62 }
 0xdac   : > { %4338 = vadd.xlane.f32.xlu0 %v4335_v19 }
 0xe37   : > { %v4337_v26 = vpop.xlane.xlu1 %4336 }
 0xe38   : > { %v4340_v29 = vmul.f32 0.0078125, %v4337_v26 }
 0xe39   : > { %v4339_v30 = vpop.xlane.xlu0 %4338 }
 0xe3a   : > { %v4342_v57 = vsub.f32 %v4334_v18, %v4340_v29  ;;  %v4341_v21 = vmul.f32 0.0078125, %v4339_v30 }
 0xe3c   : > { %v4343_v13 = vsub.f32 %v4335_v19, %v4341_v21  ;;  %v4344_v2 = vmul.f32 %v4342_v57, %v4342_v57 }
 0xe3e   : > { %4346 = vadd.xlane.f32.xlu1 %v4344_v2  ;;  %v4345_v41 = vmul.f32 %v4343_v13, %v4343_v13 }
 0xe40   : > { %4348 = vadd.xlane.f32.xlu0 %v4345_v41 }
 0xe41   : > { %5834 = shalt.err (!%p5831_p13)
}
 0xe42   : > { %s5835_s23 = scalar_lea.hbm %s7119_s24, 256  ;;  %s5839_s4 = scalar_lea.hbm %s7315_s6, 512 }
 0xe43   : > { %p5836_p5 = scmp.ne.s32.totalorder %s7119_s24, %s5835_s23  ;;  %p5840_p1 = scmp.lt.u32.totalorder %s7119_s24, %s7315_s6 }
 0xe44   : > { %p5841_p0 = scmp.lt.u32.totalorder %s5839_s4, %s5835_s23  ;;  %p5843_p12 = scmp.lt.u32.totalorder %s5835_s23, %s7119_s24 }
 0xe45   : > { %p5837_p9 = pnand %p5836_p5, %p7316_p6 }
 0xe46   : > { %p5842_p2 = por %p5841_p0, %p5840_p1 }
 0xe47   : > { %p5838_p10 = pneg %p5837_p9 }
 0xe48   : > { %p5844_p7 = por %p5843_p12, %p5842_p2 }
 0xe4a   : > { %p5845_p4 = pnand %p5844_p7, %p5838_p10 }
 0xe4c   : > { %5848 = shalt.err (!%p5845_p4)
}
 0xe4d   : > { %s5972_s21 = smov 128   ;;  %s5973_s28 = smov 8   ;;  %v4358_v36 = vld [vmem:[#allocation11 + $0x14] ss:$0 sm:$0xff]  ;;  %v4361_v61 = vld [vmem:[#allocation11 + $0x15] ss:$0 sm:$0xff] }
 0xe4e   : > { %5157 = dma.vmem_to_hbm [thread:$0]  (%p7316_p6), %s7122_s9, 256, %s7119_s24, %s4374_s13, %s5972_s21, %s5972_s21, %s5973_s28  }
 0xe4f   : > { %s718_s18 = scalar_lea.vmem [#allocation22], %s6492_s25  ;;  %s7317_s13 = sld [smem:[#allocation50_spill]] }
 0xe50   : > { %s4387_s14 = sshll.u32 %s718_s18, 4  ;;  %s4369_s29 = scalar_lea.sflag [#allocation4], %s6489_s15  ;;  %s7159_s14 = int_to_ptr.vmem [resolvable:$true] %s4387_s14 }
 0xe51   : > { %s5849_s5 = scalar_lea.vmem %s7159_s14, 256  ;;  %s5974_s25 = smov [#allocation22]  }
 0xe52   : > { %p5850_p3 = scmp.ne.s32.totalorder %s7159_s14, %s5849_s5  ;;  %s5853_s2 = sshll.u32 %s5974_s25, 4  ;;  %s5854_s2 = int_to_ptr.vmem [resolvable:$false] %s5853_s2 }
 0xe53   : > { %s5855_s17 = scalar_lea.vmem %s5854_s2, 512  ;;  %p5856_p13 = scmp.lt.s32.totalorder %s7159_s14, %s5854_s2 }
 0xe54   : > { %p5851_p8 = pnand %p5850_p3, %p7316_p6  ;;  %p5857_p5 = scmp.lt.s32.totalorder %s5855_s17, %s5849_s5 }
 0xe55   : > { %s7157_s1 = scalar_lea.hbm %s7317_s13, %s4862_s30 }
 0xe56   : > { %p5852_p11 = pneg %p5851_p8  ;;  %p5858_p9 = por %p5857_p5, %p5856_p13 }
 0xe58   : > { %p5859_p10 = pnand %p5858_p9, %p5852_p11 }
 0xecb   : > { %v4347_v28 = vpop.xlane.xlu1 %4346 }
 0xecc   : > { %v4350_v37 = vmul.f32 0.0078125, %v4347_v28 }
 0xecd   : > { %v4349_v40 = vpop.xlane.xlu0 %4348 }
 0xece   : > { %v4352_v31 = vadd.f32 1e-05, %v4350_v37  ;;  %v4351_v17 = vmul.f32 0.0078125, %v4349_v40 }
 0xed0   : > { %5469 = vrsqrt.f32 %v4352_v31  ;;  %v4353_v3 = vadd.f32 1e-05, %v4351_v17 }
 0xed2   : > { %5471 = vrsqrt.f32 %v4353_v3 }
 0xeda   : > { %v5470_v58 = vpop.eup %5469 }
 0xedb   : > { %v4356_v33 = vmul.f32 %v5470_v58, %v4342_v57 }
 0xedc   : > { %v5472_v42 = vpop.eup %5471 }
 0xedd   : > { %v4359_v38 = vmul.f32 %v4358_v36, %v4356_v33  ;;  %v4357_v39 = vmul.f32 %v5472_v42, %v4343_v13 }
 0xedf   : > { %v4362_v51 = vadd.f32 %v4361_v61, %v4359_v38  ;;  %v4360_v15 = vmul.f32 %v4358_v36, %v4357_v39 }
 0xee1   : > { %v4363_v49 = vadd.f32 %v4361_v61, %v4360_v15  ;;  %4364 = vst [vmem:[%s718_s18] sm:$0xff] %v4362_v51 }
 0xee3   : > { %4365 = vst [vmem:[%s718_s18 + $0x8] sm:$0xff] %v4363_v49 }
 0xee4   : > { %5862 = shalt.err (!%p5859_p10)
}
 0xee5   : > { %s5863_s30 = scalar_lea.hbm %s7157_s1, 256  ;;  %s5867_s7 = scalar_lea.hbm %s7317_s13, 512 }
 0xee6   : > { %p5864_p1 = scmp.ne.s32.totalorder %s7157_s1, %s5863_s30  ;;  %p5868_p12 = scmp.lt.u32.totalorder %s7157_s1, %s7317_s13 }
 0xee7   : > { %p5869_p7 = scmp.lt.u32.totalorder %s5867_s7, %s5863_s30  ;;  %p5871_p3 = scmp.lt.u32.totalorder %s5863_s30, %s7157_s1 }
 0xee8   : > { %p5865_p0 = pnand %p5864_p1, %p7316_p6 }
 0xee9   : > { %p5870_p4 = por %p5869_p7, %p5868_p12 }
 0xeea   : > { %p5866_p2 = pneg %p5865_p0 }
 0xeeb   : > { %p5872_p8 = por %p5871_p3, %p5870_p4 }
 0xeed   : > { %p5873_p11 = pnand %p5872_p8, %p5866_p2 }
 0xeef   : > { %5876 = shalt.err (!%p5873_p11)
}
 0xef0   : > { %5156 = dma.vmem_to_hbm [thread:$0]  (%p7316_p6), %s7159_s14, 256, %s7157_s1, %s4369_s29, %s5972_s21, %s5972_s21, %s5973_s28  }
 0xef1 PF: > { %s7318_s16 = sld [smem:[#allocation34_spill]]  ;;  %s7319_s18 = sld [smem:[#allocation41_spill]] }
 0xef2   : > { %s7320_s24 = sld [smem:[#allocation35_spill]] }
 0xef7   : > { %s4418_s9 = sand.u32 1, %s7318_s16   ;;  %p7321_p13 = scmp.ne.s32.totalorder %s7319_s18, 0 }
 0xef8   : > { %p7322_p5 = scmp.ge.s32.totalorder %s7320_s24, 2  ;;  %s4419_s5 = scalar_lea.sflag [#allocation4], %s4418_s9 }
 0xefa   : > { %p5199_p9 = pnand %p7322_p5, %p7321_p13 }
 0xefc   : > { %5922 = dma.done.wait (!%p5199_p9), %s4419_s5, 256  }
 0xefd   : > { %5924 = vsyncadd (!%p5199_p9), %s4419_s5, 4294967040  ;;  %s4428_s22 = scalar_lea.sflag [#allocation24], %s4418_s9 }
 0xefe   : > { %5926 = dma.done.wait (!%p5199_p9), %s4428_s22, 256  }
 0xeff   : > { %5928 = vsyncadd (!%p5199_p9), %s4428_s22, 4294967040  ;;  %s7323_s28 = sld [smem:[#allocation38_spill]]  ;;  %s7324_s15 = sld [smem:[#allocation39_spill]] }
 0xf00   : > { %s7325_s25 = smov %s5935_s26  ;;  %s7326_s26 = smov %s5939_s27 }
 0xf05   : > { %p40_p6 = scmp.ge.s32.totalorder %s7323_s28, 4   ;;  %s7327_s27 = smov %s7324_s15 }
 0xf07   :  { %42 = sbr.rel (!%p40_p6) target bundleno = 26 (0x1a), region = 211 }
 0xf0e   :  { %4433 = vsyncpa [#allocation3], 1 }
 0xf0f   :  { %4435 = vsyncpa [#allocation3 + $0x1], 1 }
 0xf10   :  { %4436 = vsyncpa [#allocation6], 1 }
 0xf11   :  { %4438 = vsyncpa [#allocation6 + $0x1], 1 }
 0xf12   :  { %4439 = vsyncpa [#allocation9], 1 }
 0xf13   :  { %4441 = vsyncpa [#allocation9 + $0x1], 1 }
 0xf14   :  { %4442 = vsyncpa [#allocation12], 1 }
 0xf15   :  { %4443 = vsyncpa [#allocation15], 1 }
 0xf16   :  { %4444 = vsyncpa [#allocation18], 1 }
 0xf17   :  { %4445 = vsyncpa [#allocation21], 1 }
 0xf18   :  { %4446 = vsyncpa [#allocation4], 1 }
 0xf19   :  { %4448 = vsyncpa [#allocation4 + $0x1], 1 }
 0xf1a   :  { %4449 = vsyncpa [#allocation24], 1 }
 0xf1b   :  { %4451 = vsyncpa [#allocation24 + $0x1], 1 }

</bundles_post_ra>
